<compile_context>
chip_gen: v7x
topology: tpu7x:2x2x1
jax: 0.10.0
libtpu: 0.0.40
codegen_flags: <defaults>
</compile_context>

<pallas_src>
import jax
import jax.numpy as jnp
from jax import lax
from jax.experimental import pallas as pl
from jax.experimental.pallas import tpu as pltpu


# ----------------------------- Pallas kernel --------------------------------
def decoder_fused_kernel(tok_ref,                               # (T*B, 1) int32
                         emb_ref, ctx_ref, h0_ref,              # VMEM inputs
                         w_x_ref, w_c_ref, b_x_ref,             # x / ctx gate weights
                         w_h_ref, b_h_ref,                      # h gate weights
                         w_lin_ref, b_lin_ref,                  # output projection
                         logp_ref, h_out_ref,                   # outputs
                         gx_scr, h_scr):                        # VMEM scratch
    T, B, H = h_scr.shape
    V = emb_ref.shape[0]
    TB = T * B
    mm = w_h_ref.dtype        # matmul-operand dtype (f32 or bf16); gate math stays f32

    # ---- 1) Batched one-hot embedding gather + x-side gate precompute --------
    # (off the recurrence path; M = T*B rows gives far better MXU fill than B)
    tok = tok_ref[...]                                                    # (T*B, 1)
    onehot = (tok == lax.broadcasted_iota(jnp.int32, (TB, V), 1)).astype(mm)
    emb = jnp.dot(onehot, emb_ref[...],
                  preferred_element_type=jnp.float32)                     # (T*B, ninp)
    gx = jnp.dot(emb.astype(mm), w_x_ref[...],
                 preferred_element_type=jnp.float32)                      # (T*B, 3H)
    gx_scr[...] = gx.reshape(T, B, 3 * H)

    # Context is constant over the whole sequence: its gate contribution plus
    # the folded r/z/i_n biases are computed once and reused every step.
    gc = jnp.dot(ctx_ref[...].astype(mm), w_c_ref[...],
                 preferred_element_type=jnp.float32) + b_x_ref[...]       # (B, 3H)

    # ---- 2) Serial GRU recurrence (h carried in vregs, unrolled time loop) ---
    def step(t, h):
        g_x = gx_scr[t] + gc                                              # (B, 3H)
        g_h = jnp.dot(h.astype(mm), w_h_ref[...],
                      preferred_element_type=jnp.float32) + b_h_ref[...]  # (B, 3H)
        r = jax.nn.sigmoid(g_x[:, 0:H] + g_h[:, 0:H])
        z = jax.nn.sigmoid(g_x[:, H:2 * H] + g_h[:, H:2 * H])
        n = jnp.tanh(g_x[:, 2 * H:3 * H] + r * g_h[:, 2 * H:3 * H])
        h_new = (1.0 - z) * n + z * h
        h_scr[t] = h_new                 # stash h_t for the batched projection
        return h_new

    h_final = lax.fori_loop(0, T, step, h0_ref[...].astype(jnp.float32),
                            unroll=True)
    h_out_ref[...] = h_final.astype(h_out_ref.dtype)

    # ---- 3) Batched output projection + log-softmax over all T*B rows --------
    h_all = h_scr[...].reshape(TB, H)
    logits = jnp.dot(h_all.astype(mm), w_lin_ref[...],
                     preferred_element_type=jnp.float32) + b_lin_ref[...]  # (T*B, V)
    m = jnp.max(logits, axis=1, keepdims=True)
    lse = m + jnp.log(jnp.sum(jnp.exp(logits - m), axis=1, keepdims=True))
    logp_ref[...] = (logits - lse).reshape(T, B, V).astype(logp_ref.dtype)


# ------------------------------ Wrappers -------------------------------------
def decoder_sequence(tokens, hidden0, context, packed):
    """Fused multi-step decode.

    tokens:  (T, B) int32 token ids (must be < ntoken).
    hidden0: (B, nhid) f32 initial hidden state.
    context: (B, nhid) f32 context (constant over the sequence).
    Returns (log_probs (T, B, ntoken) f32, final hidden (B, nhid) f32).
    """
    T, B = tokens.shape
    ntoken, ninp = packed["embedding"].shape
    nhid = hidden0.shape[1]

    vmem = pl.BlockSpec(memory_space=pltpu.MemorySpace.VMEM)

    call = pl.pallas_call(
        decoder_fused_kernel,
        out_shape=(
            jax.ShapeDtypeStruct((T, B, ntoken), jnp.float32),
            jax.ShapeDtypeStruct((B, nhid), jnp.float32),
        ),
        in_specs=[vmem] * 11,
        out_specs=(vmem, vmem),
        scratch_shapes=[
            pltpu.VMEM((T, B, 3 * nhid), jnp.float32),   # per-step x/ctx gate pre-acts
            pltpu.VMEM((T, B, nhid), jnp.float32),       # stashed hidden states h_t
        ],
    )
    return call(
        tokens.reshape(T * B, 1).astype(jnp.int32),
        packed["embedding"],
        context.astype(jnp.float32),
        hidden0.astype(jnp.float32),
        packed["w_x"], packed["w_c"], packed["b_x"],
        packed["w_h"], packed["b_h"],
        packed["w_lin_t"], packed["b_lin"],
    )


def decoder_step(token, hidden, context, packed):
    """Single-step forward matching the PyTorch module's (input, hidden, context)."""
    logp, h_new = decoder_sequence(token[None, :], hidden, context, packed)
    return logp[0], h_new


# --------------------------- Parameters ---------------------------------------
def init_raw_params(key, ntoken, ninp, nhid):
    """PyTorch-layout parameters (Embedding, GRUCell, Linear)."""
    ks = jax.random.split(key, 7)
    s = 1.0 / jnp.sqrt(nhid)
    u = lambda kk, shape: jax.random.uniform(kk, shape, jnp.float32, -s, s)
    return {
        "embedding": jax.random.normal(ks[0], (ntoken, ninp), jnp.float32),
        "w_ih": u(ks[1], (3 * nhid, ninp + nhid)),
        "b_ih": u(ks[2], (3 * nhid,)),
        "w_hh": u(ks[3], (3 * nhid, nhid)),
        "b_hh": u(ks[4], (3 * nhid,)),
        "w_lin": u(ks[5], (ntoken, nhid)),
        "b_lin": u(ks[6], (ntoken,)),
    }


def pack_decoder_params(raw, matmul_dtype=jnp.float32):
    """Repack PyTorch-layout weights for the fused kernel.

    Splits the GRUCell input weight into an emb part (w_x) and a context part
    (w_c), both mapping to gate columns [r | z | n].  r/z biases are folded
    (b_ih + b_hh) together with b_in into b_x; b_hn stays on the h side (b_h)
    because PyTorch applies it INSIDE the reset-gate product.
    Use matmul_dtype=jnp.bfloat16 on v5e/v6e/v7x for the native MXU path.
    """
    ntoken, ninp = raw["embedding"].shape
    H = raw["w_hh"].shape[1]
    f32 = jnp.float32

    w_ih_t = raw["w_ih"].T.astype(f32)          # (ninp + H, 3H), columns [r|z|n]
    w_x = w_ih_t[:ninp]                         # emb -> gates
    w_c = w_ih_t[ninp:]                         # ctx -> gates
    w_h = raw["w_hh"].T.astype(f32)             # (H, 3H), columns [r|z|n]

    b_x = jnp.concatenate([
        raw["b_ih"][0:2 * H] + raw["b_hh"][0:2 * H],   # folded r/z biases
        raw["b_ih"][2 * H:3 * H],                      # i_n bias
    ]).astype(f32)[None, :]                            # (1, 3H)
    b_h = jnp.concatenate([
        jnp.zeros((2 * H,), f32),
        raw["b_hh"][2 * H:3 * H],                      # h_n bias (inside r * (...))
    ]).astype(f32)[None, :]                            # (1, 3H)

    return {
        "embedding": raw["embedding"].astype(matmul_dtype),
        "w_x": w_x.astype(matmul_dtype),
        "w_c": w_c.astype(matmul_dtype),
        "b_x": b_x,
        "w_h": w_h.astype(matmul_dtype),
        "b_h": b_h,
        "w_lin_t": raw["w_lin"].T.astype(matmul_dtype),
        "b_lin": raw["b_lin"].astype(f32)[None, :],
    }


# ------------------------------ Reference -------------------------------------
def decoder_reference(tokens, hidden0, context, raw):
    """Pure-JAX per-step loop with PyTorch-layout weights."""
    H = hidden0.shape[1]
    h = hidden0
    outs = []
    for t in range(tokens.shape[0]):
        emb = jnp.take(raw["embedding"], tokens[t], axis=0)
        x = jnp.concatenate([emb, context], axis=1)
        gi = x @ raw["w_ih"].T + raw["b_ih"]
        gh = h @ raw["w_hh"].T + raw["b_hh"]
        i_r, i_z, i_n = gi[:, :H], gi[:, H:2 * H], gi[:, 2 * H:]
        h_r, h_z, h_n = gh[:, :H], gh[:, H:2 * H], gh[:, 2 * H:]
        r = jax.nn.sigmoid(i_r + h_r)
        z = jax.nn.sigmoid(i_z + h_z)
        n = jnp.tanh(i_n + r * h_n)
        h = (1.0 - z) * n + z * h
        logits = h @ raw["w_lin"].T + raw["b_lin"]
        outs.append(jax.nn.log_softmax(logits, axis=1))
    return jnp.stack(outs, axis=0), h


# -------------------------------- Main -----------------------------------------
if __name__ == "__main__":
    # Small, lane-aligned shapes consistent with the module
    # (vocab 512, ninp 128, lane-aligned nhid surrogate 128, batch 8, T 12).
    T, B, NTOKEN, NINP, NHID = 12, 8, 512, 128, 128

    key = jax.random.PRNGKey(0)
    kp, kt, kh, kc = jax.random.split(key, 4)

    raw = init_raw_params(kp, NTOKEN, NINP, NHID)
    tokens = jax.random.randint(kt, (T, B), 0, NTOKEN, dtype=jnp.int32)
    hidden0 = jax.random.normal(kh, (B, NHID), jnp.float32)
    context = jax.random.normal(kc, (B, NHID), jnp.float32)

    ref_lp, ref_h = decoder_reference(tokens, hidden0, context, raw)

    # --- f32 matmul path: tight correctness check -----------------------------
    packed_f32 = pack_decoder_params(raw, matmul_dtype=jnp.float32)
    log_probs, h_final = decoder_sequence(tokens, hidden0, context, packed_f32)
    jax.block_until_ready((log_probs, h_final))
    assert log_probs.shape == (T, B, NTOKEN) and h_final.shape == (B, NHID)
    err_lp = float(jnp.max(jnp.abs(log_probs - ref_lp)))
    err_h = float(jnp.max(jnp.abs(h_final - ref_h)))
    assert err_lp < 2e-3, f"log_probs mismatch (f32): max abs err {err_lp}"
    assert err_h < 2e-3, f"hidden mismatch (f32): max abs err {err_h}"

    # --- bf16 MXU-operand path (recommended on v5e/v6e/v7x): loose check ------
    packed_bf16 = pack_decoder_params(raw, matmul_dtype=jnp.bfloat16)
    lp_b, h_b = decoder_sequence(tokens, hidden0, context, packed_bf16)
    jax.block_until_ready((lp_b, h_b))
    assert float(jnp.max(jnp.abs(lp_b - ref_lp))) < 5e-1
    assert float(jnp.max(jnp.abs(h_b - ref_h))) < 2e-1

    # --- single-step API matching the original PyTorch forward signature ------
    lp0, h_step = decoder_step(tokens[0], hidden0, context, packed_f32)
    jax.block_until_ready((lp0, h_step))
    ref1_lp, ref1_h = decoder_reference(tokens[:1], hidden0, context, raw)
    assert float(jnp.max(jnp.abs(lp0 - ref1_lp[0]))) < 2e-3
    assert float(jnp.max(jnp.abs(h_step - ref1_h))) < 2e-3

    print("KERNEL_OK")
</pallas_src>

<mosaic_0001>
module attributes {stable_mosaic.version = 11 : i64} {
  func.func @decoder_fused_kernel(%arg0: memref<96x1xi32, #tpu.memory_space<vmem>>, %arg1: memref<512x128xf32, #tpu.memory_space<vmem>>, %arg2: memref<8x128xf32, #tpu.memory_space<vmem>>, %arg3: memref<8x128xf32, #tpu.memory_space<vmem>>, %arg4: memref<128x384xf32, #tpu.memory_space<vmem>>, %arg5: memref<128x384xf32, #tpu.memory_space<vmem>>, %arg6: memref<1x384xf32, #tpu.memory_space<vmem>>, %arg7: memref<128x384xf32, #tpu.memory_space<vmem>>, %arg8: memref<1x384xf32, #tpu.memory_space<vmem>>, %arg9: memref<128x512xf32, #tpu.memory_space<vmem>>, %arg10: memref<1x512xf32, #tpu.memory_space<vmem>>, %arg11: memref<12x8x512xf32, #tpu.memory_space<vmem>>, %arg12: memref<8x128xf32, #tpu.memory_space<vmem>>, %arg13: memref<12x8x384xf32, #tpu.memory_space<vmem>>, %arg14: memref<12x8x128xf32, #tpu.memory_space<vmem>>) attributes {dimension_semantics = [], scalar_prefetch = 0 : i64, scratch_operands = 2 : i64, tpu.core_type = #tpu.core_type<tc>} {
    %c0 = arith.constant 0 : index
    %c0_0 = arith.constant 0 : index
    %0 = vector.load %arg0[%c0, %c0_0] : memref<96x1xi32, #tpu.memory_space<vmem>>, vector<96x1xi32>
    %1 = tpu.iota {dimensions = array<i32: 1>} : vector<96x512xi32>
    %2 = vector.broadcast %0 : vector<96x1xi32> to vector<96x512xi32>
    %3 = arith.cmpi eq, %2, %1 : vector<96x512xi32>
    %4 = arith.extui %3 : vector<96x512xi1> to vector<96x512xi32>
    %5 = arith.sitofp %4 : vector<96x512xi32> to vector<96x512xf32>
    %c0_1 = arith.constant 0 : index
    %c0_2 = arith.constant 0 : index
    %6 = vector.load %arg1[%c0_1, %c0_2] : memref<512x128xf32, #tpu.memory_space<vmem>>, vector<512x128xf32>
    %cst = arith.constant dense<0.000000e+00> : vector<96x128xf32>
    %7 = tpu.matmul %5, %6, %cst {dimension_numbers = #tpu.dot_dimension_numbers<[1], [0], [0], [1], [0, 0, 1, 1], [], []>} : vector<96x512xf32>, vector<512x128xf32>, vector<96x128xf32> -> vector<96x128xf32>
    %c0_3 = arith.constant 0 : index
    %c0_4 = arith.constant 0 : index
    %8 = vector.load %arg4[%c0_3, %c0_4] : memref<128x384xf32, #tpu.memory_space<vmem>>, vector<128x384xf32>
    %cst_5 = arith.constant dense<0.000000e+00> : vector<96x384xf32>
    %9 = tpu.matmul %7, %8, %cst_5 {dimension_numbers = #tpu.dot_dimension_numbers<[1], [0], [0], [1], [0, 0, 1, 1], [], []>} : vector<96x128xf32>, vector<128x384xf32>, vector<96x384xf32> -> vector<96x384xf32>
    %10 = vector.shape_cast %9 : vector<96x384xf32> to vector<12x8x384xf32>
    %c0_6 = arith.constant 0 : index
    %c0_7 = arith.constant 0 : index
    %c0_8 = arith.constant 0 : index
    %11 = vector.load %arg13[%c0_6, %c0_7, %c0_8] : memref<12x8x384xf32, #tpu.memory_space<vmem>>, vector<12x8x384xf32>
    tpu.vector_store %arg13[%c0_6, %c0_7, %c0_8], %10 {strides = array<i32>} : memref<12x8x384xf32, #tpu.memory_space<vmem>>, vector<12x8x384xf32>,
    %c0_9 = arith.constant 0 : index
    %c0_10 = arith.constant 0 : index
    %12 = vector.load %arg2[%c0_9, %c0_10] : memref<8x128xf32, #tpu.memory_space<vmem>>, vector<8x128xf32>
    %c0_11 = arith.constant 0 : index
    %c0_12 = arith.constant 0 : index
    %13 = vector.load %arg5[%c0_11, %c0_12] : memref<128x384xf32, #tpu.memory_space<vmem>>, vector<128x384xf32>
    %cst_13 = arith.constant dense<0.000000e+00> : vector<8x384xf32>
    %14 = tpu.matmul %12, %13, %cst_13 {dimension_numbers = #tpu.dot_dimension_numbers<[1], [0], [0], [1], [0, 0, 1, 1], [], []>} : vector<8x128xf32>, vector<128x384xf32>, vector<8x384xf32> -> vector<8x384xf32>
    %c0_14 = arith.constant 0 : index
    %c0_15 = arith.constant 0 : index
    %15 = vector.load %arg6[%c0_14, %c0_15] : memref<1x384xf32, #tpu.memory_space<vmem>>, vector<1x384xf32>
    %16 = vector.broadcast %15 : vector<1x384xf32> to vector<8x384xf32>
    %17 = arith.addf %14, %16 : vector<8x384xf32>
    %c0_16 = arith.constant 0 : index
    %c0_17 = arith.constant 0 : index
    %18 = vector.load %arg3[%c0_16, %c0_17] : memref<8x128xf32, #tpu.memory_space<vmem>>, vector<8x128xf32>
    %c0_i32 = arith.constant 0 : i32
    %19 = arith.index_cast %c0_i32 : i32 to index
    %c0_18 = arith.constant 0 : index
    %c0_19 = arith.constant 0 : index
    %20 = vector.load %arg13[%19, %c0_18, %c0_19] : memref<12x8x384xf32, #tpu.memory_space<vmem>>, vector<1x8x384xf32>
    %21 = vector.shape_cast %20 : vector<1x8x384xf32> to vector<8x384xf32>
    %22 = arith.addf %21, %17 : vector<8x384xf32>
    %c0_20 = arith.constant 0 : index
    %c0_21 = arith.constant 0 : index
    %23 = vector.load %arg7[%c0_20, %c0_21] : memref<128x384xf32, #tpu.memory_space<vmem>>, vector<128x384xf32>
    %cst_22 = arith.constant dense<0.000000e+00> : vector<8x384xf32>
    %24 = tpu.matmul %18, %23, %cst_22 {dimension_numbers = #tpu.dot_dimension_numbers<[1], [0], [0], [1], [0, 0, 1, 1], [], []>} : vector<8x128xf32>, vector<128x384xf32>, vector<8x384xf32> -> vector<8x384xf32>
    %c0_23 = arith.constant 0 : index
    %c0_24 = arith.constant 0 : index
    %25 = vector.load %arg8[%c0_23, %c0_24] : memref<1x384xf32, #tpu.memory_space<vmem>>, vector<1x384xf32>
    %26 = vector.broadcast %25 : vector<1x384xf32> to vector<8x384xf32>
    %27 = arith.addf %24, %26 : vector<8x384xf32>
    %28 = vector.extract_strided_slice %22 {offsets = [0, 0], sizes = [8, 128], strides = [1, 1]} : vector<8x384xf32> to vector<8x128xf32>
    %29 = vector.extract_strided_slice %27 {offsets = [0, 0], sizes = [8, 128], strides = [1, 1]} : vector<8x384xf32> to vector<8x128xf32>
    %30 = arith.addf %28, %29 : vector<8x128xf32>
    %31 = arith.negf %30 : vector<8x128xf32>
    %32 = math.exp %31 : vector<8x128xf32>
    %cst_25 = arith.constant 1.000000e+00 : f32
    %33 = vector.broadcast %cst_25 : f32 to vector<8x128xf32>
    %34 = arith.addf %33, %32 : vector<8x128xf32>
    %35 = arith.divf %33, %34 : vector<8x128xf32>
    %36 = vector.extract_strided_slice %22 {offsets = [0, 128], sizes = [8, 128], strides = [1, 1]} : vector<8x384xf32> to vector<8x128xf32>
    %37 = vector.extract_strided_slice %27 {offsets = [0, 128], sizes = [8, 128], strides = [1, 1]} : vector<8x384xf32> to vector<8x128xf32>
    %38 = arith.addf %36, %37 : vector<8x128xf32>
    %39 = arith.negf %38 : vector<8x128xf32>
    %40 = math.exp %39 : vector<8x128xf32>
    %cst_26 = arith.constant 1.000000e+00 : f32
    %41 = vector.broadcast %cst_26 : f32 to vector<8x128xf32>
    %42 = arith.addf %41, %40 : vector<8x128xf32>
    %43 = arith.divf %41, %42 : vector<8x128xf32>
    %44 = vector.extract_strided_slice %22 {offsets = [0, 256], sizes = [8, 128], strides = [1, 1]} : vector<8x384xf32> to vector<8x128xf32>
    %45 = vector.extract_strided_slice %27 {offsets = [0, 256], sizes = [8, 128], strides = [1, 1]} : vector<8x384xf32> to vector<8x128xf32>
    %46 = arith.mulf %35, %45 : vector<8x128xf32>
    %47 = arith.addf %44, %46 : vector<8x128xf32>
    %48 = math.tanh %47 : vector<8x128xf32>
    %cst_27 = arith.constant 1.000000e+00 : f32
    %49 = vector.broadcast %cst_27 : f32 to vector<8x128xf32>
    %50 = arith.subf %49, %43 : vector<8x128xf32>
    %51 = arith.mulf %50, %48 : vector<8x128xf32>
    %52 = arith.mulf %43, %18 : vector<8x128xf32>
    %53 = arith.addf %51, %52 : vector<8x128xf32>
    %54 = arith.index_cast %c0_i32 : i32 to index
    %c0_28 = arith.constant 0 : index
    %c0_29 = arith.constant 0 : index
    %55 = vector.load %arg14[%54, %c0_28, %c0_29] : memref<12x8x128xf32, #tpu.memory_space<vmem>>, vector<1x8x128xf32>
    %56 = vector.shape_cast %55 : vector<1x8x128xf32> to vector<8x128xf32>
    %57 = vector.shape_cast %53 : vector<8x128xf32> to vector<1x8x128xf32>
    tpu.vector_store %arg14[%54, %c0_28, %c0_29], %57 {strides = array<i32>} : memref<12x8x128xf32, #tpu.memory_space<vmem>>, vector<1x8x128xf32>,
    %c1_i32 = arith.constant 1 : i32
    %58 = arith.index_cast %c1_i32 : i32 to index
    %c0_30 = arith.constant 0 : index
    %c0_31 = arith.constant 0 : index
    %59 = vector.load %arg13[%58, %c0_30, %c0_31] : memref<12x8x384xf32, #tpu.memory_space<vmem>>, vector<1x8x384xf32>
    %60 = vector.shape_cast %59 : vector<1x8x384xf32> to vector<8x384xf32>
    %61 = arith.addf %60, %17 : vector<8x384xf32>
    %c0_32 = arith.constant 0 : index
    %c0_33 = arith.constant 0 : index
    %62 = vector.load %arg7[%c0_32, %c0_33] : memref<128x384xf32, #tpu.memory_space<vmem>>, vector<128x384xf32>
    %cst_34 = arith.constant dense<0.000000e+00> : vector<8x384xf32>
    %63 = tpu.matmul %53, %62, %cst_34 {dimension_numbers = #tpu.dot_dimension_numbers<[1], [0], [0], [1], [0, 0, 1, 1], [], []>} : vector<8x128xf32>, vector<128x384xf32>, vector<8x384xf32> -> vector<8x384xf32>
    %c0_35 = arith.constant 0 : index
    %c0_36 = arith.constant 0 : index
    %64 = vector.load %arg8[%c0_35, %c0_36] : memref<1x384xf32, #tpu.memory_space<vmem>>, vector<1x384xf32>
    %65 = vector.broadcast %64 : vector<1x384xf32> to vector<8x384xf32>
    %66 = arith.addf %63, %65 : vector<8x384xf32>
    %67 = vector.extract_strided_slice %61 {offsets = [0, 0], sizes = [8, 128], strides = [1, 1]} : vector<8x384xf32> to vector<8x128xf32>
    %68 = vector.extract_strided_slice %66 {offsets = [0, 0], sizes = [8, 128], strides = [1, 1]} : vector<8x384xf32> to vector<8x128xf32>
    %69 = arith.addf %67, %68 : vector<8x128xf32>
    %70 = arith.negf %69 : vector<8x128xf32>
    %71 = math.exp %70 : vector<8x128xf32>
    %cst_37 = arith.constant 1.000000e+00 : f32
    %72 = vector.broadcast %cst_37 : f32 to vector<8x128xf32>
    %73 = arith.addf %72, %71 : vector<8x128xf32>
    %74 = arith.divf %72, %73 : vector<8x128xf32>
    %75 = vector.extract_strided_slice %61 {offsets = [0, 128], sizes = [8, 128], strides = [1, 1]} : vector<8x384xf32> to vector<8x128xf32>
    %76 = vector.extract_strided_slice %66 {offsets = [0, 128], sizes = [8, 128], strides = [1, 1]} : vector<8x384xf32> to vector<8x128xf32>
    %77 = arith.addf %75, %76 : vector<8x128xf32>
    %78 = arith.negf %77 : vector<8x128xf32>
    %79 = math.exp %78 : vector<8x128xf32>
    %cst_38 = arith.constant 1.000000e+00 : f32
    %80 = vector.broadcast %cst_38 : f32 to vector<8x128xf32>
    %81 = arith.addf %80, %79 : vector<8x128xf32>
    %82 = arith.divf %80, %81 : vector<8x128xf32>
    %83 = vector.extract_strided_slice %61 {offsets = [0, 256], sizes = [8, 128], strides = [1, 1]} : vector<8x384xf32> to vector<8x128xf32>
    %84 = vector.extract_strided_slice %66 {offsets = [0, 256], sizes = [8, 128], strides = [1, 1]} : vector<8x384xf32> to vector<8x128xf32>
    %85 = arith.mulf %74, %84 : vector<8x128xf32>
    %86 = arith.addf %83, %85 : vector<8x128xf32>
    %87 = math.tanh %86 : vector<8x128xf32>
    %cst_39 = arith.constant 1.000000e+00 : f32
    %88 = vector.broadcast %cst_39 : f32 to vector<8x128xf32>
    %89 = arith.subf %88, %82 : vector<8x128xf32>
    %90 = arith.mulf %89, %87 : vector<8x128xf32>
    %91 = arith.mulf %82, %53 : vector<8x128xf32>
    %92 = arith.addf %90, %91 : vector<8x128xf32>
    %93 = arith.index_cast %c1_i32 : i32 to index
    %c0_40 = arith.constant 0 : index
    %c0_41 = arith.constant 0 : index
    %94 = vector.load %arg14[%93, %c0_40, %c0_41] : memref<12x8x128xf32, #tpu.memory_space<vmem>>, vector<1x8x128xf32>
    %95 = vector.shape_cast %94 : vector<1x8x128xf32> to vector<8x128xf32>
    %96 = vector.shape_cast %92 : vector<8x128xf32> to vector<1x8x128xf32>
    tpu.vector_store %arg14[%93, %c0_40, %c0_41], %96 {strides = array<i32>} : memref<12x8x128xf32, #tpu.memory_space<vmem>>, vector<1x8x128xf32>,
    %c2_i32 = arith.constant 2 : i32
    %97 = arith.index_cast %c2_i32 : i32 to index
    %c0_42 = arith.constant 0 : index
    %c0_43 = arith.constant 0 : index
    %98 = vector.load %arg13[%97, %c0_42, %c0_43] : memref<12x8x384xf32, #tpu.memory_space<vmem>>, vector<1x8x384xf32>
    %99 = vector.shape_cast %98 : vector<1x8x384xf32> to vector<8x384xf32>
    %100 = arith.addf %99, %17 : vector<8x384xf32>
    %c0_44 = arith.constant 0 : index
    %c0_45 = arith.constant 0 : index
    %101 = vector.load %arg7[%c0_44, %c0_45] : memref<128x384xf32, #tpu.memory_space<vmem>>, vector<128x384xf32>
    %cst_46 = arith.constant dense<0.000000e+00> : vector<8x384xf32>
    %102 = tpu.matmul %92, %101, %cst_46 {dimension_numbers = #tpu.dot_dimension_numbers<[1], [0], [0], [1], [0, 0, 1, 1], [], []>} : vector<8x128xf32>, vector<128x384xf32>, vector<8x384xf32> -> vector<8x384xf32>
    %c0_47 = arith.constant 0 : index
    %c0_48 = arith.constant 0 : index
    %103 = vector.load %arg8[%c0_47, %c0_48] : memref<1x384xf32, #tpu.memory_space<vmem>>, vector<1x384xf32>
    %104 = vector.broadcast %103 : vector<1x384xf32> to vector<8x384xf32>
    %105 = arith.addf %102, %104 : vector<8x384xf32>
    %106 = vector.extract_strided_slice %100 {offsets = [0, 0], sizes = [8, 128], strides = [1, 1]} : vector<8x384xf32> to vector<8x128xf32>
    %107 = vector.extract_strided_slice %105 {offsets = [0, 0], sizes = [8, 128], strides = [1, 1]} : vector<8x384xf32> to vector<8x128xf32>
    %108 = arith.addf %106, %107 : vector<8x128xf32>
    %109 = arith.negf %108 : vector<8x128xf32>
    %110 = math.exp %109 : vector<8x128xf32>
    %cst_49 = arith.constant 1.000000e+00 : f32
    %111 = vector.broadcast %cst_49 : f32 to vector<8x128xf32>
    %112 = arith.addf %111, %110 : vector<8x128xf32>
    %113 = arith.divf %111, %112 : vector<8x128xf32>
    %114 = vector.extract_strided_slice %100 {offsets = [0, 128], sizes = [8, 128], strides = [1, 1]} : vector<8x384xf32> to vector<8x128xf32>
    %115 = vector.extract_strided_slice %105 {offsets = [0, 128], sizes = [8, 128], strides = [1, 1]} : vector<8x384xf32> to vector<8x128xf32>
    %116 = arith.addf %114, %115 : vector<8x128xf32>
    %117 = arith.negf %116 : vector<8x128xf32>
    %118 = math.exp %117 : vector<8x128xf32>
    %cst_50 = arith.constant 1.000000e+00 : f32
    %119 = vector.broadcast %cst_50 : f32 to vector<8x128xf32>
    %120 = arith.addf %119, %118 : vector<8x128xf32>
    %121 = arith.divf %119, %120 : vector<8x128xf32>
    %122 = vector.extract_strided_slice %100 {offsets = [0, 256], sizes = [8, 128], strides = [1, 1]} : vector<8x384xf32> to vector<8x128xf32>
    %123 = vector.extract_strided_slice %105 {offsets = [0, 256], sizes = [8, 128], strides = [1, 1]} : vector<8x384xf32> to vector<8x128xf32>
    %124 = arith.mulf %113, %123 : vector<8x128xf32>
    %125 = arith.addf %122, %124 : vector<8x128xf32>
    %126 = math.tanh %125 : vector<8x128xf32>
    %cst_51 = arith.constant 1.000000e+00 : f32
    %127 = vector.broadcast %cst_51 : f32 to vector<8x128xf32>
    %128 = arith.subf %127, %121 : vector<8x128xf32>
    %129 = arith.mulf %128, %126 : vector<8x128xf32>
    %130 = arith.mulf %121, %92 : vector<8x128xf32>
    %131 = arith.addf %129, %130 : vector<8x128xf32>
    %132 = arith.index_cast %c2_i32 : i32 to index
    %c0_52 = arith.constant 0 : index
    %c0_53 = arith.constant 0 : index
    %133 = vector.load %arg14[%132, %c0_52, %c0_53] : memref<12x8x128xf32, #tpu.memory_space<vmem>>, vector<1x8x128xf32>
    %134 = vector.shape_cast %133 : vector<1x8x128xf32> to vector<8x128xf32>
    %135 = vector.shape_cast %131 : vector<8x128xf32> to vector<1x8x128xf32>
    tpu.vector_store %arg14[%132, %c0_52, %c0_53], %135 {strides = array<i32>} : memref<12x8x128xf32, #tpu.memory_space<vmem>>, vector<1x8x128xf32>,
    %c3_i32 = arith.constant 3 : i32
    %136 = arith.index_cast %c3_i32 : i32 to index
    %c0_54 = arith.constant 0 : index
    %c0_55 = arith.constant 0 : index
    %137 = vector.load %arg13[%136, %c0_54, %c0_55] : memref<12x8x384xf32, #tpu.memory_space<vmem>>, vector<1x8x384xf32>
    %138 = vector.shape_cast %137 : vector<1x8x384xf32> to vector<8x384xf32>
    %139 = arith.addf %138, %17 : vector<8x384xf32>
    %c0_56 = arith.constant 0 : index
    %c0_57 = arith.constant 0 : index
    %140 = vector.load %arg7[%c0_56, %c0_57] : memref<128x384xf32, #tpu.memory_space<vmem>>, vector<128x384xf32>
    %cst_58 = arith.constant dense<0.000000e+00> : vector<8x384xf32>
    %141 = tpu.matmul %131, %140, %cst_58 {dimension_numbers = #tpu.dot_dimension_numbers<[1], [0], [0], [1], [0, 0, 1, 1], [], []>} : vector<8x128xf32>, vector<128x384xf32>, vector<8x384xf32> -> vector<8x384xf32>
    %c0_59 = arith.constant 0 : index
    %c0_60 = arith.constant 0 : index
    %142 = vector.load %arg8[%c0_59, %c0_60] : memref<1x384xf32, #tpu.memory_space<vmem>>, vector<1x384xf32>
    %143 = vector.broadcast %142 : vector<1x384xf32> to vector<8x384xf32>
    %144 = arith.addf %141, %143 : vector<8x384xf32>
    %145 = vector.extract_strided_slice %139 {offsets = [0, 0], sizes = [8, 128], strides = [1, 1]} : vector<8x384xf32> to vector<8x128xf32>
    %146 = vector.extract_strided_slice %144 {offsets = [0, 0], sizes = [8, 128], strides = [1, 1]} : vector<8x384xf32> to vector<8x128xf32>
    %147 = arith.addf %145, %146 : vector<8x128xf32>
    %148 = arith.negf %147 : vector<8x128xf32>
    %149 = math.exp %148 : vector<8x128xf32>
    %cst_61 = arith.constant 1.000000e+00 : f32
    %150 = vector.broadcast %cst_61 : f32 to vector<8x128xf32>
    %151 = arith.addf %150, %149 : vector<8x128xf32>
    %152 = arith.divf %150, %151 : vector<8x128xf32>
    %153 = vector.extract_strided_slice %139 {offsets = [0, 128], sizes = [8, 128], strides = [1, 1]} : vector<8x384xf32> to vector<8x128xf32>
    %154 = vector.extract_strided_slice %144 {offsets = [0, 128], sizes = [8, 128], strides = [1, 1]} : vector<8x384xf32> to vector<8x128xf32>
    %155 = arith.addf %153, %154 : vector<8x128xf32>
    %156 = arith.negf %155 : vector<8x128xf32>
    %157 = math.exp %156 : vector<8x128xf32>
    %cst_62 = arith.constant 1.000000e+00 : f32
    %158 = vector.broadcast %cst_62 : f32 to vector<8x128xf32>
    %159 = arith.addf %158, %157 : vector<8x128xf32>
    %160 = arith.divf %158, %159 : vector<8x128xf32>
    %161 = vector.extract_strided_slice %139 {offsets = [0, 256], sizes = [8, 128], strides = [1, 1]} : vector<8x384xf32> to vector<8x128xf32>
    %162 = vector.extract_strided_slice %144 {offsets = [0, 256], sizes = [8, 128], strides = [1, 1]} : vector<8x384xf32> to vector<8x128xf32>
    %163 = arith.mulf %152, %162 : vector<8x128xf32>
    %164 = arith.addf %161, %163 : vector<8x128xf32>
    %165 = math.tanh %164 : vector<8x128xf32>
    %cst_63 = arith.constant 1.000000e+00 : f32
    %166 = vector.broadcast %cst_63 : f32 to vector<8x128xf32>
    %167 = arith.subf %166, %160 : vector<8x128xf32>
    %168 = arith.mulf %167, %165 : vector<8x128xf32>
    %169 = arith.mulf %160, %131 : vector<8x128xf32>
    %170 = arith.addf %168, %169 : vector<8x128xf32>
    %171 = arith.index_cast %c3_i32 : i32 to index
    %c0_64 = arith.constant 0 : index
    %c0_65 = arith.constant 0 : index
    %172 = vector.load %arg14[%171, %c0_64, %c0_65] : memref<12x8x128xf32, #tpu.memory_space<vmem>>, vector<1x8x128xf32>
    %173 = vector.shape_cast %172 : vector<1x8x128xf32> to vector<8x128xf32>
    %174 = vector.shape_cast %170 : vector<8x128xf32> to vector<1x8x128xf32>
    tpu.vector_store %arg14[%171, %c0_64, %c0_65], %174 {strides = array<i32>} : memref<12x8x128xf32, #tpu.memory_space<vmem>>, vector<1x8x128xf32>,
    %c4_i32 = arith.constant 4 : i32
    %175 = arith.index_cast %c4_i32 : i32 to index
    %c0_66 = arith.constant 0 : index
    %c0_67 = arith.constant 0 : index
    %176 = vector.load %arg13[%175, %c0_66, %c0_67] : memref<12x8x384xf32, #tpu.memory_space<vmem>>, vector<1x8x384xf32>
    %177 = vector.shape_cast %176 : vector<1x8x384xf32> to vector<8x384xf32>
    %178 = arith.addf %177, %17 : vector<8x384xf32>
    %c0_68 = arith.constant 0 : index
    %c0_69 = arith.constant 0 : index
    %179 = vector.load %arg7[%c0_68, %c0_69] : memref<128x384xf32, #tpu.memory_space<vmem>>, vector<128x384xf32>
    %cst_70 = arith.constant dense<0.000000e+00> : vector<8x384xf32>
    %180 = tpu.matmul %170, %179, %cst_70 {dimension_numbers = #tpu.dot_dimension_numbers<[1], [0], [0], [1], [0, 0, 1, 1], [], []>} : vector<8x128xf32>, vector<128x384xf32>, vector<8x384xf32> -> vector<8x384xf32>
    %c0_71 = arith.constant 0 : index
    %c0_72 = arith.constant 0 : index
    %181 = vector.load %arg8[%c0_71, %c0_72] : memref<1x384xf32, #tpu.memory_space<vmem>>, vector<1x384xf32>
    %182 = vector.broadcast %181 : vector<1x384xf32> to vector<8x384xf32>
    %183 = arith.addf %180, %182 : vector<8x384xf32>
    %184 = vector.extract_strided_slice %178 {offsets = [0, 0], sizes = [8, 128], strides = [1, 1]} : vector<8x384xf32> to vector<8x128xf32>
    %185 = vector.extract_strided_slice %183 {offsets = [0, 0], sizes = [8, 128], strides = [1, 1]} : vector<8x384xf32> to vector<8x128xf32>
    %186 = arith.addf %184, %185 : vector<8x128xf32>
    %187 = arith.negf %186 : vector<8x128xf32>
    %188 = math.exp %187 : vector<8x128xf32>
    %cst_73 = arith.constant 1.000000e+00 : f32
    %189 = vector.broadcast %cst_73 : f32 to vector<8x128xf32>
    %190 = arith.addf %189, %188 : vector<8x128xf32>
    %191 = arith.divf %189, %190 : vector<8x128xf32>
    %192 = vector.extract_strided_slice %178 {offsets = [0, 128], sizes = [8, 128], strides = [1, 1]} : vector<8x384xf32> to vector<8x128xf32>
    %193 = vector.extract_strided_slice %183 {offsets = [0, 128], sizes = [8, 128], strides = [1, 1]} : vector<8x384xf32> to vector<8x128xf32>
    %194 = arith.addf %192, %193 : vector<8x128xf32>
    %195 = arith.negf %194 : vector<8x128xf32>
    %196 = math.exp %195 : vector<8x128xf32>
    %cst_74 = arith.constant 1.000000e+00 : f32
    %197 = vector.broadcast %cst_74 : f32 to vector<8x128xf32>
    %198 = arith.addf %197, %196 : vector<8x128xf32>
    %199 = arith.divf %197, %198 : vector<8x128xf32>
    %200 = vector.extract_strided_slice %178 {offsets = [0, 256], sizes = [8, 128], strides = [1, 1]} : vector<8x384xf32> to vector<8x128xf32>
    %201 = vector.extract_strided_slice %183 {offsets = [0, 256], sizes = [8, 128], strides = [1, 1]} : vector<8x384xf32> to vector<8x128xf32>
    %202 = arith.mulf %191, %201 : vector<8x128xf32>
    %203 = arith.addf %200, %202 : vector<8x128xf32>
    %204 = math.tanh %203 : vector<8x128xf32>
    %cst_75 = arith.constant 1.000000e+00 : f32
    %205 = vector.broadcast %cst_75 : f32 to vector<8x128xf32>
    %206 = arith.subf %205, %199 : vector<8x128xf32>
    %207 = arith.mulf %206, %204 : vector<8x128xf32>
    %208 = arith.mulf %199, %170 : vector<8x128xf32>
    %209 = arith.addf %207, %208 : vector<8x128xf32>
    %210 = arith.index_cast %c4_i32 : i32 to index
    %c0_76 = arith.constant 0 : index
    %c0_77 = arith.constant 0 : index
    %211 = vector.load %arg14[%210, %c0_76, %c0_77] : memref<12x8x128xf32, #tpu.memory_space<vmem>>, vector<1x8x128xf32>
    %212 = vector.shape_cast %211 : vector<1x8x128xf32> to vector<8x128xf32>
    %213 = vector.shape_cast %209 : vector<8x128xf32> to vector<1x8x128xf32>
    tpu.vector_store %arg14[%210, %c0_76, %c0_77], %213 {strides = array<i32>} : memref<12x8x128xf32, #tpu.memory_space<vmem>>, vector<1x8x128xf32>,
    %c5_i32 = arith.constant 5 : i32
    %214 = arith.index_cast %c5_i32 : i32 to index
    %c0_78 = arith.constant 0 : index
    %c0_79 = arith.constant 0 : index
    %215 = vector.load %arg13[%214, %c0_78, %c0_79] : memref<12x8x384xf32, #tpu.memory_space<vmem>>, vector<1x8x384xf32>
    %216 = vector.shape_cast %215 : vector<1x8x384xf32> to vector<8x384xf32>
    %217 = arith.addf %216, %17 : vector<8x384xf32>
    %c0_80 = arith.constant 0 : index
    %c0_81 = arith.constant 0 : index
    %218 = vector.load %arg7[%c0_80, %c0_81] : memref<128x384xf32, #tpu.memory_space<vmem>>, vector<128x384xf32>
    %cst_82 = arith.constant dense<0.000000e+00> : vector<8x384xf32>
    %219 = tpu.matmul %209, %218, %cst_82 {dimension_numbers = #tpu.dot_dimension_numbers<[1], [0], [0], [1], [0, 0, 1, 1], [], []>} : vector<8x128xf32>, vector<128x384xf32>, vector<8x384xf32> -> vector<8x384xf32>
    %c0_83 = arith.constant 0 : index
    %c0_84 = arith.constant 0 : index
    %220 = vector.load %arg8[%c0_83, %c0_84] : memref<1x384xf32, #tpu.memory_space<vmem>>, vector<1x384xf32>
    %221 = vector.broadcast %220 : vector<1x384xf32> to vector<8x384xf32>
    %222 = arith.addf %219, %221 : vector<8x384xf32>
    %223 = vector.extract_strided_slice %217 {offsets = [0, 0], sizes = [8, 128], strides = [1, 1]} : vector<8x384xf32> to vector<8x128xf32>
    %224 = vector.extract_strided_slice %222 {offsets = [0, 0], sizes = [8, 128], strides = [1, 1]} : vector<8x384xf32> to vector<8x128xf32>
    %225 = arith.addf %223, %224 : vector<8x128xf32>
    %226 = arith.negf %225 : vector<8x128xf32>
    %227 = math.exp %226 : vector<8x128xf32>
    %cst_85 = arith.constant 1.000000e+00 : f32
    %228 = vector.broadcast %cst_85 : f32 to vector<8x128xf32>
    %229 = arith.addf %228, %227 : vector<8x128xf32>
    %230 = arith.divf %228, %229 : vector<8x128xf32>
    %231 = vector.extract_strided_slice %217 {offsets = [0, 128], sizes = [8, 128], strides = [1, 1]} : vector<8x384xf32> to vector<8x128xf32>
    %232 = vector.extract_strided_slice %222 {offsets = [0, 128], sizes = [8, 128], strides = [1, 1]} : vector<8x384xf32> to vector<8x128xf32>
    %233 = arith.addf %231, %232 : vector<8x128xf32>
    %234 = arith.negf %233 : vector<8x128xf32>
    %235 = math.exp %234 : vector<8x128xf32>
    %cst_86 = arith.constant 1.000000e+00 : f32
    %236 = vector.broadcast %cst_86 : f32 to vector<8x128xf32>
    %237 = arith.addf %236, %235 : vector<8x128xf32>
    %238 = arith.divf %236, %237 : vector<8x128xf32>
    %239 = vector.extract_strided_slice %217 {offsets = [0, 256], sizes = [8, 128], strides = [1, 1]} : vector<8x384xf32> to vector<8x128xf32>
    %240 = vector.extract_strided_slice %222 {offsets = [0, 256], sizes = [8, 128], strides = [1, 1]} : vector<8x384xf32> to vector<8x128xf32>
    %241 = arith.mulf %230, %240 : vector<8x128xf32>
    %242 = arith.addf %239, %241 : vector<8x128xf32>
    %243 = math.tanh %242 : vector<8x128xf32>
    %cst_87 = arith.constant 1.000000e+00 : f32
    %244 = vector.broadcast %cst_87 : f32 to vector<8x128xf32>
    %245 = arith.subf %244, %238 : vector<8x128xf32>
    %246 = arith.mulf %245, %243 : vector<8x128xf32>
    %247 = arith.mulf %238, %209 : vector<8x128xf32>
    %248 = arith.addf %246, %247 : vector<8x128xf32>
    %249 = arith.index_cast %c5_i32 : i32 to index
    %c0_88 = arith.constant 0 : index
    %c0_89 = arith.constant 0 : index
    %250 = vector.load %arg14[%249, %c0_88, %c0_89] : memref<12x8x128xf32, #tpu.memory_space<vmem>>, vector<1x8x128xf32>
    %251 = vector.shape_cast %250 : vector<1x8x128xf32> to vector<8x128xf32>
    %252 = vector.shape_cast %248 : vector<8x128xf32> to vector<1x8x128xf32>
    tpu.vector_store %arg14[%249, %c0_88, %c0_89], %252 {strides = array<i32>} : memref<12x8x128xf32, #tpu.memory_space<vmem>>, vector<1x8x128xf32>,
    %c6_i32 = arith.constant 6 : i32
    %253 = arith.index_cast %c6_i32 : i32 to index
    %c0_90 = arith.constant 0 : index
    %c0_91 = arith.constant 0 : index
    %254 = vector.load %arg13[%253, %c0_90, %c0_91] : memref<12x8x384xf32, #tpu.memory_space<vmem>>, vector<1x8x384xf32>
    %255 = vector.shape_cast %254 : vector<1x8x384xf32> to vector<8x384xf32>
    %256 = arith.addf %255, %17 : vector<8x384xf32>
    %c0_92 = arith.constant 0 : index
    %c0_93 = arith.constant 0 : index
    %257 = vector.load %arg7[%c0_92, %c0_93] : memref<128x384xf32, #tpu.memory_space<vmem>>, vector<128x384xf32>
    %cst_94 = arith.constant dense<0.000000e+00> : vector<8x384xf32>
    %258 = tpu.matmul %248, %257, %cst_94 {dimension_numbers = #tpu.dot_dimension_numbers<[1], [0], [0], [1], [0, 0, 1, 1], [], []>} : vector<8x128xf32>, vector<128x384xf32>, vector<8x384xf32> -> vector<8x384xf32>
    %c0_95 = arith.constant 0 : index
    %c0_96 = arith.constant 0 : index
    %259 = vector.load %arg8[%c0_95, %c0_96] : memref<1x384xf32, #tpu.memory_space<vmem>>, vector<1x384xf32>
    %260 = vector.broadcast %259 : vector<1x384xf32> to vector<8x384xf32>
    %261 = arith.addf %258, %260 : vector<8x384xf32>
    %262 = vector.extract_strided_slice %256 {offsets = [0, 0], sizes = [8, 128], strides = [1, 1]} : vector<8x384xf32> to vector<8x128xf32>
    %263 = vector.extract_strided_slice %261 {offsets = [0, 0], sizes = [8, 128], strides = [1, 1]} : vector<8x384xf32> to vector<8x128xf32>
    %264 = arith.addf %262, %263 : vector<8x128xf32>
    %265 = arith.negf %264 : vector<8x128xf32>
    %266 = math.exp %265 : vector<8x128xf32>
    %cst_97 = arith.constant 1.000000e+00 : f32
    %267 = vector.broadcast %cst_97 : f32 to vector<8x128xf32>
    %268 = arith.addf %267, %266 : vector<8x128xf32>
    %269 = arith.divf %267, %268 : vector<8x128xf32>
    %270 = vector.extract_strided_slice %256 {offsets = [0, 128], sizes = [8, 128], strides = [1, 1]} : vector<8x384xf32> to vector<8x128xf32>
    %271 = vector.extract_strided_slice %261 {offsets = [0, 128], sizes = [8, 128], strides = [1, 1]} : vector<8x384xf32> to vector<8x128xf32>
    %272 = arith.addf %270, %271 : vector<8x128xf32>
    %273 = arith.negf %272 : vector<8x128xf32>
    %274 = math.exp %273 : vector<8x128xf32>
    %cst_98 = arith.constant 1.000000e+00 : f32
    %275 = vector.broadcast %cst_98 : f32 to vector<8x128xf32>
    %276 = arith.addf %275, %274 : vector<8x128xf32>
    %277 = arith.divf %275, %276 : vector<8x128xf32>
    %278 = vector.extract_strided_slice %256 {offsets = [0, 256], sizes = [8, 128], strides = [1, 1]} : vector<8x384xf32> to vector<8x128xf32>
    %279 = vector.extract_strided_slice %261 {offsets = [0, 256], sizes = [8, 128], strides = [1, 1]} : vector<8x384xf32> to vector<8x128xf32>
    %280 = arith.mulf %269, %279 : vector<8x128xf32>
    %281 = arith.addf %278, %280 : vector<8x128xf32>
    %282 = math.tanh %281 : vector<8x128xf32>
    %cst_99 = arith.constant 1.000000e+00 : f32
    %283 = vector.broadcast %cst_99 : f32 to vector<8x128xf32>
    %284 = arith.subf %283, %277 : vector<8x128xf32>
    %285 = arith.mulf %284, %282 : vector<8x128xf32>
    %286 = arith.mulf %277, %248 : vector<8x128xf32>
    %287 = arith.addf %285, %286 : vector<8x128xf32>
    %288 = arith.index_cast %c6_i32 : i32 to index
    %c0_100 = arith.constant 0 : index
    %c0_101 = arith.constant 0 : index
    %289 = vector.load %arg14[%288, %c0_100, %c0_101] : memref<12x8x128xf32, #tpu.memory_space<vmem>>, vector<1x8x128xf32>
    %290 = vector.shape_cast %289 : vector<1x8x128xf32> to vector<8x128xf32>
    %291 = vector.shape_cast %287 : vector<8x128xf32> to vector<1x8x128xf32>
    tpu.vector_store %arg14[%288, %c0_100, %c0_101], %291 {strides = array<i32>} : memref<12x8x128xf32, #tpu.memory_space<vmem>>, vector<1x8x128xf32>,
    %c7_i32 = arith.constant 7 : i32
    %292 = arith.index_cast %c7_i32 : i32 to index
    %c0_102 = arith.constant 0 : index
    %c0_103 = arith.constant 0 : index
    %293 = vector.load %arg13[%292, %c0_102, %c0_103] : memref<12x8x384xf32, #tpu.memory_space<vmem>>, vector<1x8x384xf32>
    %294 = vector.shape_cast %293 : vector<1x8x384xf32> to vector<8x384xf32>
    %295 = arith.addf %294, %17 : vector<8x384xf32>
    %c0_104 = arith.constant 0 : index
    %c0_105 = arith.constant 0 : index
    %296 = vector.load %arg7[%c0_104, %c0_105] : memref<128x384xf32, #tpu.memory_space<vmem>>, vector<128x384xf32>
    %cst_106 = arith.constant dense<0.000000e+00> : vector<8x384xf32>
    %297 = tpu.matmul %287, %296, %cst_106 {dimension_numbers = #tpu.dot_dimension_numbers<[1], [0], [0], [1], [0, 0, 1, 1], [], []>} : vector<8x128xf32>, vector<128x384xf32>, vector<8x384xf32> -> vector<8x384xf32>
    %c0_107 = arith.constant 0 : index
    %c0_108 = arith.constant 0 : index
    %298 = vector.load %arg8[%c0_107, %c0_108] : memref<1x384xf32, #tpu.memory_space<vmem>>, vector<1x384xf32>
    %299 = vector.broadcast %298 : vector<1x384xf32> to vector<8x384xf32>
    %300 = arith.addf %297, %299 : vector<8x384xf32>
    %301 = vector.extract_strided_slice %295 {offsets = [0, 0], sizes = [8, 128], strides = [1, 1]} : vector<8x384xf32> to vector<8x128xf32>
    %302 = vector.extract_strided_slice %300 {offsets = [0, 0], sizes = [8, 128], strides = [1, 1]} : vector<8x384xf32> to vector<8x128xf32>
    %303 = arith.addf %301, %302 : vector<8x128xf32>
    %304 = arith.negf %303 : vector<8x128xf32>
    %305 = math.exp %304 : vector<8x128xf32>
    %cst_109 = arith.constant 1.000000e+00 : f32
    %306 = vector.broadcast %cst_109 : f32 to vector<8x128xf32>
    %307 = arith.addf %306, %305 : vector<8x128xf32>
    %308 = arith.divf %306, %307 : vector<8x128xf32>
    %309 = vector.extract_strided_slice %295 {offsets = [0, 128], sizes = [8, 128], strides = [1, 1]} : vector<8x384xf32> to vector<8x128xf32>
    %310 = vector.extract_strided_slice %300 {offsets = [0, 128], sizes = [8, 128], strides = [1, 1]} : vector<8x384xf32> to vector<8x128xf32>
    %311 = arith.addf %309, %310 : vector<8x128xf32>
    %312 = arith.negf %311 : vector<8x128xf32>
    %313 = math.exp %312 : vector<8x128xf32>
    %cst_110 = arith.constant 1.000000e+00 : f32
    %314 = vector.broadcast %cst_110 : f32 to vector<8x128xf32>
    %315 = arith.addf %314, %313 : vector<8x128xf32>
    %316 = arith.divf %314, %315 : vector<8x128xf32>
    %317 = vector.extract_strided_slice %295 {offsets = [0, 256], sizes = [8, 128], strides = [1, 1]} : vector<8x384xf32> to vector<8x128xf32>
    %318 = vector.extract_strided_slice %300 {offsets = [0, 256], sizes = [8, 128], strides = [1, 1]} : vector<8x384xf32> to vector<8x128xf32>
    %319 = arith.mulf %308, %318 : vector<8x128xf32>
    %320 = arith.addf %317, %319 : vector<8x128xf32>
    %321 = math.tanh %320 : vector<8x128xf32>
    %cst_111 = arith.constant 1.000000e+00 : f32
    %322 = vector.broadcast %cst_111 : f32 to vector<8x128xf32>
    %323 = arith.subf %322, %316 : vector<8x128xf32>
    %324 = arith.mulf %323, %321 : vector<8x128xf32>
    %325 = arith.mulf %316, %287 : vector<8x128xf32>
    %326 = arith.addf %324, %325 : vector<8x128xf32>
    %327 = arith.index_cast %c7_i32 : i32 to index
    %c0_112 = arith.constant 0 : index
    %c0_113 = arith.constant 0 : index
    %328 = vector.load %arg14[%327, %c0_112, %c0_113] : memref<12x8x128xf32, #tpu.memory_space<vmem>>, vector<1x8x128xf32>
    %329 = vector.shape_cast %328 : vector<1x8x128xf32> to vector<8x128xf32>
    %330 = vector.shape_cast %326 : vector<8x128xf32> to vector<1x8x128xf32>
    tpu.vector_store %arg14[%327, %c0_112, %c0_113], %330 {strides = array<i32>} : memref<12x8x128xf32, #tpu.memory_space<vmem>>, vector<1x8x128xf32>,
    %c8_i32 = arith.constant 8 : i32
    %331 = arith.index_cast %c8_i32 : i32 to index
    %c0_114 = arith.constant 0 : index
    %c0_115 = arith.constant 0 : index
    %332 = vector.load %arg13[%331, %c0_114, %c0_115] : memref<12x8x384xf32, #tpu.memory_space<vmem>>, vector<1x8x384xf32>
    %333 = vector.shape_cast %332 : vector<1x8x384xf32> to vector<8x384xf32>
    %334 = arith.addf %333, %17 : vector<8x384xf32>
    %c0_116 = arith.constant 0 : index
    %c0_117 = arith.constant 0 : index
    %335 = vector.load %arg7[%c0_116, %c0_117] : memref<128x384xf32, #tpu.memory_space<vmem>>, vector<128x384xf32>
    %cst_118 = arith.constant dense<0.000000e+00> : vector<8x384xf32>
    %336 = tpu.matmul %326, %335, %cst_118 {dimension_numbers = #tpu.dot_dimension_numbers<[1], [0], [0], [1], [0, 0, 1, 1], [], []>} : vector<8x128xf32>, vector<128x384xf32>, vector<8x384xf32> -> vector<8x384xf32>
    %c0_119 = arith.constant 0 : index
    %c0_120 = arith.constant 0 : index
    %337 = vector.load %arg8[%c0_119, %c0_120] : memref<1x384xf32, #tpu.memory_space<vmem>>, vector<1x384xf32>
    %338 = vector.broadcast %337 : vector<1x384xf32> to vector<8x384xf32>
    %339 = arith.addf %336, %338 : vector<8x384xf32>
    %340 = vector.extract_strided_slice %334 {offsets = [0, 0], sizes = [8, 128], strides = [1, 1]} : vector<8x384xf32> to vector<8x128xf32>
    %341 = vector.extract_strided_slice %339 {offsets = [0, 0], sizes = [8, 128], strides = [1, 1]} : vector<8x384xf32> to vector<8x128xf32>
    %342 = arith.addf %340, %341 : vector<8x128xf32>
    %343 = arith.negf %342 : vector<8x128xf32>
    %344 = math.exp %343 : vector<8x128xf32>
    %cst_121 = arith.constant 1.000000e+00 : f32
    %345 = vector.broadcast %cst_121 : f32 to vector<8x128xf32>
    %346 = arith.addf %345, %344 : vector<8x128xf32>
    %347 = arith.divf %345, %346 : vector<8x128xf32>
    %348 = vector.extract_strided_slice %334 {offsets = [0, 128], sizes = [8, 128], strides = [1, 1]} : vector<8x384xf32> to vector<8x128xf32>
    %349 = vector.extract_strided_slice %339 {offsets = [0, 128], sizes = [8, 128], strides = [1, 1]} : vector<8x384xf32> to vector<8x128xf32>
    %350 = arith.addf %348, %349 : vector<8x128xf32>
    %351 = arith.negf %350 : vector<8x128xf32>
    %352 = math.exp %351 : vector<8x128xf32>
    %cst_122 = arith.constant 1.000000e+00 : f32
    %353 = vector.broadcast %cst_122 : f32 to vector<8x128xf32>
    %354 = arith.addf %353, %352 : vector<8x128xf32>
    %355 = arith.divf %353, %354 : vector<8x128xf32>
    %356 = vector.extract_strided_slice %334 {offsets = [0, 256], sizes = [8, 128], strides = [1, 1]} : vector<8x384xf32> to vector<8x128xf32>
    %357 = vector.extract_strided_slice %339 {offsets = [0, 256], sizes = [8, 128], strides = [1, 1]} : vector<8x384xf32> to vector<8x128xf32>
    %358 = arith.mulf %347, %357 : vector<8x128xf32>
    %359 = arith.addf %356, %358 : vector<8x128xf32>
    %360 = math.tanh %359 : vector<8x128xf32>
    %cst_123 = arith.constant 1.000000e+00 : f32
    %361 = vector.broadcast %cst_123 : f32 to vector<8x128xf32>
    %362 = arith.subf %361, %355 : vector<8x128xf32>
    %363 = arith.mulf %362, %360 : vector<8x128xf32>
    %364 = arith.mulf %355, %326 : vector<8x128xf32>
    %365 = arith.addf %363, %364 : vector<8x128xf32>
    %366 = arith.index_cast %c8_i32 : i32 to index
    %c0_124 = arith.constant 0 : index
    %c0_125 = arith.constant 0 : index
    %367 = vector.load %arg14[%366, %c0_124, %c0_125] : memref<12x8x128xf32, #tpu.memory_space<vmem>>, vector<1x8x128xf32>
    %368 = vector.shape_cast %367 : vector<1x8x128xf32> to vector<8x128xf32>
    %369 = vector.shape_cast %365 : vector<8x128xf32> to vector<1x8x128xf32>
    tpu.vector_store %arg14[%366, %c0_124, %c0_125], %369 {strides = array<i32>} : memref<12x8x128xf32, #tpu.memory_space<vmem>>, vector<1x8x128xf32>,
    %c9_i32 = arith.constant 9 : i32
    %370 = arith.index_cast %c9_i32 : i32 to index
    %c0_126 = arith.constant 0 : index
    %c0_127 = arith.constant 0 : index
    %371 = vector.load %arg13[%370, %c0_126, %c0_127] : memref<12x8x384xf32, #tpu.memory_space<vmem>>, vector<1x8x384xf32>
    %372 = vector.shape_cast %371 : vector<1x8x384xf32> to vector<8x384xf32>
    %373 = arith.addf %372, %17 : vector<8x384xf32>
    %c0_128 = arith.constant 0 : index
    %c0_129 = arith.constant 0 : index
    %374 = vector.load %arg7[%c0_128, %c0_129] : memref<128x384xf32, #tpu.memory_space<vmem>>, vector<128x384xf32>
    %cst_130 = arith.constant dense<0.000000e+00> : vector<8x384xf32>
    %375 = tpu.matmul %365, %374, %cst_130 {dimension_numbers = #tpu.dot_dimension_numbers<[1], [0], [0], [1], [0, 0, 1, 1], [], []>} : vector<8x128xf32>, vector<128x384xf32>, vector<8x384xf32> -> vector<8x384xf32>
    %c0_131 = arith.constant 0 : index
    %c0_132 = arith.constant 0 : index
    %376 = vector.load %arg8[%c0_131, %c0_132] : memref<1x384xf32, #tpu.memory_space<vmem>>, vector<1x384xf32>
    %377 = vector.broadcast %376 : vector<1x384xf32> to vector<8x384xf32>
    %378 = arith.addf %375, %377 : vector<8x384xf32>
    %379 = vector.extract_strided_slice %373 {offsets = [0, 0], sizes = [8, 128], strides = [1, 1]} : vector<8x384xf32> to vector<8x128xf32>
    %380 = vector.extract_strided_slice %378 {offsets = [0, 0], sizes = [8, 128], strides = [1, 1]} : vector<8x384xf32> to vector<8x128xf32>
    %381 = arith.addf %379, %380 : vector<8x128xf32>
    %382 = arith.negf %381 : vector<8x128xf32>
    %383 = math.exp %382 : vector<8x128xf32>
    %cst_133 = arith.constant 1.000000e+00 : f32
    %384 = vector.broadcast %cst_133 : f32 to vector<8x128xf32>
    %385 = arith.addf %384, %383 : vector<8x128xf32>
    %386 = arith.divf %384, %385 : vector<8x128xf32>
    %387 = vector.extract_strided_slice %373 {offsets = [0, 128], sizes = [8, 128], strides = [1, 1]} : vector<8x384xf32> to vector<8x128xf32>
    %388 = vector.extract_strided_slice %378 {offsets = [0, 128], sizes = [8, 128], strides = [1, 1]} : vector<8x384xf32> to vector<8x128xf32>
    %389 = arith.addf %387, %388 : vector<8x128xf32>
    %390 = arith.negf %389 : vector<8x128xf32>
    %391 = math.exp %390 : vector<8x128xf32>
    %cst_134 = arith.constant 1.000000e+00 : f32
    %392 = vector.broadcast %cst_134 : f32 to vector<8x128xf32>
    %393 = arith.addf %392, %391 : vector<8x128xf32>
    %394 = arith.divf %392, %393 : vector<8x128xf32>
    %395 = vector.extract_strided_slice %373 {offsets = [0, 256], sizes = [8, 128], strides = [1, 1]} : vector<8x384xf32> to vector<8x128xf32>
    %396 = vector.extract_strided_slice %378 {offsets = [0, 256], sizes = [8, 128], strides = [1, 1]} : vector<8x384xf32> to vector<8x128xf32>
    %397 = arith.mulf %386, %396 : vector<8x128xf32>
    %398 = arith.addf %395, %397 : vector<8x128xf32>
    %399 = math.tanh %398 : vector<8x128xf32>
    %cst_135 = arith.constant 1.000000e+00 : f32
    %400 = vector.broadcast %cst_135 : f32 to vector<8x128xf32>
    %401 = arith.subf %400, %394 : vector<8x128xf32>
    %402 = arith.mulf %401, %399 : vector<8x128xf32>
    %403 = arith.mulf %394, %365 : vector<8x128xf32>
    %404 = arith.addf %402, %403 : vector<8x128xf32>
    %405 = arith.index_cast %c9_i32 : i32 to index
    %c0_136 = arith.constant 0 : index
    %c0_137 = arith.constant 0 : index
    %406 = vector.load %arg14[%405, %c0_136, %c0_137] : memref<12x8x128xf32, #tpu.memory_space<vmem>>, vector<1x8x128xf32>
    %407 = vector.shape_cast %406 : vector<1x8x128xf32> to vector<8x128xf32>
    %408 = vector.shape_cast %404 : vector<8x128xf32> to vector<1x8x128xf32>
    tpu.vector_store %arg14[%405, %c0_136, %c0_137], %408 {strides = array<i32>} : memref<12x8x128xf32, #tpu.memory_space<vmem>>, vector<1x8x128xf32>,
    %c10_i32 = arith.constant 10 : i32
    %409 = arith.index_cast %c10_i32 : i32 to index
    %c0_138 = arith.constant 0 : index
    %c0_139 = arith.constant 0 : index
    %410 = vector.load %arg13[%409, %c0_138, %c0_139] : memref<12x8x384xf32, #tpu.memory_space<vmem>>, vector<1x8x384xf32>
    %411 = vector.shape_cast %410 : vector<1x8x384xf32> to vector<8x384xf32>
    %412 = arith.addf %411, %17 : vector<8x384xf32>
    %c0_140 = arith.constant 0 : index
    %c0_141 = arith.constant 0 : index
    %413 = vector.load %arg7[%c0_140, %c0_141] : memref<128x384xf32, #tpu.memory_space<vmem>>, vector<128x384xf32>
    %cst_142 = arith.constant dense<0.000000e+00> : vector<8x384xf32>
    %414 = tpu.matmul %404, %413, %cst_142 {dimension_numbers = #tpu.dot_dimension_numbers<[1], [0], [0], [1], [0, 0, 1, 1], [], []>} : vector<8x128xf32>, vector<128x384xf32>, vector<8x384xf32> -> vector<8x384xf32>
    %c0_143 = arith.constant 0 : index
    %c0_144 = arith.constant 0 : index
    %415 = vector.load %arg8[%c0_143, %c0_144] : memref<1x384xf32, #tpu.memory_space<vmem>>, vector<1x384xf32>
    %416 = vector.broadcast %415 : vector<1x384xf32> to vector<8x384xf32>
    %417 = arith.addf %414, %416 : vector<8x384xf32>
    %418 = vector.extract_strided_slice %412 {offsets = [0, 0], sizes = [8, 128], strides = [1, 1]} : vector<8x384xf32> to vector<8x128xf32>
    %419 = vector.extract_strided_slice %417 {offsets = [0, 0], sizes = [8, 128], strides = [1, 1]} : vector<8x384xf32> to vector<8x128xf32>
    %420 = arith.addf %418, %419 : vector<8x128xf32>
    %421 = arith.negf %420 : vector<8x128xf32>
    %422 = math.exp %421 : vector<8x128xf32>
    %cst_145 = arith.constant 1.000000e+00 : f32
    %423 = vector.broadcast %cst_145 : f32 to vector<8x128xf32>
    %424 = arith.addf %423, %422 : vector<8x128xf32>
    %425 = arith.divf %423, %424 : vector<8x128xf32>
    %426 = vector.extract_strided_slice %412 {offsets = [0, 128], sizes = [8, 128], strides = [1, 1]} : vector<8x384xf32> to vector<8x128xf32>
    %427 = vector.extract_strided_slice %417 {offsets = [0, 128], sizes = [8, 128], strides = [1, 1]} : vector<8x384xf32> to vector<8x128xf32>
    %428 = arith.addf %426, %427 : vector<8x128xf32>
    %429 = arith.negf %428 : vector<8x128xf32>
    %430 = math.exp %429 : vector<8x128xf32>
    %cst_146 = arith.constant 1.000000e+00 : f32
    %431 = vector.broadcast %cst_146 : f32 to vector<8x128xf32>
    %432 = arith.addf %431, %430 : vector<8x128xf32>
    %433 = arith.divf %431, %432 : vector<8x128xf32>
    %434 = vector.extract_strided_slice %412 {offsets = [0, 256], sizes = [8, 128], strides = [1, 1]} : vector<8x384xf32> to vector<8x128xf32>
    %435 = vector.extract_strided_slice %417 {offsets = [0, 256], sizes = [8, 128], strides = [1, 1]} : vector<8x384xf32> to vector<8x128xf32>
    %436 = arith.mulf %425, %435 : vector<8x128xf32>
    %437 = arith.addf %434, %436 : vector<8x128xf32>
    %438 = math.tanh %437 : vector<8x128xf32>
    %cst_147 = arith.constant 1.000000e+00 : f32
    %439 = vector.broadcast %cst_147 : f32 to vector<8x128xf32>
    %440 = arith.subf %439, %433 : vector<8x128xf32>
    %441 = arith.mulf %440, %438 : vector<8x128xf32>
    %442 = arith.mulf %433, %404 : vector<8x128xf32>
    %443 = arith.addf %441, %442 : vector<8x128xf32>
    %444 = arith.index_cast %c10_i32 : i32 to index
    %c0_148 = arith.constant 0 : index
    %c0_149 = arith.constant 0 : index
    %445 = vector.load %arg14[%444, %c0_148, %c0_149] : memref<12x8x128xf32, #tpu.memory_space<vmem>>, vector<1x8x128xf32>
    %446 = vector.shape_cast %445 : vector<1x8x128xf32> to vector<8x128xf32>
    %447 = vector.shape_cast %443 : vector<8x128xf32> to vector<1x8x128xf32>
    tpu.vector_store %arg14[%444, %c0_148, %c0_149], %447 {strides = array<i32>} : memref<12x8x128xf32, #tpu.memory_space<vmem>>, vector<1x8x128xf32>,
    %c11_i32 = arith.constant 11 : i32
    %448 = arith.index_cast %c11_i32 : i32 to index
    %c0_150 = arith.constant 0 : index
    %c0_151 = arith.constant 0 : index
    %449 = vector.load %arg13[%448, %c0_150, %c0_151] : memref<12x8x384xf32, #tpu.memory_space<vmem>>, vector<1x8x384xf32>
    %450 = vector.shape_cast %449 : vector<1x8x384xf32> to vector<8x384xf32>
    %451 = arith.addf %450, %17 : vector<8x384xf32>
    %c0_152 = arith.constant 0 : index
    %c0_153 = arith.constant 0 : index
    %452 = vector.load %arg7[%c0_152, %c0_153] : memref<128x384xf32, #tpu.memory_space<vmem>>, vector<128x384xf32>
    %cst_154 = arith.constant dense<0.000000e+00> : vector<8x384xf32>
    %453 = tpu.matmul %443, %452, %cst_154 {dimension_numbers = #tpu.dot_dimension_numbers<[1], [0], [0], [1], [0, 0, 1, 1], [], []>} : vector<8x128xf32>, vector<128x384xf32>, vector<8x384xf32> -> vector<8x384xf32>
    %c0_155 = arith.constant 0 : index
    %c0_156 = arith.constant 0 : index
    %454 = vector.load %arg8[%c0_155, %c0_156] : memref<1x384xf32, #tpu.memory_space<vmem>>, vector<1x384xf32>
    %455 = vector.broadcast %454 : vector<1x384xf32> to vector<8x384xf32>
    %456 = arith.addf %453, %455 : vector<8x384xf32>
    %457 = vector.extract_strided_slice %451 {offsets = [0, 0], sizes = [8, 128], strides = [1, 1]} : vector<8x384xf32> to vector<8x128xf32>
    %458 = vector.extract_strided_slice %456 {offsets = [0, 0], sizes = [8, 128], strides = [1, 1]} : vector<8x384xf32> to vector<8x128xf32>
    %459 = arith.addf %457, %458 : vector<8x128xf32>
    %460 = arith.negf %459 : vector<8x128xf32>
    %461 = math.exp %460 : vector<8x128xf32>
    %cst_157 = arith.constant 1.000000e+00 : f32
    %462 = vector.broadcast %cst_157 : f32 to vector<8x128xf32>
    %463 = arith.addf %462, %461 : vector<8x128xf32>
    %464 = arith.divf %462, %463 : vector<8x128xf32>
    %465 = vector.extract_strided_slice %451 {offsets = [0, 128], sizes = [8, 128], strides = [1, 1]} : vector<8x384xf32> to vector<8x128xf32>
    %466 = vector.extract_strided_slice %456 {offsets = [0, 128], sizes = [8, 128], strides = [1, 1]} : vector<8x384xf32> to vector<8x128xf32>
    %467 = arith.addf %465, %466 : vector<8x128xf32>
    %468 = arith.negf %467 : vector<8x128xf32>
    %469 = math.exp %468 : vector<8x128xf32>
    %cst_158 = arith.constant 1.000000e+00 : f32
    %470 = vector.broadcast %cst_158 : f32 to vector<8x128xf32>
    %471 = arith.addf %470, %469 : vector<8x128xf32>
    %472 = arith.divf %470, %471 : vector<8x128xf32>
    %473 = vector.extract_strided_slice %451 {offsets = [0, 256], sizes = [8, 128], strides = [1, 1]} : vector<8x384xf32> to vector<8x128xf32>
    %474 = vector.extract_strided_slice %456 {offsets = [0, 256], sizes = [8, 128], strides = [1, 1]} : vector<8x384xf32> to vector<8x128xf32>
    %475 = arith.mulf %464, %474 : vector<8x128xf32>
    %476 = arith.addf %473, %475 : vector<8x128xf32>
    %477 = math.tanh %476 : vector<8x128xf32>
    %cst_159 = arith.constant 1.000000e+00 : f32
    %478 = vector.broadcast %cst_159 : f32 to vector<8x128xf32>
    %479 = arith.subf %478, %472 : vector<8x128xf32>
    %480 = arith.mulf %479, %477 : vector<8x128xf32>
    %481 = arith.mulf %472, %443 : vector<8x128xf32>
    %482 = arith.addf %480, %481 : vector<8x128xf32>
    %483 = arith.index_cast %c11_i32 : i32 to index
    %c0_160 = arith.constant 0 : index
    %c0_161 = arith.constant 0 : index
    %484 = vector.load %arg14[%483, %c0_160, %c0_161] : memref<12x8x128xf32, #tpu.memory_space<vmem>>, vector<1x8x128xf32>
    %485 = vector.shape_cast %484 : vector<1x8x128xf32> to vector<8x128xf32>
    %486 = vector.shape_cast %482 : vector<8x128xf32> to vector<1x8x128xf32>
    tpu.vector_store %arg14[%483, %c0_160, %c0_161], %486 {strides = array<i32>} : memref<12x8x128xf32, #tpu.memory_space<vmem>>, vector<1x8x128xf32>,
    %c12_i32 = arith.constant 12 : i32
    %c0_162 = arith.constant 0 : index
    %c0_163 = arith.constant 0 : index
    %487 = vector.load %arg12[%c0_162, %c0_163] : memref<8x128xf32, #tpu.memory_space<vmem>>, vector<8x128xf32>
    tpu.vector_store %arg12[%c0_162, %c0_163], %482 {strides = array<i32>} : memref<8x128xf32, #tpu.memory_space<vmem>>, vector<8x128xf32>,
    %c0_164 = arith.constant 0 : index
    %c0_165 = arith.constant 0 : index
    %c0_166 = arith.constant 0 : index
    %488 = vector.load %arg14[%c0_164, %c0_165, %c0_166] : memref<12x8x128xf32, #tpu.memory_space<vmem>>, vector<12x8x128xf32>
    %489 = vector.shape_cast %488 : vector<12x8x128xf32> to vector<96x128xf32>
    %c0_167 = arith.constant 0 : index
    %c0_168 = arith.constant 0 : index
    %490 = vector.load %arg9[%c0_167, %c0_168] : memref<128x512xf32, #tpu.memory_space<vmem>>, vector<128x512xf32>
    %cst_169 = arith.constant dense<0.000000e+00> : vector<96x512xf32>
    %491 = tpu.matmul %489, %490, %cst_169 {dimension_numbers = #tpu.dot_dimension_numbers<[1], [0], [0], [1], [0, 0, 1, 1], [], []>} : vector<96x128xf32>, vector<128x512xf32>, vector<96x512xf32> -> vector<96x512xf32>
    %c0_170 = arith.constant 0 : index
    %c0_171 = arith.constant 0 : index
    %492 = vector.load %arg10[%c0_170, %c0_171] : memref<1x512xf32, #tpu.memory_space<vmem>>, vector<1x512xf32>
    %493 = vector.broadcast %492 : vector<1x512xf32> to vector<96x512xf32>
    %494 = arith.addf %491, %493 : vector<96x512xf32>
    %cst_172 = arith.constant dense<0xFF800000> : vector<96xf32>
    %495 = vector.multi_reduction <maximumf>, %494, %cst_172 [1] : vector<96x512xf32> to vector<96xf32>
    %496 = vector.shape_cast %495 : vector<96xf32> to vector<96x1xf32>
    %497 = vector.broadcast %496 : vector<96x1xf32> to vector<96x512xf32>
    %498 = arith.subf %494, %497 : vector<96x512xf32>
    %499 = math.exp %498 : vector<96x512xf32>
    %cst_173 = arith.constant dense<0.000000e+00> : vector<96xf32>
    %500 = vector.multi_reduction <add>, %499, %cst_173 [1] : vector<96x512xf32> to vector<96xf32>
    %501 = vector.shape_cast %500 : vector<96xf32> to vector<96x1xf32>
    %502 = math.log %501 : vector<96x1xf32>
    %503 = arith.addf %496, %502 : vector<96x1xf32>
    %504 = vector.broadcast %503 : vector<96x1xf32> to vector<96x512xf32>
    %505 = arith.subf %494, %504 : vector<96x512xf32>
    %506 = vector.shape_cast %505 : vector<96x512xf32> to vector<12x8x512xf32>
    %c0_174 = arith.constant 0 : index
    %c0_175 = arith.constant 0 : index
    %c0_176 = arith.constant 0 : index
    %507 = vector.load %arg11[%c0_174, %c0_175, %c0_176] : memref<12x8x512xf32, #tpu.memory_space<vmem>>, vector<12x8x512xf32>
    tpu.vector_store %arg11[%c0_174, %c0_175, %c0_176], %506 {strides = array<i32>} : memref<12x8x512xf32, #tpu.memory_space<vmem>>, vector<12x8x512xf32>,
    return
  }
}

</mosaic_0001>

<bundles_post_ra>
// kernel: tpu_custom_call.1
= control target key start
LH: loop header
LB: loop body
LE: loop exit
PB: predicated region body
PF: predicated region fallthrough
CT: control target
= control target key end

     0   :  { %18 = vsyncpa [#allocation5], 0  ;;  %s8900_s0 = inlined_call_operand.vmem [shape: s32[96,1], index: 0, kind: input, shape index: {}]   ;;  %s8901_s1 = inlined_call_operand.hbm [shape: f32[512,128], index: 1, kind: input, shape index: {}]   ;;  %s8902_s2 = inlined_call_operand.vmem [shape: f32[8,128], index: 2, kind: input, shape index: {}]   ;;  %s8903_s3 = inlined_call_operand.vmem [shape: f32[8,128], index: 3, kind: input, shape index: {}]   ;;  %s8904_s4 = inlined_call_operand.hbm [shape: f32[128,384], index: 4, kind: input, shape index: {}]   ;;  %s8905_s5 = inlined_call_operand.hbm [shape: f32[128,384], index: 5, kind: input, shape index: {}]   ;;  %s8906_s6 = inlined_call_operand.vmem [shape: f32[1,384], index: 6, kind: input, shape index: {}]   ;;  %s8907_s7 = inlined_call_operand.hbm [shape: f32[128,384], index: 7, kind: input, shape index: {}]   ;;  %s8908_s8 = inlined_call_operand.vmem [shape: f32[1,384], index: 8, kind: input, shape index: {}]   ;;  %s8909_s9 = inlined_call_operand.hbm [shape: f32[128,512], index: 9, kind: input, shape index: {}]   ;;  %s8910_s10 = inlined_call_operand.vmem [shape: f32[1,512], index: 10, kind: input, shape index: {}]   ;;  %s8911_s11 = inlined_call_operand.hbm [shape: f32[12,8,512], index: 11, kind: output, shape index: {0}]   ;;  %s8912_s12 = inlined_call_operand.hbm [shape: f32[8,128], index: 12, kind: output, shape index: {1}]  }
   0x1   :  { %19 = vsyncpa [#allocation8], 0 }
   0x2   :  { %20 = vsyncpa [#allocation11], 0 }
   0x3   :  { %21 = vsyncpa [#allocation6], 0 }
   0x4   :  { %22 = vsyncpa [#allocation15], 0  ;;  %s7249_s21 = smov [#allocation7]   ;;  %s7085_s25 = scalar_lea.hbm %s8904_s4, 6144 }
   0x5   :  { %s46_s22 = sshll.u32 %s7249_s21, 4  ;;  %p7086_p0 = scmp.ne.s32.totalorder %s8904_s4, %s7085_s25  ;;  %s47_s22 = int_to_ptr.vmem [resolvable:$true] %s46_s22 }
   0x6   :  { %p7089_p1 = scmp.lt.u32.totalorder %s7085_s25, %s8904_s4 }
   0x8   :  { %p7091_p2 = pnand %p7089_p1, %p7086_p0 }
   0xa   :  { %7094 = shalt.err (!%p7091_p2)
}
   0xb   :  { %s7095_s30 = scalar_lea.vmem %s47_s22, 6144  ;;  %p7100_p4 = scmp.lt.s32.totalorder %s47_s22, %s47_s22 }
   0xc   :  { %p7096_p3 = scmp.ne.s32.totalorder %s47_s22, %s7095_s30  ;;  %p7101_p5 = scmp.lt.s32.totalorder %s7095_s30, %s7095_s30 }
   0xe   :  { %p7102_p6 = por %p7101_p5, %p7100_p4 }
  0x10   :  { %p7103_p7 = pnand %p7102_p6, %p7096_p3 }
  0x12   :  { %7106 = shalt.err (!%p7103_p7)
}
  0x13   :  { %s7250_s13 = smov 384   ;;  %s7251_s14 = smov 24  }
  0x14   :  { %52 = dma.hbm_to_vmem [thread:$0]  %s8904_s4, 6144, %s47_s22, [#allocation8], %s7250_s13, %s7250_s13, %s7251_s14  }
  0x15   :  { %s7252_s17 = smov [#allocation10]   ;;  %s7253_s19 = smov [#allocation4]  }
  0x16   :  { %s72_s18 = sshll.u32 %s7252_s17, 4  ;;  %s30_s20 = sshll.u32 %s7253_s19, 4  ;;  %s73_s18 = int_to_ptr.vmem [resolvable:$true] %s72_s18  ;;  %s31_s20 = int_to_ptr.vmem [resolvable:$true] %s30_s20 }
  0x17   :  { %s7107_s24 = scalar_lea.hbm %s8907_s7, 6144 }
  0x18   :  { %p7108_p8 = scmp.ne.s32.totalorder %s8907_s7, %s7107_s24  ;;  %p7111_p9 = scmp.lt.u32.totalorder %s7107_s24, %s8907_s7 }
  0x1a   :  { %p7113_p10 = pnand %p7111_p9, %p7108_p8 }
  0x1c   :  { %7116 = shalt.err (!%p7113_p10)
}
  0x1d   :  { %s7117_s4 = scalar_lea.vmem %s73_s18, 6144  ;;  %p7122_p12 = scmp.lt.s32.totalorder %s73_s18, %s73_s18 }
  0x1e   :  { %p7118_p11 = scmp.ne.s32.totalorder %s73_s18, %s7117_s4  ;;  %p7123_p13 = scmp.lt.s32.totalorder %s7117_s4, %s7117_s4 }
  0x20   :  { %p7124_p0 = por %p7123_p13, %p7122_p12 }
  0x22   :  { %p7125_p1 = pnand %p7124_p0, %p7118_p11 }
  0x24   :  { %7128 = shalt.err (!%p7125_p1)
}
  0x25   :  { %78 = dma.hbm_to_vmem [thread:$0]  %s8907_s7, 6144, %s73_s18, [#allocation11], %s7250_s13, %s7250_s13, %s7251_s14  }
  0x26   :  { %s7129_s16 = scalar_lea.hbm %s8901_s1, 8192 }
  0x27   :  { %p7130_p2 = scmp.ne.s32.totalorder %s8901_s1, %s7129_s16  ;;  %p7133_p3 = scmp.lt.u32.totalorder %s7129_s16, %s8901_s1 }
  0x29   :  { %p7135_p4 = pnand %p7133_p3, %p7130_p2 }
  0x2b   :  { %7138 = shalt.err (!%p7135_p4)
}
  0x2c   :  { %s7139_s24 = scalar_lea.vmem %s31_s20, 8192  ;;  %p7144_p6 = scmp.lt.s32.totalorder %s31_s20, %s31_s20 }
  0x2d   :  { %p7140_p5 = scmp.ne.s32.totalorder %s31_s20, %s7139_s24  ;;  %p7145_p7 = scmp.lt.s32.totalorder %s7139_s24, %s7139_s24 }
  0x2f   :  { %p7146_p8 = por %p7145_p7, %p7144_p6 }
  0x31   :  { %p7147_p9 = pnand %p7146_p8, %p7140_p5 }
  0x33   :  { %7150 = shalt.err (!%p7147_p9)
}
  0x34   :  { %s7254_s7 = smov 128   ;;  %s7255_s18 = smov 8  }
  0x35   :  { %36 = dma.hbm_to_vmem [thread:$0]  %s8901_s1, 8192, %s31_s20, [#allocation5], %s7254_s7, %s7254_s7, %s7255_s18  }
  0x36   :  { %s7256_s27 = smov [#allocation9]   ;;  %s7257_s4 = smov [#allocation12]  }
  0x37   :  { %s58_s28 = sshll.u32 %s7256_s27, 4  ;;  %s86_s22 = sshll.u32 %s7257_s4, 4  ;;  %s59_s28 = int_to_ptr.vmem [resolvable:$true] %s58_s28  ;;  %s87_s22 = int_to_ptr.vmem [resolvable:$true] %s86_s22 }
  0x38   :  { %s7151_s15 = scalar_lea.hbm %s8905_s5, 6144 }
  0x39   :  { %p7152_p10 = scmp.ne.s32.totalorder %s8905_s5, %s7151_s15  ;;  %p7155_p11 = scmp.lt.u32.totalorder %s7151_s15, %s8905_s5 }
  0x3b   :  { %p7157_p12 = pnand %p7155_p11, %p7152_p10 }
  0x3d   :  { %7160 = shalt.err (!%p7157_p12)
}
  0x3e   :  { %s7161_s1 = scalar_lea.vmem %s59_s28, 6144  ;;  %p7166_p0 = scmp.lt.s32.totalorder %s59_s28, %s59_s28 }
  0x3f   :  { %p7162_p13 = scmp.ne.s32.totalorder %s59_s28, %s7161_s1  ;;  %p7167_p1 = scmp.lt.s32.totalorder %s7161_s1, %s7161_s1 }
  0x41   :  { %p7168_p2 = por %p7167_p1, %p7166_p0 }
  0x43   :  { %p7169_p3 = pnand %p7168_p2, %p7162_p13 }
  0x45   :  { %7172 = shalt.err (!%p7169_p3)
}
  0x46   :  { %64 = dma.hbm_to_vmem [thread:$0]  %s8905_s5, 6144, %s59_s28, [#allocation8], %s7250_s13, %s7250_s13, %s7251_s14  }
  0x47   :  { %s7173_s18 = scalar_lea.hbm %s8909_s9, 8192 }
  0x48   :  { %p7174_p4 = scmp.ne.s32.totalorder %s8909_s9, %s7173_s18  ;;  %p7177_p5 = scmp.lt.u32.totalorder %s7173_s18, %s8909_s9 }
  0x4a   :  { %p7179_p6 = pnand %p7177_p5, %p7174_p4 }
  0x4c   :  { %7182 = shalt.err (!%p7179_p6)
}
  0x4d   :  { %s7183_s29 = scalar_lea.vmem %s87_s22, 8192  ;;  %p7188_p8 = scmp.lt.s32.totalorder %s87_s22, %s87_s22 }
  0x4e   :  { %p7184_p7 = scmp.ne.s32.totalorder %s87_s22, %s7183_s29  ;;  %p7189_p9 = scmp.lt.s32.totalorder %s7183_s29, %s7183_s29 }
  0x50   :  { %p7190_p10 = por %p7189_p9, %p7188_p8 }
  0x52   :  { %p7191_p11 = pnand %p7190_p10, %p7184_p7 }
  0x54   :  { %7194 = shalt.err (!%p7191_p11)
}
  0x55   :  { %s7258_s5 = smov 512   ;;  %s7259_s13 = smov 32  }
  0x56   :  { %92 = dma.hbm_to_vmem [thread:$0]  %s8909_s9, 8192, %s87_s22, [#allocation11], %s7258_s5, %s7258_s5, %s7259_s13  }
  0x57   :  { %7239 = dma.done.wait [#allocation5], 8192  }
  0x58   :  { %7240 = vsyncadd [#allocation5], 4294959104 }
  0x59   :  { %7241 = dma.done.wait [#allocation8], 12288  }
  0x5a   :  { %7242 = vsyncadd [#allocation8], 4294955008 }
  0x5b   :  { %7243 = dma.done.wait [#allocation11], 14336  }
  0x5c   :  { %7244 = vsyncadd [#allocation11], 4294952960  ;;  %v7260_v0 = vmov 0   ;;  %v112_v1 = vld [vmem:[%s8900_s0 + $0x10] sm:$0xff]  ;;  %v110_v2 = vld [vmem:[%s8900_s0] sm:$0xff] }
  0x5d   :  { %6844 = vset.pattern.permute.xlu1 %v7260_v0  ;;  %6843 = vset.pattern.permute.xlu0 %v7260_v0  ;;  %v113_v3 = vld [vmem:[%s8900_s0 + $0x18] sm:$0xff]  ;;  %v111_v4 = vld [vmem:[%s8900_s0 + $0x8] sm:$0xff]  ;;  %v114_v6 = vld [vmem:[%s8900_s0 + $0x20] sm:$0xff] }
  0x5e   :  { %134 = vperm.xlu1 %6844, %v112_v1   ;;  %128 = vperm.xlu0 %6843, %v110_v2   ;;  %v115_v5 = vld [vmem:[%s8900_s0 + $0x28] sm:$0xff]  ;;  %v324_v8 = vld [vmem:[#allocation4 + $0x88] sm:$0xff]  ;;  %v325_v18 = vld [vmem:[#allocation4 + $0x90] sm:$0xff] }
  0x5f   :  { %v323_v7 = vld [vmem:[#allocation4 + $0x80] sm:$0xff]  ;;  %v356_v11 = vld [vmem:[#allocation4 + $0x188] sm:$0xff]  ;;  %v326_v20 = vld [vmem:[#allocation4 + $0x98] sm:$0xff] }
  0x60   :  { %v355_v9 = vld [vmem:[#allocation4 + $0x180] sm:$0xff]  ;;  %v5817_v10 = vpack.c.bf16 %v324_v8, %v323_v7  ;;  %v308_v13 = vld [vmem:[#allocation4 + $0x8] sm:$0xff]  ;;  %v357_v21 = vld [vmem:[#allocation4 + $0x190] sm:$0xff]  ;;  %v5821_v25 = vpack.c.bf16 %v326_v20, %v325_v18 }
  0x61   :  { %v307_v12 = vld [vmem:[#allocation4] sm:$0xff]  ;;  %v5849_v14 = vpack.c.bf16 %v356_v11, %v355_v9  ;;  %v340_v17 = vld [vmem:[#allocation4 + $0x108] sm:$0xff]  ;;  %v358_v22 = vld [vmem:[#allocation4 + $0x198] sm:$0xff] }
  0x62   :  { %137 = vperm.xlu1 %6844, %v113_v3   ;;  %131 = vperm.xlu0 %6843, %v111_v4   ;;  %v5819_v15 = vpack.c.bf16 %v308_v13, %v307_v12  ;;  %v339_v16 = vld [vmem:[#allocation4 + $0x100] sm:$0xff]  ;;  %v117_v23 = vld [vmem:[%s8900_s0 + $0x38] sm:$0xff]  ;;  %v116_v24 = vld [vmem:[%s8900_s0 + $0x30] sm:$0xff]  ;;  %v5853_v26 = vpack.c.bf16 %v358_v22, %v357_v21 }
  0x63   :  { %5818 = vmatprep.subr.bf16.mxu0 %v5817_v10  ;;  %v5851_v19 = vpack.c.bf16 %v340_v17, %v339_v16  ;;  %5850 = vmatprep.subr.bf16.mxu1 %v5849_v14  ;;  %v309_v27 = vld [vmem:[#allocation4 + $0x10] sm:$0xff]  ;;  %v310_v28 = vld [vmem:[#allocation4 + $0x18] sm:$0xff]  ;;  %v327_v32 = vld [vmem:[#allocation4 + $0xa0] sm:$0xff] }
  0x64   :  { %5820 = vmatpush3.bf16.msra.mxu0 %v5819_v15  ;;  %v341_v29 = vld [vmem:[#allocation4 + $0x110] sm:$0xff]  ;;  %v5823_v30 = vpack.c.bf16 %v310_v28, %v309_v27  ;;  %v342_v31 = vld [vmem:[#allocation4 + $0x118] sm:$0xff]  ;;  %v328_v33 = vld [vmem:[#allocation4 + $0xa8] sm:$0xff] }
  0x65   :  { %5852 = vmatpush3.bf16.msra.mxu1 %v5851_v19  ;;  %5822 = vmatprep.subr.bf16.mxu0 %v5821_v25  ;;  %v5855_v34 = vpack.c.bf16 %v342_v31, %v341_v29  ;;  %v5825_v35 = vpack.c.bf16 %v328_v33, %v327_v32  ;;  %v359_v36 = vld [vmem:[#allocation4 + $0x1a0] sm:$0xff]  ;;  %v360_v37 = vld [vmem:[#allocation4 + $0x1a8] sm:$0xff]  ;;  %v329_v44 = vld [vmem:[#allocation4 + $0xb0] sm:$0xff] }
  0x66   :  { %143 = vperm.xlu1 %6844, %v115_v5   ;;  %140 = vperm.xlu0 %6843, %v114_v6   ;;  %v311_v38 = vld [vmem:[#allocation4 + $0x20] sm:$0xff]  ;;  %v5857_v39 = vpack.c.bf16 %v360_v37, %v359_v36  ;;  %v312_v40 = vld [vmem:[#allocation4 + $0x28] sm:$0xff]  ;;  %v330_v45 = vld [vmem:[#allocation4 + $0xb8] sm:$0xff] }
  0x67   :  { %5854 = vmatprep.subr.bf16.mxu1 %v5853_v26  ;;  %v343_v41 = vld [vmem:[#allocation4 + $0x120] sm:$0xff]  ;;  %v344_v42 = vld [vmem:[#allocation4 + $0x128] sm:$0xff]  ;;  %v5827_v43 = vpack.c.bf16 %v312_v40, %v311_v38  ;;  %v361_v46 = vld [vmem:[#allocation4 + $0x1b0] sm:$0xff]  ;;  %v5829_v53 = vpack.c.bf16 %v330_v45, %v329_v44 }
  0x68   :  { %5824 = vmatpush3.bf16.msra.mxu0 %v5823_v30  ;;  %v362_v47 = vld [vmem:[#allocation4 + $0x1b8] sm:$0xff]  ;;  %v313_v48 = vld [vmem:[#allocation4 + $0x30] sm:$0xff]  ;;  %v119_v50 = vld [vmem:[%s8900_s0 + $0x48] sm:$0xff]  ;;  %v5859_v52 = vpack.c.bf16 %v344_v42, %v343_v41 }
  0x69   :  { %v314_v49 = vld [vmem:[#allocation4 + $0x38] sm:$0xff]  ;;  %5856 = vmatpush3.bf16.msra.mxu1 %v5855_v34  ;;  %5826 = vmatprep.subr.bf16.mxu0 %v5825_v35  ;;  %v345_v54 = vld [vmem:[#allocation4 + $0x130] sm:$0xff]  ;;  %v5861_v55 = vpack.c.bf16 %v362_v47, %v361_v46  ;;  %v331_v57 = vld [vmem:[#allocation4 + $0xc0] sm:$0xff] }
  0x6a   :  { %149 = vperm.xlu1 %6844, %v117_v23   ;;  %146 = vperm.xlu0 %6843, %v116_v24   ;;  %v118_v51 = vld [vmem:[%s8900_s0 + $0x40] sm:$0xff]  ;;  %v332_v58 = vld [vmem:[#allocation4 + $0xc8] sm:$0xff]  ;;  %v5831_v59 = vpack.c.bf16 %v314_v49, %v313_v48  ;;  %v363_v60 = vld [vmem:[#allocation4 + $0x1c0] sm:$0xff] }
  0x6b   :  { %5858 = vmatprep.subr.bf16.mxu1 %v5857_v39  ;;  %v346_v56 = vld [vmem:[#allocation4 + $0x138] sm:$0xff]  ;;  %v364_v61 = vld [vmem:[#allocation4 + $0x1c8] sm:$0xff]  ;;  %v121_v62 = vld [vmem:[%s8900_s0 + $0x58] sm:$0xff]  ;;  %v5833_v3 = vpack.c.bf16 %v332_v58, %v331_v57 }
  0x6c   :  { %5828 = vmatpush3.bf16.msra.mxu0 %v5827_v43  ;;  %v315_v63 = vld [vmem:[#allocation4 + $0x40] sm:$0xff]  ;;  %v316_v0 = vld [vmem:[#allocation4 + $0x48] sm:$0xff]  ;;  %v5863_v2 = vpack.c.bf16 %v346_v56, %v345_v54  ;;  %v333_v4 = vld [vmem:[#allocation4 + $0xd0] sm:$0xff]  ;;  %v5865_v6 = vpack.c.bf16 %v364_v61, %v363_v60 }
  0x6d   :  { %v120_v1 = vld [vmem:[%s8900_s0 + $0x50] sm:$0xff]  ;;  %5860 = vmatpush3.bf16.msra.mxu1 %v5859_v52  ;;  %5830 = vmatprep.subr.bf16.mxu0 %v5829_v53  ;;  %v334_v5 = vld [vmem:[#allocation4 + $0xd8] sm:$0xff]  ;;  %v347_v7 = vld [vmem:[#allocation4 + $0x140] sm:$0xff]  ;;  %v5835_v9 = vpack.c.bf16 %v316_v0, %v315_v63 }
  0x6e   :  { %155 = vperm.xlu1 %6844, %v119_v50   ;;  %152 = vperm.xlu0 %6843, %v118_v51   ;;  %v348_v8 = vld [vmem:[#allocation4 + $0x148] sm:$0xff]  ;;  %v365_v10 = vld [vmem:[#allocation4 + $0x1d0] sm:$0xff]  ;;  %v366_v11 = vld [vmem:[#allocation4 + $0x1d8] sm:$0xff]  ;;  %v5837_v12 = vpack.c.bf16 %v334_v5, %v333_v4  ;;  %v122_v51 = vlaneseq }
  0x6f   :  { %5862 = vmatprep.subr.bf16.mxu1 %v5861_v55  ;;  %v317_v13 = vld [vmem:[#allocation4 + $0x50] sm:$0xff]  ;;  %v318_v14 = vld [vmem:[#allocation4 + $0x58] sm:$0xff]  ;;  %v5867_v15 = vpack.c.bf16 %v348_v8, %v347_v7  ;;  %v335_v16 = vld [vmem:[#allocation4 + $0xe0] sm:$0xff]  ;;  %v5869_v18 = vpack.c.bf16 %v366_v11, %v365_v10 }
  0x70   :  { %5832 = vmatpush3.bf16.msra.mxu0 %v5831_v59  ;;  %v336_v17 = vld [vmem:[#allocation4 + $0xe8] sm:$0xff]  ;;  %v349_v19 = vld [vmem:[#allocation4 + $0x150] sm:$0xff]  ;;  %v350_v20 = vld [vmem:[#allocation4 + $0x158] sm:$0xff]  ;;  %v5839_v21 = vpack.c.bf16 %v318_v14, %v317_v13  ;;  %v7441_v52 = vand.u32 127, %v122_v51 }
  0x71   :  { %5864 = vmatpush3.bf16.msra.mxu1 %v5863_v2  ;;  %5834 = vmatprep.subr.bf16.mxu0 %v5833_v3  ;;  %v367_v22 = vld [vmem:[#allocation4 + $0x1e0] sm:$0xff]  ;;  %v368_v23 = vld [vmem:[#allocation4 + $0x1e8] sm:$0xff]  ;;  %v5841_v24 = vpack.c.bf16 %v336_v17, %v335_v16  ;;  %v5871_v27 = vpack.c.bf16 %v350_v20, %v349_v19  ;;  %v337_v28 = vld [vmem:[#allocation4 + $0xf0] sm:$0xff] }
  0x72   :  { %161 = vperm.xlu1 %6844, %v121_v62   ;;  %158 = vperm.xlu0 %6843, %v120_v1   ;;  %v319_v25 = vld [vmem:[#allocation4 + $0x60] sm:$0xff]  ;;  %v320_v26 = vld [vmem:[#allocation4 + $0x68] sm:$0xff]  ;;  %v338_v29 = vld [vmem:[#allocation4 + $0xf8] sm:$0xff]  ;;  %v5873_v30 = vpack.c.bf16 %v368_v23, %v367_v22  ;;  %v7444_v54 = vadd.s32 128, %v7441_v52  ;;  %v7447_v55 = vadd.s32 384, %v7441_v52  ;;  %v7450_v56 = vadd.s32 256, %v7441_v52 }
  0x73   :  { %5866 = vmatprep.subr.bf16.mxu1 %v5865_v6  ;;  %v351_v31 = vld [vmem:[#allocation4 + $0x160] sm:$0xff]  ;;  %v352_v32 = vld [vmem:[#allocation4 + $0x168] sm:$0xff]  ;;  %v5843_v33 = vpack.c.bf16 %v320_v26, %v319_v25  ;;  %v369_v34 = vld [vmem:[#allocation4 + $0x1f0] sm:$0xff]  ;;  %v5845_v36 = vpack.c.bf16 %v338_v29, %v337_v28  ;;  %v7261_v1 = vmov 1.0  }
  0x74   :  { %5836 = vmatpush3.bf16.msra.mxu0 %v5835_v9  ;;  %v370_v35 = vld [vmem:[#allocation4 + $0x1f8] sm:$0xff]  ;;  %v321_v37 = vld [vmem:[#allocation4 + $0x70] sm:$0xff]  ;;  %v5875_v39 = vpack.c.bf16 %v352_v32, %v351_v31  ;;  %v622_v45 = vld [vmem:[#allocation7 + $0x8] sm:$0xff] }
  0x75   :  { %5838 = vmatprep.subr.bf16.mxu0 %v5837_v12  ;;  %5868 = vmatpush3.bf16.msra.mxu1 %v5867_v15  ;;  %v322_v38 = vld [vmem:[#allocation4 + $0x78] sm:$0xff]  ;;  %v5877_v40 = vpack.c.bf16 %v370_v35, %v369_v34  ;;  %v353_v41 = vld [vmem:[#allocation4 + $0x170] sm:$0xff]  ;;  %v625_v46 = vld [vmem:[#allocation7 + $0x20] sm:$0xff] }
  0x76   :  { %5870 = vmatprep.subr.bf16.mxu1 %v5869_v18  ;;  %v354_v42 = vld [vmem:[#allocation4 + $0x178] sm:$0xff]  ;;  %v5847_v43 = vpack.c.bf16 %v322_v38, %v321_v37  ;;  %v5881_v47 = vpack.c.bf16 %v625_v46, %v622_v45  ;;  %v623_v48 = vld [vmem:[#allocation7 + $0x10] sm:$0xff]  ;;  %v626_v49 = vld [vmem:[#allocation7 + $0x28] sm:$0xff] }
  0x77   :  { %v5879_v44 = vpack.c.bf16 %v354_v42, %v353_v41  ;;  %v5913_v50 = vpack.c.bf16 %v626_v49, %v623_v48  ;;  %v621_v53 = vld [vmem:[#allocation7] sm:$0xff]  ;;  %v624_v57 = vld [vmem:[#allocation7 + $0x18] sm:$0xff]  ;;  %v631_v59 = vld [vmem:[#allocation7 + $0x50] sm:$0xff] }
  0x78   :  { %5840 = vmatpush3.bf16.msra.mxu0 %v5839_v21  ;;  %v628_v58 = vld [vmem:[#allocation7 + $0x38] sm:$0xff]  ;;  %v5883_v61 = vpack.c.bf16 %v624_v57, %v621_v53  ;;  %v627_v63 = vld [vmem:[#allocation7 + $0x30] sm:$0xff]  ;;  %v630_v0 = vld [vmem:[#allocation7 + $0x48] sm:$0xff] }
  0x79   :  { %5842 = vmatprep.subr.bf16.mxu0 %v5841_v24  ;;  %5872 = vmatpush3.bf16.msra.mxu1 %v5871_v27  ;;  %v5885_v62 = vpack.c.bf16 %v631_v59, %v628_v58  ;;  %v634_v3 = vld [vmem:[#allocation7 + $0x68] sm:$0xff]  ;;  %v637_v4 = vld [vmem:[#allocation7 + $0x80] sm:$0xff]  ;;  %v5887_v6 = vpack.c.bf16 %v630_v0, %v627_v63  ;;  %v636_v9 = vld [vmem:[#allocation7 + $0x78] sm:$0xff] }
  0x7a   :  { %5874 = vmatprep.subr.bf16.mxu1 %v5873_v30  ;;  %v5889_v7 = vpack.c.bf16 %v637_v4, %v634_v3  ;;  %v633_v8 = vld [vmem:[#allocation7 + $0x60] sm:$0xff]  ;;  %v640_v10 = vld [vmem:[#allocation7 + $0x98] sm:$0xff]  ;;  %v643_v11 = vld [vmem:[#allocation7 + $0xb0] sm:$0xff] }
  0x7b   :  { %v5891_v12 = vpack.c.bf16 %v636_v9, %v633_v8  ;;  %v5893_v14 = vpack.c.bf16 %v643_v11, %v640_v10  ;;  %v639_v15 = vld [vmem:[#allocation7 + $0x90] sm:$0xff]  ;;  %v642_v16 = vld [vmem:[#allocation7 + $0xa8] sm:$0xff]  ;;  %v649_v18 = vld [vmem:[#allocation7 + $0xe0] sm:$0xff]  ;;  %v8913_v11 = vmov 0.0  }
  0x7c   :  { %5844 = vmatpush3.bf16.msra.mxu0 %v5843_v33  ;;  %v646_v17 = vld [vmem:[#allocation7 + $0xc8] sm:$0xff]  ;;  %v5895_v20 = vpack.c.bf16 %v642_v16, %v639_v15  ;;  %v645_v22 = vld [vmem:[#allocation7 + $0xc0] sm:$0xff]  ;;  %v648_v23 = vld [vmem:[#allocation7 + $0xd8] sm:$0xff] }
  0x7d   :  { %5846 = vmatprep.subr.bf16.mxu0 %v5845_v36  ;;  %5876 = vmatpush3.bf16.msra.mxu1 %v5875_v39  ;;  %v5897_v21 = vpack.c.bf16 %v649_v18, %v646_v17  ;;  %v629_v24 = vld [vmem:[#allocation7 + $0x40] sm:$0xff]  ;;  %v632_v25 = vld [vmem:[#allocation7 + $0x58] sm:$0xff]  ;;  %v5899_v27 = vpack.c.bf16 %v648_v23, %v645_v22  ;;  %v635_v29 = vld [vmem:[#allocation7 + $0x70] sm:$0xff] }
  0x7e   :  { %5878 = vmatprep.subr.bf16.mxu1 %v5877_v40  ;;  %v5917_v28 = vpack.c.bf16 %v632_v25, %v629_v24  ;;  %v652_v30 = vld [vmem:[#allocation7 + $0xf8] sm:$0xff]  ;;  %v655_v31 = vld [vmem:[#allocation7 + $0x110] sm:$0xff]  ;;  %v638_v32 = vld [vmem:[#allocation7 + $0x88] sm:$0xff] }
  0x7f   :  { %v651_v33 = vld [vmem:[#allocation7 + $0xf0] sm:$0xff]  ;;  %v654_v34 = vld [vmem:[#allocation7 + $0x108] sm:$0xff]  ;;  %v5901_v36 = vpack.c.bf16 %v655_v31, %v652_v30  ;;  %v641_v37 = vld [vmem:[#allocation7 + $0xa0] sm:$0xff]  ;;  %v5921_v38 = vpack.c.bf16 %v638_v32, %v635_v29 }
  0x80   :  { %5848 = vmatpush3.bf16.msra.mxu0 %v5847_v43  ;;  %v5903_v39 = vpack.c.bf16 %v654_v34, %v651_v33  ;;  %v644_v40 = vld [vmem:[#allocation7 + $0xb8] sm:$0xff]  ;;  %v658_v41 = vld [vmem:[#allocation7 + $0x128] sm:$0xff]  ;;  %v661_v42 = vld [vmem:[#allocation7 + $0x140] sm:$0xff] }
  0x81   :  { %5880 = vmatpush3.bf16.msra.mxu1 %v5879_v44  ;;  %5882 = vmatprep.subr.bf16.mxu0 %v5881_v47  ;;  %v657_v43 = vld [vmem:[#allocation7 + $0x120] sm:$0xff]  ;;  %v660_v44 = vld [vmem:[#allocation7 + $0x138] sm:$0xff]  ;;  %v5925_v46 = vpack.c.bf16 %v644_v40, %v641_v37  ;;  %v5905_v47 = vpack.c.bf16 %v661_v42, %v658_v41  ;;  %v647_v53 = vld [vmem:[#allocation7 + $0xd0] sm:$0xff] }
  0x82   :  { %5914 = vmatprep.subr.bf16.mxu1 %v5913_v50  ;;  %v5907_v48 = vpack.c.bf16 %v660_v44, %v657_v43  ;;  %v664_v49 = vld [vmem:[#allocation7 + $0x158] sm:$0xff]  ;;  %v650_v57 = vld [vmem:[#allocation7 + $0xe8] sm:$0xff]  ;;  %v663_v4 = vld [vmem:[#allocation7 + $0x150] sm:$0xff] }
  0x83   :  { %v662_v8 = vld [vmem:[#allocation7 + $0x148] sm:$0xff]  ;;  %v668_v9 = vld [vmem:[#allocation7 + $0x178] sm:$0xff]  ;;  %v970_v15 = vld [vmem:[#allocation9 + $0x10] sm:$0xff] }
  0x84   :  { %v973_v16 = vld [vmem:[#allocation9 + $0x28] sm:$0xff]  ;;  %v976_v25 = vld [vmem:[#allocation9 + $0x40] sm:$0xff]  ;;  %v971_v30 = vld [vmem:[#allocation9 + $0x18] sm:$0xff] }
  0x85   :  { %v968_v29 = vld [vmem:[#allocation9] sm:$0xff]  ;;  %v975_v33 = vld [vmem:[#allocation9 + $0x38] sm:$0xff]  ;;  %v978_v34 = vld [vmem:[#allocation9 + $0x50] sm:$0xff] }
  0x86   :  { %v985_v40 = vld [vmem:[#allocation9 + $0x88] sm:$0xff]  ;;  %v5947_v41 = vpack.c.bf16 %v971_v30, %v968_v29  ;;  %v5949_v44 = vpack.c.bf16 %v978_v34, %v975_v33  ;;  %v995_v33 = vld [vmem:[#allocation9 + $0xd8] sm:$0xff] }
  0xdd   :  { %v129_v60 = vpop.permute.xlu0 %128  ;;  %v135_v2 = vpop.permute.xlu1 %134 }
  0xde   :  { %vm164_vm0 = vcmp.eq.s32.totalorder %v129_v60, %v7444_v54  ;;  %vm166_vm1 = vcmp.eq.s32.totalorder %v129_v60, %v7447_v55  ;;  %vm163_vm2 = vcmp.eq.s32.totalorder %v129_v60, %v7441_v52  ;;  %vm165_vm3 = vcmp.eq.s32.totalorder %v129_v60, %v7450_v56 }
  0xdf   :  { %4855 = vmatprep.mubr.msk.f32.mxu0 %vm164_vm0, %v7261_v1  ;;  %4879 = vmatprep.mubr.msk.f32.mxu1 %vm166_vm1, %v7261_v1  ;;  %vm172_vm4 = vcmp.eq.s32.totalorder %v135_v2, %v7444_v54  ;;  %vm174_vm5 = vcmp.eq.s32.totalorder %v135_v2, %v7447_v55  ;;  %vm171_vm10 = vcmp.eq.s32.totalorder %v135_v2, %v7441_v52 }
  0xe0   :  { %4856 = vmatmul.mubr.msk.f32.vlgmr.msra.gmra.mrb[0].mxu0 %vm163_vm2, %v7261_v1  ;;  %4880 = vmatmul.mubr.msk.f32.vlgmr.msra.gmra.mrb[0].mxu1 %vm165_vm3, %v7261_v1  ;;  %vm173_vm11 = vcmp.eq.s32.totalorder %v135_v2, %v7450_v56  ;;  %v5929_v60 = vpack.c.bf16 %v650_v57, %v647_v53 }
  0xe1   :  { %v132_v5 = vpop.permute.xlu0 %131  ;;  %5884 = vmatpush1.bf16.msra.mxu0 %v5883_v61  ;;  %5916 = vmatpush3.bf16.msra.mxu1 %v5913_v50  ;;  %v138_v13 = vpop.permute.xlu1 %137  ;;  %v667_v50 = vld [vmem:[#allocation7 + $0x170] sm:$0xff]  ;;  %v653_v61 = vld [vmem:[#allocation7 + $0x100] sm:$0xff] }
  0xe2   :  { %vm168_vm6 = vcmp.eq.s32.totalorder %v132_v5, %v7444_v54  ;;  %vm170_vm7 = vcmp.eq.s32.totalorder %v132_v5, %v7447_v55  ;;  %vm167_vm8 = vcmp.eq.s32.totalorder %v132_v5, %v7441_v52  ;;  %vm169_vm9 = vcmp.eq.s32.totalorder %v132_v5, %v7450_v56  ;;  %5886 = vmatprep.subr.bf16.mxu0 %v5885_v62  ;;  %v656_v62 = vld [vmem:[#allocation7 + $0x118] sm:$0xff]  ;;  %v666_v5 = vld [vmem:[#allocation7 + $0x168] sm:$0xff] }
  0xe3   :  { %4857 = vmatprep.mubr.msk.f32.mxu0 %vm168_vm6, %v7261_v1  ;;  %4881 = vmatprep.mubr.msk.f32.mxu1 %vm170_vm7, %v7261_v1  ;;  %vm176_vm12 = vcmp.eq.s32.totalorder %v138_v13, %v7444_v54  ;;  %vm178_vm13 = vcmp.eq.s32.totalorder %v138_v13, %v7447_v55  ;;  %vm175_vm14 = vcmp.eq.s32.totalorder %v138_v13, %v7441_v52 }
  0xe4   :  { %4858 = vmatmul.mubr.msk.f32.gmra.mrb[2].mxu0 %vm167_vm8, %v7261_v1  ;;  %4882 = vmatmul.mubr.msk.f32.gmra.mrb[2].mxu1 %vm169_vm9, %v7261_v1  ;;  %vm177_vm15 = vcmp.eq.s32.totalorder %v138_v13, %v7450_v56  ;;  %v5909_v59 = vpack.c.bf16 %v667_v50, %v664_v49  ;;  %v5933_v0 = vpack.c.bf16 %v656_v62, %v653_v61  ;;  %v981_v49 = vld [vmem:[#allocation9 + $0x68] sm:$0xff]  ;;  %v984_v50 = vld [vmem:[#allocation9 + $0x80] sm:$0xff]  ;;  %v991_v61 = vld [vmem:[#allocation9 + $0xb8] sm:$0xff] }
  0xe5   :  { %4859 = vmatprep.mubr.msk.f32.mxu0 %vm172_vm4, %v7261_v1  ;;  %4883 = vmatprep.mubr.msk.f32.mxu1 %vm174_vm5, %v7261_v1  ;;  %v141_v19 = vpop.permute.xlu0 %140  ;;  %v144_v26 = vpop.permute.xlu1 %143 }
  0xe6   :  { %5888 = vmatpush1.bf16.msra.mxu0 %v5887_v6  ;;  %vm180_vm0 = vcmp.eq.s32.totalorder %v141_v19, %v7444_v54  ;;  %vm182_vm1 = vcmp.eq.s32.totalorder %v141_v19, %v7447_v55  ;;  %vm179_vm2 = vcmp.eq.s32.totalorder %v141_v19, %v7441_v52  ;;  %vm181_vm3 = vcmp.eq.s32.totalorder %v141_v19, %v7450_v56  ;;  %v659_v6 = vld [vmem:[#allocation7 + $0x130] sm:$0xff] }
  0xe7   :  { %5890 = vmatprep.subr.bf16.mxu0 %v5889_v7  ;;  %vm184_vm4 = vcmp.eq.s32.totalorder %v144_v26, %v7444_v54  ;;  %vm186_vm5 = vcmp.eq.s32.totalorder %v144_v26, %v7447_v55  ;;  %vm183_vm6 = vcmp.eq.s32.totalorder %v144_v26, %v7441_v52  ;;  %vm185_vm7 = vcmp.eq.s32.totalorder %v144_v26, %v7450_v56  ;;  %v979_v26 = vld [vmem:[#allocation9 + $0x58] sm:$0xff] }
  0xe8   :  { %4860 = vmatmul.mubr.msk.f32.gmra.mrb[4].mxu0 %vm171_vm10, %v7261_v1  ;;  %4884 = vmatmul.mubr.msk.f32.gmra.mrb[4].mxu1 %vm173_vm11, %v7261_v1  ;;  %v5911_v7 = vpack.c.bf16 %v666_v5, %v663_v4  ;;  %v983_v4 = vld [vmem:[#allocation9 + $0x78] sm:$0xff] }
  0xe9   :  { %4861 = vmatprep.mubr.msk.f32.mxu0 %vm176_vm12, %v7261_v1  ;;  %4885 = vmatprep.mubr.msk.f32.mxu1 %vm178_vm13, %v7261_v1  ;;  %v147_v35 = vpop.permute.xlu0 %146  ;;  %v150_v45 = vpop.permute.xlu1 %149 }
  0xea   :  { %5892 = vmatpush1.bf16.msra.mxu0 %v5891_v12  ;;  %5918 = vmatprep.subr.bf16.mxu1 %v5917_v28  ;;  %vm188_vm8 = vcmp.eq.s32.totalorder %v147_v35, %v7444_v54  ;;  %vm190_vm9 = vcmp.eq.s32.totalorder %v147_v35, %v7447_v55  ;;  %vm187_vm10 = vcmp.eq.s32.totalorder %v147_v35, %v7441_v52 }
  0xeb   :  { %5894 = vmatprep.subr.bf16.mxu0 %v5893_v14  ;;  %5920 = vmatpush3.bf16.msra.mxu1 %v5917_v28  ;;  %vm189_vm11 = vcmp.eq.s32.totalorder %v147_v35, %v7450_v56  ;;  %vm192_vm12 = vcmp.eq.s32.totalorder %v150_v45, %v7444_v54  ;;  %vm194_vm13 = vcmp.eq.s32.totalorder %v150_v45, %v7447_v55 }
  0xec   :  { %4862 = vmatmul.mubr.msk.f32.gmra.mrb[6].mxu0 %vm175_vm14, %v7261_v1  ;;  %4886 = vmatmul.mubr.msk.f32.gmra.mrb[6].mxu1 %vm177_vm15, %v7261_v1  ;;  %vm191_vm14 = vcmp.eq.s32.totalorder %v150_v45, %v7441_v52  ;;  %vm193_vm15 = vcmp.eq.s32.totalorder %v150_v45, %v7450_v56  ;;  %v5981_v35 = vpack.c.bf16 %v979_v26, %v976_v25  ;;  %v974_v45 = vld [vmem:[#allocation9 + $0x30] sm:$0xff]  ;;  %v1000_v26 = vld [vmem:[#allocation9 + $0x100] sm:$0xff] }
  0xed   :  { %4863 = vmatprep.mubr.msk.f32.mxu0 %vm180_vm0, %v7261_v1  ;;  %4887 = vmatprep.mubr.msk.f32.mxu1 %vm182_vm1, %v7261_v1  ;;  %v153_v58 = vpop.permute.xlu0 %152  ;;  %v156_v63 = vpop.permute.xlu1 %155 }
  0xee   :  { %5896 = vmatpush1.bf16.msra.mxu0 %v5895_v20  ;;  %5922 = vmatprep.subr.bf16.mxu1 %v5921_v38  ;;  %vm196_vm0 = vcmp.eq.s32.totalorder %v153_v58, %v7444_v54  ;;  %vm198_vm1 = vcmp.eq.s32.totalorder %v153_v58, %v7447_v55 }
  0xef   :  { %5898 = vmatprep.subr.bf16.mxu0 %v5897_v21  ;;  %5924 = vmatpush3.bf16.msra.mxu1 %v5921_v38  ;;  %v5978_v21 = vpack.c.bf16 %v973_v16, %v970_v15  ;;  %v986_v16 = vld [vmem:[#allocation9 + $0x90] sm:$0xff] }
  0xf0   :  { %4864 = vmatmul.mubr.msk.f32.gmra.mrb[8].mxu0 %vm179_vm2, %v7261_v1  ;;  %4888 = vmatmul.mubr.msk.f32.gmra.mrb[8].mxu1 %vm181_vm3, %v7261_v1  ;;  %vm195_vm2 = vcmp.eq.s32.totalorder %v153_v58, %v7441_v52  ;;  %vm197_vm3 = vcmp.eq.s32.totalorder %v153_v58, %v7450_v56 }
  0xf1   :  { %4865 = vmatprep.mubr.msk.f32.mxu0 %vm184_vm4, %v7261_v1  ;;  %4889 = vmatprep.mubr.msk.f32.mxu1 %vm186_vm5, %v7261_v1  ;;  %vm200_vm4 = vcmp.eq.s32.totalorder %v156_v63, %v7444_v54  ;;  %vm202_vm5 = vcmp.eq.s32.totalorder %v156_v63, %v7447_v55  ;;  %v159_v2 = vpop.permute.xlu0 %158  ;;  %v162_v3 = vpop.permute.xlu1 %161 }
  0xf2   :  { %5900 = vmatpush1.bf16.msra.mxu0 %v5899_v27  ;;  %5926 = vmatprep.subr.bf16.mxu1 %v5925_v46 }
  0xf3   :  { %5902 = vmatprep.subr.bf16.mxu0 %v5901_v36  ;;  %5928 = vmatpush3.bf16.msra.mxu1 %v5925_v46  ;;  %v977_v46 = vld [vmem:[#allocation9 + $0x48] sm:$0xff] }
  0xf4   :  { %4866 = vmatmul.mubr.msk.f32.gmra.mrb[10].mxu0 %vm183_vm6, %v7261_v1  ;;  %4890 = vmatmul.mubr.msk.f32.gmra.mrb[10].mxu1 %vm185_vm7, %v7261_v1  ;;  %vm199_vm6 = vcmp.eq.s32.totalorder %v156_v63, %v7441_v52  ;;  %vm201_vm7 = vcmp.eq.s32.totalorder %v156_v63, %v7450_v56  ;;  %v5951_v62 = vpack.c.bf16 %v977_v46, %v974_v45 }
  0xf5   :  { %4867 = vmatprep.mubr.msk.f32.mxu0 %vm188_vm8, %v7261_v1  ;;  %4891 = vmatprep.mubr.msk.f32.mxu1 %vm190_vm9, %v7261_v1  ;;  %vm204_vm8 = vcmp.eq.s32.totalorder %v159_v2, %v7444_v54  ;;  %vm206_vm9 = vcmp.eq.s32.totalorder %v159_v2, %v7447_v55 }
  0xf6   :  { %5904 = vmatpush1.bf16.msra.mxu0 %v5903_v39  ;;  %5930 = vmatprep.subr.bf16.mxu1 %v5929_v60  ;;  %v982_v39 = vld [vmem:[#allocation9 + $0x70] sm:$0xff] }
  0xf7   :  { %5906 = vmatprep.subr.bf16.mxu0 %v5905_v47  ;;  %5932 = vmatpush3.bf16.msra.mxu1 %v5929_v60  ;;  %v5984_v53 = vpack.c.bf16 %v985_v40, %v982_v39  ;;  %v988_v60 = vld [vmem:[#allocation9 + $0xa0] sm:$0xff] }
  0xf8   :  { %4868 = vmatmul.mubr.msk.f32.gmra.mrb[12].mxu0 %vm187_vm10, %v7261_v1  ;;  %4892 = vmatmul.mubr.msk.f32.gmra.mrb[12].mxu1 %vm189_vm11, %v7261_v1  ;;  %vm203_vm10 = vcmp.eq.s32.totalorder %v159_v2, %v7441_v52  ;;  %vm205_vm11 = vcmp.eq.s32.totalorder %v159_v2, %v7450_v56  ;;  %v5953_v2 = vpack.c.bf16 %v984_v50, %v981_v49  ;;  %v1001_v49 = vld [vmem:[#allocation9 + $0x108] sm:$0xff] }
  0xf9   :  { %4869 = vmatprep.mubr.msk.f32.mxu0 %vm192_vm12, %v7261_v1  ;;  %4893 = vmatprep.mubr.msk.f32.mxu1 %vm194_vm13, %v7261_v1  ;;  %vm208_vm12 = vcmp.eq.s32.totalorder %v162_v3, %v7444_v54  ;;  %vm210_vm13 = vcmp.eq.s32.totalorder %v162_v3, %v7447_v55  ;;  %v5937_v54 = vpack.c.bf16 %v662_v8, %v659_v6  ;;  %v665_v55 = vld [vmem:[#allocation7 + $0x160] sm:$0xff]  ;;  %v990_v8 = vld [vmem:[#allocation9 + $0xb0] sm:$0xff] }
  0xfa   :  { %5908 = vmatpush1.bf16.msra.mxu0 %v5907_v48  ;;  %5934 = vmatprep.subr.bf16.mxu1 %v5933_v0  ;;  %v5941_v10 = vpack.c.bf16 %v668_v9, %v665_v55 }
  0xfb   :  { %5910 = vmatprep.subr.bf16.mxu0 %v5909_v59  ;;  %5936 = vmatpush3.bf16.msra.mxu1 %v5933_v0 }
  0xfc   :  { %4870 = vmatmul.mubr.msk.f32.gmra.mrb[14].mxu0 %vm191_vm14, %v7261_v1  ;;  %4894 = vmatmul.mubr.msk.f32.gmra.mrb[14].mxu1 %vm193_vm15, %v7261_v1  ;;  %vm207_vm14 = vcmp.eq.s32.totalorder %v162_v3, %v7441_v52  ;;  %vm209_vm15 = vcmp.eq.s32.totalorder %v162_v3, %v7450_v56  ;;  %v7263_v52 = vmov 0.0|0.0   ;;  %v969_v56 = vld [vmem:[#allocation9 + $0x8] sm:$0xff]  ;;  %v980_v3 = vld [vmem:[#allocation9 + $0x60] sm:$0xff] }
  0xfd   :  { %4871 = vmatprep.mubr.msk.f32.mxu0 %vm196_vm0, %v7261_v1  ;;  %4895 = vmatprep.mubr.msk.f32.mxu1 %vm198_vm1, %v7261_v1  ;;  %vm7264_vm0 = vmmov 0  }
  0xfe   :  { %5912 = vmatpush1.bf16.msra.mxu0 %v5911_v7  ;;  %5938 = vmatprep.subr.bf16.mxu1 %v5937_v54  ;;  %v987_v7 = vld [vmem:[#allocation9 + $0x98] sm:$0xff] }
  0xff   :  { %5940 = vmatpush3.bf16.msra.mxu1 %v5937_v54  ;;  %5977 = vmatprep.subr.bf16.mxu0 %v7263_v52  ;;  %v5987_v54 = vpack.c.bf16 %v991_v61, %v988_v60  ;;  %v5957_v15 = vpack.c.bf16 %v990_v8, %v987_v7  ;;  %v1004_v8 = vld [vmem:[#allocation9 + $0x120] sm:$0xff] }
 0x100   :  { %4872 = vmatmul.mubr.msk.f32.gmra.mrb[16].mxu0 %vm195_vm2, %v7261_v1  ;;  %4896 = vmatmul.mubr.msk.f32.gmra.mrb[16].mxu1 %vm197_vm3, %v7261_v1 }
 0x101   :  { %4873 = vmatprep.mubr.msk.f32.mxu0 %vm200_vm4, %v7261_v1  ;;  %4897 = vmatprep.mubr.msk.f32.mxu1 %vm202_vm5, %v7261_v1 }
 0x102   :  { %5942 = vmatprep.subr.bf16.mxu1 %v5941_v10 }
 0x103   :  { %5944 = vmatpush3.bf16.msra.mxu1 %v5941_v10 }
 0x104   :  { %4874 = vmatmul.mubr.msk.f32.gmra.mrb[18].mxu0 %vm199_vm6, %v7261_v1  ;;  %4898 = vmatmul.mubr.msk.f32.gmra.mrb[18].mxu1 %vm201_vm7, %v7261_v1 }
 0x105   :  { %4875 = vmatprep.mubr.msk.f32.mxu0 %vm204_vm8, %v7261_v1  ;;  %4899 = vmatprep.mubr.msk.f32.mxu1 %vm206_vm9, %v7261_v1 }
 0x108   :  { %4876 = vmatmul.mubr.msk.f32.gmra.mrb[20].mxu0 %vm203_vm10, %v7261_v1  ;;  %4900 = vmatmul.mubr.msk.f32.gmra.mrb[20].mxu1 %vm205_vm11, %v7261_v1 }
 0x109   :  { %4877 = vmatprep.mubr.msk.f32.mxu0 %vm208_vm12, %v7261_v1  ;;  %4901 = vmatprep.mubr.msk.f32.mxu1 %vm210_vm13, %v7261_v1 }
 0x10c   :  { %4878 = vmatmul.mubr.msk.f32.gmra.mrb[22].mxu0 %vm207_vm14, %v7261_v1  ;;  %4902 = vmatmul.mubr.msk.f32.gmra.mrb[22].mxu1 %vm209_vm15, %v7261_v1  ;;  %v972_v1 = vld [vmem:[#allocation9 + $0x20] sm:$0xff] }
 0x10d   :  { %733 = vmatprep.mubr.f32.mxu0 %v8913_v11  ;;  %v5945_v12 = vpack.c.bf16 %v972_v1, %v969_v56  ;;  %v994_v56 = vld [vmem:[#allocation9 + $0xd0] sm:$0xff]  ;;  %v997_v1 = vld [vmem:[#allocation9 + $0xe8] sm:$0xff] }
 0x10f   :  { %5946 = vmatprep.subr.bf16.mxu1 %v5945_v12  ;;  %v5955_v12 = vpack.c.bf16 %v983_v4, %v980_v3 }
 0x1b3   :  { %v4959_v13 = vpop.f32.mrb[0].mxu0  ;;  %v5027_v14 = vpop.f32.mrb[0].mxu1 }
 0x1b4   :  { %v4960_v17 = vpop.f32.mrb[1].mxu0  ;;  %v5028_v18 = vpop.f32.mrb[1].mxu1 }
 0x1b5   :  { %v4961_v19 = vadd.f32 %v4960_v17, %v4959_v13  ;;  %v5029_v20 = vadd.f32 %v5028_v18, %v5027_v14  ;;  %v989_v17 = vld [vmem:[#allocation9 + $0xa8] sm:$0xff] }
 0x1b7   :  { %v563_v22 = vadd.f32 %v5029_v20, %v4961_v19  ;;  %v4962_v23 = vpop.f32.mrb[2].mxu0  ;;  %v5030_v24 = vpop.f32.mrb[2].mxu1  ;;  %v993_v20 = vld [vmem:[#allocation9 + $0xc8] sm:$0xff] }
 0x1b8   :  { %v4963_v27 = vpop.f32.mrb[3].mxu0  ;;  %v5031_v28 = vpop.f32.mrb[3].mxu1 }
 0x1b9   :  { %v4964_v31 = vadd.f32 %v4963_v27, %v4962_v23  ;;  %v5032_v32 = vadd.f32 %v5031_v28, %v5030_v24  ;;  %734 = vmatmul.mubr.f32.vlgmr.msra.gmra.mrb[24].mxu0 %v563_v22  ;;  %5344 = vmatprep.mubr.f32.mxu1 %v563_v22  ;;  %v5990_v22 = vpack.c.bf16 %v997_v1, %v994_v56  ;;  %v1003_v27 = vld [vmem:[#allocation9 + $0x118] sm:$0xff]  ;;  %v1014_v56 = vld [vmem:[#allocation9 + $0x170] sm:$0xff] }
 0x1ba   :  { %5979 = vmatpush3.bf16.msra.mxu0 %v5978_v21  ;;  %739 = vmatprep.mubr.f32.mxu0 %v8913_v11  ;;  %v996_v21 = vld [vmem:[#allocation9 + $0xe0] sm:$0xff]  ;;  %v5959_v28 = vpack.c.bf16 %v989_v17, %v986_v16 }
 0x1bb   :  { %v568_v36 = vadd.f32 %v5032_v32, %v4964_v31  ;;  %v4965_v37 = vpop.f32.mrb[4].mxu0  ;;  %v5033_v38 = vpop.f32.mrb[4].mxu1  ;;  %5980 = vmatprep.subr.bf16.mxu0 %v7263_v52  ;;  %v5961_v31 = vpack.c.bf16 %v996_v21, %v993_v20  ;;  %v992_v32 = vld [vmem:[#allocation9 + $0xc0] sm:$0xff]  ;;  %v1010_v20 = vld [vmem:[#allocation9 + $0x150] sm:$0xff]  ;;  %v1013_v21 = vld [vmem:[#allocation9 + $0x168] sm:$0xff] }
 0x1bc   :  { %v4966_v42 = vpop.f32.mrb[5].mxu0  ;;  %v5034_v43 = vpop.f32.mrb[5].mxu1 }
 0x1bd   :  { %v4967_v47 = vadd.f32 %v4966_v42, %v4965_v37  ;;  %v5035_v48 = vadd.f32 %v5034_v43, %v5033_v38  ;;  %740 = vmatmul.mubr.f32.gmra.mrb[26].mxu0 %v568_v36  ;;  %5345 = vmatmul.mubr.f32.vlgmr.msra.gmra.mrb[24].mxu1 %v568_v36  ;;  %v999_v36 = vld [vmem:[#allocation9 + $0xf8] sm:$0xff]  ;;  %v1002_v37 = vld [vmem:[#allocation9 + $0x110] sm:$0xff]  ;;  %v5993_v38 = vpack.c.bf16 %v1003_v27, %v1000_v26  ;;  %v1009_v43 = vld [vmem:[#allocation9 + $0x148] sm:$0xff] }
 0x1be   :  { %5982 = vmatpush3.bf16.msra.mxu0 %v5981_v35  ;;  %745 = vmatprep.mubr.f32.mxu0 %v8913_v11  ;;  %v1006_v42 = vld [vmem:[#allocation9 + $0x130] sm:$0xff]  ;;  %v5975_v27 = vpack.c.bf16 %v1013_v21, %v1010_v20  ;;  %v1209_v20 = vld [vmem:[#allocation10 + $0xe0] sm:$0xff] }
 0x1bf   :  { %v573_v57 = vadd.f32 %v5035_v48, %v4967_v47  ;;  %v4968_v58 = vpop.f32.mrb[6].mxu0  ;;  %v5036_v59 = vpop.f32.mrb[6].mxu1  ;;  %5983 = vmatprep.subr.bf16.mxu0 %v7263_v52  ;;  %5948 = vmatpush1.bf16.msra.mxu1 %v5947_v41  ;;  %v5965_v47 = vpack.c.bf16 %v1002_v37, %v999_v36  ;;  %v998_v48 = vld [vmem:[#allocation9 + $0xf0] sm:$0xff] }
 0x1c0   :  { %v4969_v63 = vpop.f32.mrb[7].mxu0  ;;  %v5037_v0 = vpop.f32.mrb[7].mxu1  ;;  %5950 = vmatprep.subr.bf16.mxu1 %v5949_v44  ;;  %v5963_v44 = vpack.c.bf16 %v995_v33, %v992_v32  ;;  %v5967_v3 = vpack.c.bf16 %v1001_v49, %v998_v48  ;;  %v1184_v48 = vld [vmem:[#allocation10 + $0x18] sm:$0xff]  ;;  %v1183_v49 = vld [vmem:[#allocation10 + $0x10] sm:$0xff] }
 0x1c1   :  { %v4970_v5 = vadd.f32 %v4969_v63, %v4968_v58  ;;  %v5038_v6 = vadd.f32 %v5037_v0, %v5036_v59  ;;  %746 = vmatmul.mubr.f32.gmra.mrb[28].mxu0 %v573_v57  ;;  %5347 = vmatprep.mubr.f32.mxu1 %v573_v57  ;;  %v1005_v57 = vld [vmem:[#allocation9 + $0x128] sm:$0xff]  ;;  %v1008_v58 = vld [vmem:[#allocation9 + $0x140] sm:$0xff]  ;;  %v5996_v59 = vpack.c.bf16 %v1009_v43, %v1006_v42  ;;  %v1015_v0 = vld [vmem:[#allocation9 + $0x178] sm:$0xff] }
 0x1c2   :  { %751 = vmatprep.mubr.f32.mxu0 %v8913_v11  ;;  %5985 = vmatpush3.bf16.msra.mxu0 %v5984_v53  ;;  %v1012_v63 = vld [vmem:[#allocation9 + $0x160] sm:$0xff]  ;;  %v5969_v7 = vpack.c.bf16 %v1008_v58, %v1005_v57  ;;  %v1191_v57 = vld [vmem:[#allocation10 + $0x50] sm:$0xff]  ;;  %v967_v58 = vld [vmem:[%s8902_s2] sm:$0xff] }
 0x1c3   :  { %v578_v55 = vadd.f32 %v5038_v6, %v4970_v5  ;;  %v4971_v9 = vpop.f32.mrb[8].mxu0  ;;  %v5039_v10 = vpop.f32.mrb[8].mxu1  ;;  %5986 = vmatprep.subr.bf16.mxu0 %v7263_v52  ;;  %5952 = vmatpush1.bf16.msra.mxu1 %v5951_v62  ;;  %v1185_v6 = vld [vmem:[#allocation10 + $0x20] sm:$0xff]  ;;  %v5999_v1 = vpack.c.bf16 %v1015_v0, %v1012_v63  ;;  %v1190_v63 = vld [vmem:[#allocation10 + $0x48] sm:$0xff] }
 0x1c4   :  { %v4972_v13 = vpop.f32.mrb[9].mxu0  ;;  %v5040_v14 = vpop.f32.mrb[9].mxu1  ;;  %5954 = vmatprep.subr.bf16.mxu1 %v5953_v2  ;;  %v1182_v2 = vld [vmem:[#allocation10 + $0x8] sm:$0xff]  ;;  %v1189_v0 = vld [vmem:[#allocation10 + $0x40] sm:$0xff] }
 0x1c5   :  { %v4973_v18 = vadd.f32 %v4972_v13, %v4971_v9  ;;  %v5041_v19 = vadd.f32 %v5040_v14, %v5039_v10  ;;  %752 = vmatmul.mubr.f32.gmra.mrb[30].mxu0 %v578_v55  ;;  %5348 = vmatmul.mubr.f32.gmra.mrb[26].mxu1 %v578_v55  ;;  %v1011_v10 = vld [vmem:[#allocation9 + $0x158] sm:$0xff] }
 0x1c6   :  { %757 = vmatprep.mubr.f32.mxu0 %v8913_v11  ;;  %5988 = vmatpush3.bf16.msra.mxu0 %v5987_v54  ;;  %v1007_v54 = vld [vmem:[#allocation9 + $0x138] sm:$0xff] }
 0x1c7   :  { %v583_v23 = vadd.f32 %v5041_v19, %v4973_v18  ;;  %v4974_v24 = vpop.f32.mrb[10].mxu0  ;;  %v5042_v25 = vpop.f32.mrb[10].mxu1  ;;  %5989 = vmatprep.subr.bf16.mxu0 %v7263_v52  ;;  %5956 = vmatpush1.bf16.msra.mxu1 %v5955_v12  ;;  %v5971_v16 = vpack.c.bf16 %v1007_v54, %v1004_v8  ;;  %v5973_v19 = vpack.c.bf16 %v1014_v56, %v1011_v10  ;;  %v1196_v54 = vld [vmem:[#allocation10 + $0x78] sm:$0xff]  ;;  %v1203_v56 = vld [vmem:[#allocation10 + $0xb0] sm:$0xff] }
 0x1c8   :  { %v4975_v29 = vpop.f32.mrb[11].mxu0  ;;  %v5043_v30 = vpop.f32.mrb[11].mxu1  ;;  %5958 = vmatprep.subr.bf16.mxu1 %v5957_v15  ;;  %v7568_v15 = vpack.c.bf16 %v1185_v6, %v1182_v2  ;;  %v1192_v2 = vld [vmem:[#allocation10 + $0x58] sm:$0xff]  ;;  %v1193_v6 = vld [vmem:[#allocation10 + $0x60] sm:$0xff] }
 0x1c9   :  { %v4976_v34 = vadd.f32 %v4975_v29, %v4974_v24  ;;  %v5044_v35 = vadd.f32 %v5043_v30, %v5042_v25  ;;  %758 = vmatmul.mubr.f32.gmra.mrb[32].mxu0 %v583_v23  ;;  %5350 = vmatprep.mubr.f32.mxu1 %v583_v23  ;;  %v1200_v10 = vld [vmem:[#allocation10 + $0x98] sm:$0xff] }
 0x1ca   :  { %763 = vmatprep.mubr.f32.mxu0 %v8913_v11  ;;  %5991 = vmatpush3.bf16.msra.mxu0 %v5990_v22 }
 0x1cb   :  { %v588_v39 = vadd.f32 %v5044_v35, %v4976_v34  ;;  %v4977_v40 = vpop.f32.mrb[12].mxu0  ;;  %v5045_v41 = vpop.f32.mrb[12].mxu1  ;;  %5992 = vmatprep.subr.bf16.mxu0 %v7263_v52  ;;  %5960 = vmatpush1.bf16.msra.mxu1 %v5959_v28 }
 0x1cc   :  { %v4978_v45 = vpop.f32.mrb[13].mxu0  ;;  %v5046_v46 = vpop.f32.mrb[13].mxu1  ;;  %5962 = vmatprep.subr.bf16.mxu1 %v5961_v31 }
 0x1cd   :  { %v4979_v50 = vadd.f32 %v4978_v45, %v4977_v40  ;;  %v5047_v53 = vadd.f32 %v5046_v46, %v5045_v41  ;;  %764 = vmatmul.mubr.f32.gmra.mrb[34].mxu0 %v588_v39  ;;  %5351 = vmatmul.mubr.f32.gmra.mrb[28].mxu1 %v588_v39  ;;  %v1181_v46 = vld [vmem:[#allocation10] sm:$0xff] }
 0x1ce   :  { %769 = vmatprep.mubr.f32.mxu0 %v8913_v11  ;;  %5994 = vmatpush3.bf16.msra.mxu0 %v5993_v38 }
 0x1cf   :  { %v593_v60 = vadd.f32 %v5047_v53, %v4979_v50  ;;  %v4980_v61 = vpop.f32.mrb[14].mxu0  ;;  %v5048_v62 = vpop.f32.mrb[14].mxu1  ;;  %5995 = vmatprep.subr.bf16.mxu0 %v7263_v52  ;;  %5964 = vmatpush1.bf16.msra.mxu1 %v5963_v44  ;;  %v1186_v50 = vld [vmem:[#allocation10 + $0x28] sm:$0xff]  ;;  %v1188_v53 = vld [vmem:[#allocation10 + $0x38] sm:$0xff] }
 0x1d0   :  { %v4981_v4 = vpop.f32.mrb[15].mxu0  ;;  %v5049_v5 = vpop.f32.mrb[15].mxu1  ;;  %5966 = vmatprep.subr.bf16.mxu1 %v5965_v47 }
 0x1d1   :  { %v4982_v55 = vadd.f32 %v4981_v4, %v4980_v61  ;;  %v5050_v9 = vadd.f32 %v5049_v5, %v5048_v62  ;;  %770 = vmatmul.mubr.f32.gmra.mrb[36].mxu0 %v593_v60  ;;  %5353 = vmatprep.mubr.f32.mxu1 %v593_v60  ;;  %v1187_v60 = vld [vmem:[#allocation10 + $0x30] sm:$0xff]  ;;  %v7584_v61 = vpack.c.bf16 %v1186_v50, %v1183_v49  ;;  %v1197_v4 = vld [vmem:[#allocation10 + $0x80] sm:$0xff] }
 0x1d2   :  { %775 = vmatprep.mubr.f32.mxu0 %v8913_v11  ;;  %5997 = vmatpush3.bf16.msra.mxu0 %v5996_v59  ;;  %v7581_v59 = vpack.c.bf16 %v1184_v48, %v1181_v46  ;;  %v7586_v62 = vpack.c.bf16 %v1191_v57, %v1188_v53  ;;  %v7589_v5 = vpack.c.bf16 %v1190_v63, %v1187_v60  ;;  %v1224_v46 = vld [vmem:[#allocation10 + $0x158] sm:$0xff]  ;;  %v1223_v49 = vld [vmem:[#allocation10 + $0x150] sm:$0xff]  ;;  %v1226_v57 = vld [vmem:[#allocation10 + $0x168] sm:$0xff] }
 0x1d3   :  { %v598_v12 = vadd.f32 %v5050_v9, %v4982_v55  ;;  %v4983_v13 = vpop.f32.mrb[16].mxu0  ;;  %v5051_v14 = vpop.f32.mrb[16].mxu1  ;;  %5998 = vmatprep.subr.bf16.mxu0 %v7263_v52  ;;  %5968 = vmatpush1.bf16.msra.mxu1 %v5967_v3  ;;  %v1194_v3 = vld [vmem:[#allocation10 + $0x68] sm:$0xff]  ;;  %v1195_v55 = vld [vmem:[#allocation10 + $0x70] sm:$0xff]  ;;  %v1228_v60 = vld [vmem:[#allocation10 + $0x178] sm:$0xff]  ;;  %v7652_v63 = vpack.c.bf16 %v1226_v57, %v1223_v49 }
 0x1d4   :  { %v4984_v17 = vpop.f32.mrb[17].mxu0  ;;  %v5052_v18 = vpop.f32.mrb[17].mxu1  ;;  %5970 = vmatprep.subr.bf16.mxu1 %v5969_v7  ;;  %v7592_v7 = vpack.c.bf16 %v1192_v2, %v1189_v0  ;;  %v7595_v8 = vpack.c.bf16 %v1197_v4, %v1194_v3  ;;  %v1198_v9 = vld [vmem:[#allocation10 + $0x88] sm:$0xff]  ;;  %v7663_v2 = vld [vmem:[%s8903_s3] sm:$0xff] }
 0x1d5   :  { %v4985_v22 = vadd.f32 %v4984_v17, %v4983_v13  ;;  %v5053_v23 = vadd.f32 %v5052_v18, %v5051_v14  ;;  %776 = vmatmul.mubr.f32.gmra.mrb[38].mxu0 %v598_v12  ;;  %5354 = vmatmul.mubr.f32.gmra.mrb[30].mxu1 %v598_v12  ;;  %v1199_v12 = vld [vmem:[#allocation10 + $0x90] sm:$0xff]  ;;  %v7605_v13 = vpack.c.bf16 %v1198_v9, %v1195_v55  ;;  %v1201_v17 = vld [vmem:[#allocation10 + $0xa0] sm:$0xff]  ;;  %v1204_v18 = vld [vmem:[#allocation10 + $0xb8] sm:$0xff] }
 0x1d6   :  { %781 = vmatprep.mubr.f32.mxu0 %v8913_v11  ;;  %6000 = vmatpush3.bf16.msra.mxu0 %v5999_v1  ;;  %v7602_v1 = vpack.c.bf16 %v1196_v54, %v1193_v6  ;;  %v7608_v14 = vpack.c.bf16 %v1203_v56, %v1200_v10 }
 0x1d7   :  { %v603_v24 = vadd.f32 %v5053_v23, %v4985_v22  ;;  %v4986_v25 = vpop.f32.mrb[18].mxu0  ;;  %v5054_v26 = vpop.f32.mrb[18].mxu1  ;;  %6002 = vmatprep.subr.bf16.mxu0 %v7568_v15  ;;  %5972 = vmatpush1.bf16.msra.mxu1 %v5971_v16  ;;  %v1202_v16 = vld [vmem:[#allocation10 + $0xa8] sm:$0xff]  ;;  %v1205_v22 = vld [vmem:[#allocation10 + $0xc0] sm:$0xff]  ;;  %v7615_v23 = vpack.c.bf16 %v1204_v18, %v1201_v17  ;;  %v7706_v17 = vshrl.u32 %v122_v51, 7 }
 0x1d8   :  { %v4987_v28 = vpop.f32.mrb[19].mxu0  ;;  %v5055_v29 = vpop.f32.mrb[19].mxu1  ;;  %5974 = vmatprep.subr.bf16.mxu1 %v5973_v19  ;;  %v1206_v19 = vld [vmem:[#allocation10 + $0xc8] sm:$0xff]  ;;  %v7612_v21 = vpack.c.bf16 %v1202_v16, %v1199_v12 }
 0x1d9   :  { %v4988_v30 = vadd.f32 %v4987_v28, %v4986_v25  ;;  %v5056_v31 = vadd.f32 %v5055_v29, %v5054_v26  ;;  %782 = vmatmul.mubr.f32.gmra.mrb[40].mxu0 %v603_v24  ;;  %5356 = vmatprep.mubr.f32.mxu1 %v603_v24  ;;  %v7618_v24 = vpack.c.bf16 %v1209_v20, %v1206_v19  ;;  %v1208_v25 = vld [vmem:[#allocation10 + $0xd8] sm:$0xff]  ;;  %v1207_v26 = vld [vmem:[#allocation10 + $0xd0] sm:$0xff]  ;;  %v7709_v18 = vsub.s32 2, %v7706_v17 }
 0x1da   :  { %787 = vmatprep.mubr.f32.mxu0 %v8913_v11  ;;  %v1212_v28 = vld [vmem:[#allocation10 + $0xf8] sm:$0xff]  ;;  %v1215_v29 = vld [vmem:[#allocation10 + $0x110] sm:$0xff]  ;;  %v7738_v49 = vsub.s32 0, %v7706_v17  ;;  %v7741_v57 = vsub.s32 1, %v7706_v17 }
 0x1db   :  { %v608_v32 = vadd.f32 %v5056_v31, %v4988_v30  ;;  %v4989_v33 = vpop.f32.mrb[20].mxu0  ;;  %v5057_v34 = vpop.f32.mrb[20].mxu1  ;;  %5976 = vmatpush1.bf16.msra.mxu1 %v5975_v27  ;;  %v1210_v27 = vld [vmem:[#allocation10 + $0xe8] sm:$0xff]  ;;  %v7622_v30 = vpack.c.bf16 %v1208_v25, %v1205_v22  ;;  %v1211_v31 = vld [vmem:[#allocation10 + $0xf0] sm:$0xff]  ;;  %v1016_v19 = vld [vmem:[%s8906_s6] sm:$0x7] }
 0x1dc   :  { %v4990_v35 = vpop.f32.mrb[21].mxu0  ;;  %v5058_v36 = vpop.f32.mrb[21].mxu1  ;;  %6033 = vmatprep.subr.bf16.mxu1 %v7263_v52  ;;  %v1029_v25 = vrot.slane %v1016_v19, %v7709_v18 }
 0x1dd   :  { %v4991_v37 = vadd.f32 %v4990_v35, %v4989_v33  ;;  %v5059_v38 = vadd.f32 %v5058_v36, %v5057_v34  ;;  %788 = vmatmul.mubr.f32.gmra.mrb[42].mxu0 %v608_v32  ;;  %5357 = vmatmul.mubr.f32.gmra.mrb[32].mxu1 %v608_v32  ;;  %v7625_v32 = vpack.c.bf16 %v1210_v27, %v1207_v26  ;;  %v1214_v34 = vld [vmem:[#allocation10 + $0x108] sm:$0xff]  ;;  %v1213_v35 = vld [vmem:[#allocation10 + $0x100] sm:$0xff]  ;;  %v1216_v36 = vld [vmem:[#allocation10 + $0x118] sm:$0xff] }
 0x1de   :  { %793 = vmatprep.mubr.f32.mxu0 %v8913_v11  ;;  %v7628_v33 = vpack.c.bf16 %v1215_v29, %v1212_v28 }
 0x1df   :  { %v613_v39 = vadd.f32 %v5059_v38, %v4991_v37  ;;  %v4992_v40 = vpop.f32.mrb[22].mxu0  ;;  %v5060_v41 = vpop.f32.mrb[22].mxu1  ;;  %v1218_v37 = vld [vmem:[#allocation10 + $0x128] sm:$0xff]  ;;  %v1221_v38 = vld [vmem:[#allocation10 + $0x140] sm:$0xff] }
 0x1e0   :  { %v4993_v42 = vpop.f32.mrb[23].mxu0  ;;  %v5061_v43 = vpop.f32.mrb[23].mxu1 }
 0x1e1   :  { %v4994_v44 = vadd.f32 %v4993_v42, %v4992_v40  ;;  %v5062_v45 = vadd.f32 %v5061_v43, %v5060_v41  ;;  %794 = vmatmul.mubr.f32.gmra.mrb[44].mxu0 %v613_v39  ;;  %5359 = vmatprep.mubr.f32.mxu1 %v613_v39  ;;  %v7632_v39 = vpack.c.bf16 %v1214_v34, %v1211_v31  ;;  %v1217_v40 = vld [vmem:[#allocation10 + $0x120] sm:$0xff]  ;;  %v1220_v43 = vld [vmem:[#allocation10 + $0x138] sm:$0xff] }
 0x1e2   :  { %799 = vmatprep.mubr.f32.mxu0 %v8913_v11  ;;  %v7635_v41 = vpack.c.bf16 %v1216_v36, %v1213_v35  ;;  %v7638_v42 = vpack.c.bf16 %v1221_v38, %v1218_v37  ;;  %v7642_v48 = vpack.c.bf16 %v1220_v43, %v1217_v40 }
 0x1e3   :  { %v618_v47 = vadd.f32 %v5062_v45, %v4994_v44  ;;  %v1219_v44 = vld [vmem:[#allocation10 + $0x130] sm:$0xff]  ;;  %v1222_v45 = vld [vmem:[#allocation10 + $0x148] sm:$0xff] }
 0x1e4   :  { %v7645_v50 = vpack.c.bf16 %v1222_v45, %v1219_v44 }
 0x1e5   :  { %800 = vmatmul.mubr.f32.gmra.mrb[46].mxu0 %v618_v47  ;;  %5360 = vmatmul.mubr.f32.gmra.mrb[34].mxu1 %v618_v47  ;;  %v1227_v47 = vld [vmem:[#allocation10 + $0x170] sm:$0xff] }
 0x1e6   :  { %5394 = vmatprep.mubr.msk.f32.mxu0 %vm7264_vm0, %v8913_v11  ;;  %1097 = vmatprep.mubr.f32.mxu1 %v8913_v11  ;;  %v7648_v53 = vpack.c.bf16 %v1227_v47, %v1224_v46 }
 0x1e9   :  { %5395 = vmatmul.mubr.f32.vlgmr.msra.gmra.mrb[48].mxu0 %v967_v58  ;;  %1098 = vmatmul.mubr.f32.vlgmr.msra.gmra.mrb[36].mxu1 %v967_v58  ;;  %v1225_v58 = vld [vmem:[#allocation10 + $0x160] sm:$0xff] }
 0x1ea   :  { %6004 = vmatpush1.bf16.msra.mxu0 %v7581_v59  ;;  %6035 = vmatpush3.bf16.msra.mxu1 %v7584_v61  ;;  %v7655_v0 = vpack.c.bf16 %v1228_v60, %v1225_v58  ;;  %v1021_v58 = vrot.slane %v1016_v19, %v7738_v49  ;;  %v1229_v60 = vld [vmem:[%s8908_s8] sm:$0x7] }
 0x1eb   :  { %6006 = vmatprep.subr.bf16.mxu0 %v7586_v62  ;;  %6036 = vmatprep.subr.bf16.mxu1 %v7263_v52 }
 0x1ec   :  { %1310 = vmatprep.mubr.f32.mxu0 %v8913_v11  ;;  %5429 = vmatprep.mubr.msk.f32.mxu1 %vm7264_vm0, %v8913_v11 }
 0x1ee   :  { %6008 = vmatpush1.bf16.msra.mxu0 %v7589_v5  ;;  %6038 = vmatpush3.bf16.msra.mxu1 %v7592_v7 }
 0x1ef   :  { %6010 = vmatprep.subr.bf16.mxu0 %v7595_v8  ;;  %6039 = vmatprep.subr.bf16.mxu1 %v7263_v52 }
 0x1f2   :  { %6012 = vmatpush1.bf16.msra.mxu0 %v7602_v1  ;;  %6041 = vmatpush3.bf16.msra.mxu1 %v7605_v13 }
 0x1f3   :  { %6014 = vmatprep.subr.bf16.mxu0 %v7608_v14  ;;  %6042 = vmatprep.subr.bf16.mxu1 %v7263_v52 }
 0x1f6   :  { %6016 = vmatpush1.bf16.msra.mxu0 %v7612_v21  ;;  %6044 = vmatpush3.bf16.msra.mxu1 %v7615_v23 }
 0x1f7   :  { %6018 = vmatprep.subr.bf16.mxu0 %v7618_v24  ;;  %6045 = vmatprep.subr.bf16.mxu1 %v7263_v52 }
 0x1fa   :  { %6020 = vmatpush1.bf16.msra.mxu0 %v7622_v30  ;;  %6047 = vmatpush3.bf16.msra.mxu1 %v7625_v32 }
 0x1fb   :  { %6022 = vmatprep.subr.bf16.mxu0 %v7628_v33  ;;  %6048 = vmatprep.subr.bf16.mxu1 %v7263_v52 }
 0x1fe   :  { %6024 = vmatpush1.bf16.msra.mxu0 %v7632_v39  ;;  %6050 = vmatpush3.bf16.msra.mxu1 %v7635_v41 }
 0x1ff   :  { %6026 = vmatprep.subr.bf16.mxu0 %v7638_v42  ;;  %6051 = vmatprep.subr.bf16.mxu1 %v7263_v52 }
 0x202   :  { %6028 = vmatpush1.bf16.msra.mxu0 %v7642_v48  ;;  %6053 = vmatpush3.bf16.msra.mxu1 %v7645_v50 }
 0x203   :  { %6030 = vmatprep.subr.bf16.mxu0 %v7648_v53  ;;  %6054 = vmatprep.subr.bf16.mxu1 %v7263_v52 }
 0x206   :  { %6032 = vmatpush1.bf16.msra.mxu0 %v7652_v63  ;;  %6056 = vmatpush3.bf16.msra.mxu1 %v7655_v0 }
 0x207   :  { %6058 = vmatprep.subr.bf16.mxu0 %v7568_v15  ;;  %6089 = vmatprep.subr.bf16.mxu1 %v7263_v52 }
 0x209   :  { %1311 = vmatmul.mubr.f32.vlgmr.msra.gmra.mrb[24].mxu0 %v7663_v2  ;;  %5430 = vmatmul.mubr.f32.vlgmr.msra.gmra.mrb[38].mxu1 %v7663_v2 }
 0x20a   :  { %6060 = vmatpush1.bf16.msra.mxu0 %v7581_v59  ;;  %6091 = vmatpush3.bf16.msra.mxu1 %v7584_v61 }
 0x20b   :  { %6062 = vmatprep.subr.bf16.mxu0 %v7586_v62  ;;  %6092 = vmatprep.subr.bf16.mxu1 %v7263_v52 }
 0x20c   :  { %1545 = vmatprep.mubr.f32.mxu0 %v8913_v11  ;;  %5464 = vmatprep.mubr.msk.f32.mxu1 %vm7264_vm0, %v8913_v11 }
 0x20e   :  { %6064 = vmatpush1.bf16.msra.mxu0 %v7589_v5  ;;  %6094 = vmatpush3.bf16.msra.mxu1 %v7592_v7 }
 0x20f   :  { %6066 = vmatprep.subr.bf16.mxu0 %v7595_v8  ;;  %6095 = vmatprep.subr.bf16.mxu1 %v7263_v52 }
 0x212   :  { %6068 = vmatpush1.bf16.msra.mxu0 %v7602_v1  ;;  %6097 = vmatpush3.bf16.msra.mxu1 %v7605_v13 }
 0x213   :  { %6070 = vmatprep.subr.bf16.mxu0 %v7608_v14  ;;  %6098 = vmatprep.subr.bf16.mxu1 %v7263_v52 }
 0x216   :  { %6072 = vmatpush1.bf16.msra.mxu0 %v7612_v21  ;;  %6100 = vmatpush3.bf16.msra.mxu1 %v7615_v23 }
 0x217   :  { %6074 = vmatprep.subr.bf16.mxu0 %v7618_v24  ;;  %6101 = vmatprep.subr.bf16.mxu1 %v7263_v52 }
 0x21a   :  { %6076 = vmatpush1.bf16.msra.mxu0 %v7622_v30  ;;  %6103 = vmatpush3.bf16.msra.mxu1 %v7625_v32 }
 0x21b   :  { %6078 = vmatprep.subr.bf16.mxu0 %v7628_v33  ;;  %6104 = vmatprep.subr.bf16.mxu1 %v7263_v52 }
 0x21e   :  { %6080 = vmatpush1.bf16.msra.mxu0 %v7632_v39  ;;  %6106 = vmatpush3.bf16.msra.mxu1 %v7635_v41 }
 0x21f   :  { %6082 = vmatprep.subr.bf16.mxu0 %v7638_v42  ;;  %6107 = vmatprep.subr.bf16.mxu1 %v7263_v52 }
 0x222   :  { %6084 = vmatpush1.bf16.msra.mxu0 %v7642_v48  ;;  %6109 = vmatpush3.bf16.msra.mxu1 %v7645_v50 }
 0x223   :  { %6086 = vmatprep.subr.bf16.mxu0 %v7648_v53  ;;  %6110 = vmatprep.subr.bf16.mxu1 %v7263_v52 }
 0x226   :  { %6088 = vmatpush1.bf16.msra.mxu0 %v7652_v63  ;;  %6112 = vmatpush3.bf16.msra.mxu1 %v7655_v0 }
 0x227   :  { %6114 = vmatprep.subr.bf16.mxu0 %v7568_v15  ;;  %6145 = vmatprep.subr.bf16.mxu1 %v7263_v52 }
 0x290   :  { %v5346_v3 = vpop.f32.mrb[24].mxu1 }
 0x291   :  { %v872_v4 = vpop.f32.mrb[25].mxu1 }
 0x298   :  { %v5349_v6 = vpop.f32.mrb[26].mxu1 }
 0x299   :  { %v882_v54 = vpop.f32.mrb[27].mxu1 }
 0x2a0   :  { %v5352_v55 = vpop.f32.mrb[28].mxu1 }
 0x2a1   :  { %v892_v9 = vpop.f32.mrb[29].mxu1 }
 0x2a8   :  { %v5355_v10 = vpop.f32.mrb[30].mxu1 }
 0x2a9   :  { %v902_v56 = vpop.f32.mrb[31].mxu1 }
 0x2b0   :  { %v5358_v12 = vpop.f32.mrb[32].mxu1 }
 0x2b1   :  { %v912_v16 = vpop.f32.mrb[33].mxu1 }
 0x2b8   :  { %v5361_v20 = vpop.f32.mrb[34].mxu1 }
 0x2b9   :  { %v922_v22 = vpop.f32.mrb[35].mxu1 }
 0x2bc   :  { %v1170_v26 = vpop.f32.mrb[48].mxu0  ;;  %v1099_v27 = vpop.f32.mrb[36].mxu1 }
 0x2bd   :  { %v1171_v28 = vadd.f32 %v1170_v26, %v1029_v25  ;;  %v5396_v29 = vpop.f32.mrb[49].mxu0  ;;  %v1101_v31 = vpop.f32.mrb[37].mxu1 }
 0x2be   :  { %v1242_v29 = vrot.slane %v1229_v60, %v7709_v18 }
 0x2bf   :  { %v1180_v34 = vadd.f32 %v1171_v28, %v872_v4  ;;  %v7715_v35 = vadd.f32 %v5346_v3, %v1171_v28  ;;  %v7717_v51 = vadd.f32 %v1171_v28, %v882_v54  ;;  %v7719_v36 = vadd.f32 %v5349_v6, %v1171_v28 }
 0x2c0   :  { %v7721_v37 = vadd.f32 %v1171_v28, %v892_v9  ;;  %v7723_v38 = vadd.f32 %v5352_v55, %v1171_v28  ;;  %v7725_v40 = vadd.f32 %v1171_v28, %v902_v56  ;;  %v7727_v43 = vadd.f32 %v5355_v10, %v1171_v28 }
 0x2c1   :  { %v7729_v44 = vadd.f32 %v1171_v28, %v912_v16  ;;  %v7731_v45 = vadd.f32 %v5358_v12, %v1171_v28  ;;  %v7733_v46 = vadd.f32 %v1171_v28, %v922_v22  ;;  %v7735_v47 = vadd.f32 %v5361_v20, %v1171_v28 }
 0x2c2   :  { %v1025_v3 = vrot.slane %v1016_v19, %v7741_v57  ;;  %v7748_v4 = vadd.f32 %v1099_v27, %v1021_v58  ;;  %v1234_v6 = vrot.slane %v1229_v60, %v7738_v49  ;;  %v1238_v55 = vrot.slane %v1229_v60, %v7741_v57 }
 0x2c4   :  { %v7751_v54 = vadd.f32 %v1101_v31, %v1025_v3  ;;  %v6753_v9 = vadd.f32 %v1234_v6, %v7748_v4 }
 0x2c6   :  { %v6755_v56 = vadd.f32 %v1238_v55, %v7751_v54 }
 0x2dc   :  { %v1312_v10 = vpop.f32.mrb[24].mxu0  ;;  %v1383_v12 = vpop.f32.mrb[38].mxu1 }
 0x2dd   :  { %v6754_v16 = vadd.f32 %v6753_v9, %v1312_v10  ;;  %v1314_v20 = vpop.f32.mrb[25].mxu0  ;;  %v5431_v22 = vpop.f32.mrb[39].mxu1  ;;  %v1384_v3 = vadd.f32 %v1383_v12, %v1242_v29 }
 0x2de   :  { %v6756_v25 = vadd.f32 %v6755_v56, %v1314_v20 }
 0x2df   :  { %v4903_v26 = vmul.f32 -1.442695, %v6754_v16 }
 0x2e0   :  { %v4904_v19 = vmul.f32 -1.442695, %v6756_v25 }
 0x2e1   :  { %6845 = vpow2.f32 %v4903_v26 }
 0x2e2   :  { %6847 = vpow2.f32 %v4904_v19 }
 0x2eb   :  { %v6846_v27 = vpop.eup %6845 }
 0x2ec   :  { %v1391_v28 = vadd.f32 1.0, %v6846_v27  ;;  %v6848_v31 = vpop.eup %6847 }
 0x2ed   :  { %v1398_v58 = vadd.f32 1.0, %v6848_v31 }
 0x2ee   :  { %6849 = vrcp.f32 %v1391_v28 }
 0x2ef   :  { %6851 = vrcp.f32 %v1398_v58 }
 0x2f8   :  { %v6850_v6 = vpop.eup %6849 }
 0x2f9   :  { %v1401_v55 = vmul.f32 %v6850_v6, %v1384_v3  ;;  %v6852_v9 = vpop.eup %6851 }
 0x2fa   :  { %v1404_v10 = vsub.f32 1.0, %v6852_v9  ;;  %v1406_v20 = vmul.f32 %v6852_v9, %v7663_v2  ;;  %v1464_v2 = vld [vmem:[%s8908_s8] sm:$0x7] }
 0x2fb   :  { %v1402_v11 = vadd.f32 %v1401_v55, %v1180_v34  ;;  %v1469_v34 = vrot.slane %v1464_v2, %v7738_v49  ;;  %v1473_v60 = vrot.slane %v1464_v2, %v7741_v57  ;;  %v1477_v9 = vrot.slane %v1464_v2, %v7709_v18 }
 0x2fd   :  { %6853 = vtanh.f32 %v1402_v11  ;;  %v8948_v11 = vmov 0.0   ;;  %v6757_v12 = vadd.f32 %v1469_v34, %v7748_v4  ;;  %v6759_v19 = vadd.f32 %v1473_v60, %v7751_v54 }
 0x307   :  { %v6854_v56 = vpop.eup %6853 }
 0x308   :  { %v1405_v16 = vmul.f32 %v6854_v56, %v1404_v10 }
 0x30a   :  { %v7758_v22 = vadd.f32 %v1406_v20, %v1405_v16 }
 0x30c   :  { %1546 = vmatmul.mubr.f32.vlgmr.msra.gmra.mrb[26].mxu0 %v7758_v22  ;;  %5465 = vmatmul.mubr.f32.vlgmr.msra.gmra.mrb[40].mxu1 %v7758_v22 }
 0x30d   :  { %6116 = vmatpush1.bf16.msra.mxu0 %v7581_v59  ;;  %6147 = vmatpush3.bf16.msra.mxu1 %v7584_v61 }
 0x30e   :  { %6118 = vmatprep.subr.bf16.mxu0 %v7586_v62  ;;  %6148 = vmatprep.subr.bf16.mxu1 %v7263_v52 }
 0x30f   :  { %1781 = vmatprep.mubr.f32.mxu0 %v8948_v11  ;;  %5499 = vmatprep.mubr.msk.f32.mxu1 %vm7264_vm0, %v8948_v11 }
 0x311   :  { %6120 = vmatpush1.bf16.msra.mxu0 %v7589_v5  ;;  %6150 = vmatpush3.bf16.msra.mxu1 %v7592_v7 }
 0x312   :  { %6122 = vmatprep.subr.bf16.mxu0 %v7595_v8  ;;  %6151 = vmatprep.subr.bf16.mxu1 %v7263_v52 }
 0x315   :  { %6124 = vmatpush1.bf16.msra.mxu0 %v7602_v1  ;;  %6153 = vmatpush3.bf16.msra.mxu1 %v7605_v13 }
 0x316   :  { %6126 = vmatprep.subr.bf16.mxu0 %v7608_v14  ;;  %6154 = vmatprep.subr.bf16.mxu1 %v7263_v52 }
 0x319   :  { %6128 = vmatpush1.bf16.msra.mxu0 %v7612_v21  ;;  %6156 = vmatpush3.bf16.msra.mxu1 %v7615_v23 }
 0x31a   :  { %6130 = vmatprep.subr.bf16.mxu0 %v7618_v24  ;;  %6157 = vmatprep.subr.bf16.mxu1 %v7263_v52 }
 0x31d   :  { %6132 = vmatpush1.bf16.msra.mxu0 %v7622_v30  ;;  %6159 = vmatpush3.bf16.msra.mxu1 %v7625_v32 }
 0x31e   :  { %6134 = vmatprep.subr.bf16.mxu0 %v7628_v33  ;;  %6160 = vmatprep.subr.bf16.mxu1 %v7263_v52 }
 0x321   :  { %6136 = vmatpush1.bf16.msra.mxu0 %v7632_v39  ;;  %6162 = vmatpush3.bf16.msra.mxu1 %v7635_v41 }
 0x322   :  { %6138 = vmatprep.subr.bf16.mxu0 %v7638_v42  ;;  %6163 = vmatprep.subr.bf16.mxu1 %v7263_v52 }
 0x325   :  { %6140 = vmatpush1.bf16.msra.mxu0 %v7642_v48  ;;  %6165 = vmatpush3.bf16.msra.mxu1 %v7645_v50 }
 0x326   :  { %6142 = vmatprep.subr.bf16.mxu0 %v7648_v53  ;;  %6166 = vmatprep.subr.bf16.mxu1 %v7263_v52 }
 0x329   :  { %6144 = vmatpush1.bf16.msra.mxu0 %v7652_v63  ;;  %6168 = vmatpush3.bf16.msra.mxu1 %v7655_v0 }
 0x32a   :  { %6170 = vmatprep.subr.bf16.mxu0 %v7568_v15  ;;  %6201 = vmatprep.subr.bf16.mxu1 %v7263_v52 }
 0x3df   :  { %v1547_v25 = vpop.f32.mrb[26].mxu0  ;;  %v1618_v26 = vpop.f32.mrb[40].mxu1 }
 0x3e0   :  { %v6758_v27 = vadd.f32 %v6757_v12, %v1547_v25  ;;  %v1549_v28 = vpop.f32.mrb[27].mxu0  ;;  %v5466_v29 = vpop.f32.mrb[41].mxu1  ;;  %v1619_v56 = vadd.f32 %v1618_v26, %v1477_v9 }
 0x3e1   :  { %v6760_v15 = vadd.f32 %v6759_v19, %v1549_v28 }
 0x3e2   :  { %v4905_v31 = vmul.f32 -1.442695, %v6758_v27 }
 0x3e3   :  { %v4906_v58 = vmul.f32 -1.442695, %v6760_v15 }
 0x3e4   :  { %6855 = vpow2.f32 %v4905_v31  ;;  %v2125_v31 = vld [vmem:[#allocation10 + $0x8] sm:$0xff] }
 0x3e5   :  { %6857 = vpow2.f32 %v4906_v58 }
 0x3ee   :  { %v6856_v3 = vpop.eup %6855 }
 0x3ef   :  { %v1626_v6 = vadd.f32 1.0, %v6856_v3  ;;  %v6858_v55 = vpop.eup %6857  ;;  %v2124_v3 = vld [vmem:[#allocation10] sm:$0xff] }
 0x3f0   :  { %v1633_v10 = vadd.f32 1.0, %v6858_v55  ;;  %v2126_v55 = vld [vmem:[#allocation10 + $0x10] sm:$0xff] }
 0x3f1   :  { %6859 = vrcp.f32 %v1626_v6  ;;  %v2127_v6 = vld [vmem:[#allocation10 + $0x18] sm:$0xff] }
 0x3f2   :  { %6861 = vrcp.f32 %v1633_v10  ;;  %v7864_v9 = vpack.c.bf16 %v2127_v6, %v2124_v3  ;;  %v2129_v10 = vld [vmem:[#allocation10 + $0x28] sm:$0xff]  ;;  %v2158_v3 = vld [vmem:[#allocation10 + $0x110] sm:$0xff] }
 0x3f3   :  { %v2154_v6 = vld [vmem:[#allocation10 + $0xf0] sm:$0xff] }
 0x3fb   :  { %v6860_v16 = vpop.eup %6859 }
 0x3fc   :  { %v1636_v20 = vmul.f32 %v6860_v16, %v1619_v56  ;;  %v6862_v60 = vpop.eup %6861  ;;  %v7867_v56 = vpack.c.bf16 %v2129_v10, %v2126_v55  ;;  %v2131_v16 = vld [vmem:[#allocation10 + $0x38] sm:$0xff]  ;;  %v2157_v10 = vld [vmem:[#allocation10 + $0x108] sm:$0xff] }
 0x3fd   :  { %v1639_v12 = vsub.f32 1.0, %v6862_v60  ;;  %v1641_v27 = vmul.f32 %v6862_v60, %v7758_v22  ;;  %v2130_v60 = vld [vmem:[#allocation10 + $0x30] sm:$0xff] }
 0x3fe   :  { %v1637_v34 = vadd.f32 %v1636_v20, %v7715_v35  ;;  %v2134_v20 = vld [vmem:[#allocation10 + $0x50] sm:$0xff] }
 0x400   :  { %6863 = vtanh.f32 %v1637_v34  ;;  %v7871_v34 = vpack.c.bf16 %v2134_v20, %v2131_v16  ;;  %v2156_v16 = vld [vmem:[#allocation10 + $0x100] sm:$0xff]  ;;  %v2159_v20 = vld [vmem:[#allocation10 + $0x118] sm:$0xff] }
 0x40a   :  { %v6864_v25 = vpop.eup %6863 }
 0x40b   :  { %v1640_v19 = vmul.f32 %v6864_v25, %v1639_v12  ;;  %v2133_v12 = vld [vmem:[#allocation10 + $0x48] sm:$0xff]  ;;  %v2132_v25 = vld [vmem:[#allocation10 + $0x40] sm:$0xff] }
 0x40d   :  { %v7807_v28 = vadd.f32 %v1641_v27, %v1640_v19  ;;  %v7874_v19 = vpack.c.bf16 %v2133_v12, %v2130_v60  ;;  %v2135_v27 = vld [vmem:[#allocation10 + $0x58] sm:$0xff]  ;;  %v7913_v60 = vpack.c.bf16 %v2157_v10, %v2154_v6  ;;  %v7915_v12 = vpack.c.bf16 %v2159_v20, %v2156_v16 }
 0x40f   :  { %1782 = vmatmul.mubr.f32.vlgmr.msra.gmra.mrb[28].mxu0 %v7807_v28  ;;  %5500 = vmatmul.mubr.f32.vlgmr.msra.gmra.mrb[42].mxu1 %v7807_v28 }
 0x410   :  { %6172 = vmatpush1.bf16.msra.mxu0 %v7581_v59  ;;  %6203 = vmatpush3.bf16.msra.mxu1 %v7584_v61  ;;  %v1700_v59 = vld [vmem:[%s8908_s8] sm:$0x7] }
 0x411   :  { %6174 = vmatprep.subr.bf16.mxu0 %v7586_v62  ;;  %6204 = vmatprep.subr.bf16.mxu1 %v7263_v52  ;;  %v1705_v61 = vrot.slane %v1700_v59, %v7738_v49  ;;  %v1709_v62 = vrot.slane %v1700_v59, %v7741_v57 }
 0x412   :  { %2017 = vmatprep.mubr.f32.mxu0 %v8948_v11  ;;  %5534 = vmatprep.mubr.msk.f32.mxu1 %vm7264_vm0, %v8948_v11 }
 0x414   :  { %6176 = vmatpush1.bf16.msra.mxu0 %v7589_v5  ;;  %6206 = vmatpush3.bf16.msra.mxu1 %v7592_v7  ;;  %v6761_v5 = vadd.f32 %v1705_v61, %v7748_v4  ;;  %v2137_v61 = vld [vmem:[#allocation10 + $0x68] sm:$0xff] }
 0x415   :  { %6178 = vmatprep.subr.bf16.mxu0 %v7595_v8  ;;  %6207 = vmatprep.subr.bf16.mxu1 %v7263_v52 }
 0x418   :  { %6180 = vmatpush1.bf16.msra.mxu0 %v7602_v1  ;;  %6209 = vmatpush3.bf16.msra.mxu1 %v7605_v13  ;;  %v6763_v1 = vadd.f32 %v1709_v62, %v7751_v54  ;;  %v2140_v62 = vld [vmem:[#allocation10 + $0x80] sm:$0xff] }
 0x419   :  { %6182 = vmatprep.subr.bf16.mxu0 %v7608_v14  ;;  %6210 = vmatprep.subr.bf16.mxu1 %v7263_v52 }
 0x41c   :  { %6184 = vmatpush1.bf16.msra.mxu0 %v7612_v21  ;;  %6212 = vmatpush3.bf16.msra.mxu1 %v7615_v23 }
 0x41d   :  { %6186 = vmatprep.subr.bf16.mxu0 %v7618_v24  ;;  %6213 = vmatprep.subr.bf16.mxu1 %v7263_v52 }
 0x420   :  { %6188 = vmatpush1.bf16.msra.mxu0 %v7622_v30  ;;  %6215 = vmatpush3.bf16.msra.mxu1 %v7625_v32 }
 0x421   :  { %6190 = vmatprep.subr.bf16.mxu0 %v7628_v33  ;;  %6216 = vmatprep.subr.bf16.mxu1 %v7263_v52 }
 0x424   :  { %6192 = vmatpush1.bf16.msra.mxu0 %v7632_v39  ;;  %6218 = vmatpush3.bf16.msra.mxu1 %v7635_v41  ;;  %v1713_v41 = vrot.slane %v1700_v59, %v7709_v18  ;;  %v7877_v59 = vpack.c.bf16 %v2135_v27, %v2132_v25  ;;  %v2161_v25 = vld [vmem:[#allocation10 + $0x128] sm:$0xff]  ;;  %v2164_v27 = vld [vmem:[#allocation10 + $0x140] sm:$0xff] }
 0x425   :  { %6194 = vmatprep.subr.bf16.mxu0 %v7638_v42  ;;  %6219 = vmatprep.subr.bf16.mxu1 %v7263_v52 }
 0x428   :  { %6196 = vmatpush1.bf16.msra.mxu0 %v7642_v48  ;;  %6221 = vmatpush3.bf16.msra.mxu1 %v7645_v50 }
 0x429   :  { %6198 = vmatprep.subr.bf16.mxu0 %v7648_v53  ;;  %6222 = vmatprep.subr.bf16.mxu1 %v7263_v52 }
 0x42c   :  { %6200 = vmatpush1.bf16.msra.mxu0 %v7652_v63  ;;  %6224 = vmatpush3.bf16.msra.mxu1 %v7655_v0 }
 0x42d   :  { %6257 = vmatprep.subr.bf16.mxu1 %v7263_v52 }
 0x4e2   :  { %v1783_v7 = vpop.f32.mrb[28].mxu0  ;;  %v1854_v8 = vpop.f32.mrb[42].mxu1 }
 0x4e3   :  { %v6762_v13 = vadd.f32 %v6761_v5, %v1783_v7  ;;  %v1785_v14 = vpop.f32.mrb[29].mxu0  ;;  %v5501_v21 = vpop.f32.mrb[43].mxu1  ;;  %v1855_v48 = vadd.f32 %v1854_v8, %v1713_v41  ;;  %v7881_v5 = vpack.c.bf16 %v2140_v62, %v2137_v61  ;;  %v2136_v7 = vld [vmem:[#allocation10 + $0x60] sm:$0xff]  ;;  %v2139_v8 = vld [vmem:[#allocation10 + $0x78] sm:$0xff]  ;;  %v7919_v62 = vpack.c.bf16 %v2164_v27, %v2161_v25 }
 0x4e4   :  { %v6764_v23 = vadd.f32 %v6763_v1, %v1785_v14  ;;  %v2138_v1 = vld [vmem:[#allocation10 + $0x70] sm:$0xff]  ;;  %v2141_v14 = vld [vmem:[#allocation10 + $0x88] sm:$0xff]  ;;  %v2160_v61 = vld [vmem:[#allocation10 + $0x120] sm:$0xff] }
 0x4e5   :  { %v4907_v24 = vmul.f32 -1.442695, %v6762_v13  ;;  %v7884_v13 = vpack.c.bf16 %v2139_v8, %v2136_v7  ;;  %v7887_v21 = vpack.c.bf16 %v2141_v14, %v2138_v1  ;;  %v2163_v7 = vld [vmem:[#allocation10 + $0x138] sm:$0xff]  ;;  %v2162_v8 = vld [vmem:[#allocation10 + $0x130] sm:$0xff]  ;;  %v2165_v1 = vld [vmem:[#allocation10 + $0x148] sm:$0xff] }
 0x4e6   :  { %v4908_v30 = vmul.f32 -1.442695, %v6764_v23  ;;  %v2143_v23 = vld [vmem:[#allocation10 + $0x98] sm:$0xff] }
 0x4e7   :  { %6865 = vpow2.f32 %v4907_v24  ;;  %v2146_v24 = vld [vmem:[#allocation10 + $0xb0] sm:$0xff]  ;;  %v2167_v14 = vld [vmem:[#allocation10 + $0x158] sm:$0xff] }
 0x4e8   :  { %6867 = vpow2.f32 %v4908_v30  ;;  %v7891_v30 = vpack.c.bf16 %v2146_v24, %v2143_v23  ;;  %v2170_v23 = vld [vmem:[#allocation10 + $0x170] sm:$0xff]  ;;  %v7922_v24 = vpack.c.bf16 %v2163_v7, %v2160_v61 }
 0x4f1   :  { %v6866_v32 = vpop.eup %6865 }
 0x4f2   :  { %v1862_v33 = vadd.f32 1.0, %v6866_v32  ;;  %v6868_v39 = vpop.eup %6867  ;;  %v2142_v32 = vld [vmem:[#allocation10 + $0x90] sm:$0xff] }
 0x4f3   :  { %v1869_v42 = vadd.f32 1.0, %v6868_v39  ;;  %v2144_v39 = vld [vmem:[#allocation10 + $0xa0] sm:$0xff] }
 0x4f4   :  { %6869 = vrcp.f32 %v1862_v33  ;;  %v2145_v33 = vld [vmem:[#allocation10 + $0xa8] sm:$0xff] }
 0x4f5   :  { %6871 = vrcp.f32 %v1869_v42  ;;  %v7894_v41 = vpack.c.bf16 %v2145_v33, %v2142_v32  ;;  %v2147_v42 = vld [vmem:[#allocation10 + $0xb8] sm:$0xff]  ;;  %v7926_v32 = vpack.c.bf16 %v2165_v1, %v2162_v8  ;;  %v7928_v33 = vpack.c.bf16 %v2170_v23, %v2167_v14 }
 0x4fe   :  { %v6870_v50 = vpop.eup %6869 }
 0x4ff   :  { %v1872_v53 = vmul.f32 %v6870_v50, %v1855_v48  ;;  %v6872_v0 = vpop.eup %6871  ;;  %v7897_v48 = vpack.c.bf16 %v2147_v42, %v2144_v39  ;;  %v2149_v50 = vld [vmem:[#allocation10 + $0xc8] sm:$0xff]  ;;  %v2166_v39 = vld [vmem:[#allocation10 + $0x150] sm:$0xff] }
 0x500   :  { %v1875_v35 = vsub.f32 1.0, %v6872_v0  ;;  %v1877_v29 = vmul.f32 %v6872_v0, %v7807_v28  ;;  %v2148_v0 = vld [vmem:[#allocation10 + $0xc0] sm:$0xff]  ;;  %v2169_v42 = vld [vmem:[#allocation10 + $0x168] sm:$0xff] }
 0x501   :  { %v1873_v63 = vadd.f32 %v1872_v53, %v7717_v51  ;;  %v2128_v51 = vld [vmem:[#allocation10 + $0x20] sm:$0xff] }
 0x502   :  { %v7862_v58 = vpack.c.bf16 %v2128_v51, %v2125_v31  ;;  %v2152_v53 = vld [vmem:[#allocation10 + $0xe0] sm:$0xff]  ;;  %v2155_v51 = vld [vmem:[#allocation10 + $0xf8] sm:$0xff] }
 0x503   :  { %6873 = vtanh.f32 %v1873_v63  ;;  %v7901_v63 = vpack.c.bf16 %v2152_v53, %v2149_v50  ;;  %v7910_v55 = vpack.c.bf16 %v2158_v3, %v2155_v51  ;;  %v2168_v50 = vld [vmem:[#allocation10 + $0x160] sm:$0xff]  ;;  %v2171_v53 = vld [vmem:[#allocation10 + $0x178] sm:$0xff] }
 0x504   :  { %6226 = vmatprep.subr.bf16.mxu0 %v7862_v58 }
 0x50d   :  { %v6874_v2 = vpop.eup %6873 }
 0x50e   :  { %v1876_v26 = vmul.f32 %v6874_v2, %v1875_v35  ;;  %v2151_v35 = vld [vmem:[#allocation10 + $0xd8] sm:$0xff]  ;;  %v2150_v2 = vld [vmem:[#allocation10 + $0xd0] sm:$0xff] }
 0x510   :  { %v7855_v15 = vadd.f32 %v1877_v29, %v1876_v26  ;;  %v7904_v26 = vpack.c.bf16 %v2151_v35, %v2148_v0  ;;  %v2153_v29 = vld [vmem:[#allocation10 + $0xe8] sm:$0xff]  ;;  %v7932_v0 = vpack.c.bf16 %v2169_v42, %v2166_v39  ;;  %v7936_v35 = vpack.c.bf16 %v2171_v53, %v2168_v50 }
 0x511   :  { %v7907_v31 = vpack.c.bf16 %v2153_v29, %v2150_v2  ;;  %v1936_v2 = vld [vmem:[%s8908_s8] sm:$0x7] }
 0x512   :  { %2018 = vmatmul.mubr.f32.vlgmr.msra.gmra.mrb[30].mxu0 %v7855_v15  ;;  %5535 = vmatmul.mubr.f32.vlgmr.msra.gmra.mrb[44].mxu1 %v7855_v15  ;;  %v1941_v29 = vrot.slane %v1936_v2, %v7738_v49  ;;  %v1945_v51 = vrot.slane %v1936_v2, %v7741_v57  ;;  %v1949_v39 = vrot.slane %v1936_v2, %v7709_v18 }
 0x513   :  { %2253 = vmatprep.mubr.f32.mxu0 %v8948_v11  ;;  %5569 = vmatprep.mubr.msk.f32.mxu1 %vm7264_vm0, %v8948_v11 }
 0x514   :  { %6228 = vmatpush1.bf16.msra.mxu0 %v7864_v9  ;;  %6259 = vmatpush3.bf16.msra.mxu1 %v7867_v56  ;;  %v6765_v3 = vadd.f32 %v1941_v29, %v7748_v4  ;;  %v6767_v16 = vadd.f32 %v1945_v51, %v7751_v54 }
 0x515   :  { %6260 = vmatprep.subr.bf16.mxu1 %v7263_v52  ;;  %6230 = vmatprep.subr.bf16.mxu0 %v7871_v34 }
 0x518   :  { %6232 = vmatpush1.bf16.msra.mxu0 %v7874_v19  ;;  %6262 = vmatpush3.bf16.msra.mxu1 %v7877_v59 }
 0x519   :  { %6263 = vmatprep.subr.bf16.mxu1 %v7263_v52  ;;  %6234 = vmatprep.subr.bf16.mxu0 %v7881_v5 }
 0x51c   :  { %6236 = vmatpush1.bf16.msra.mxu0 %v7884_v13  ;;  %6265 = vmatpush3.bf16.msra.mxu1 %v7887_v21 }
 0x51d   :  { %6266 = vmatprep.subr.bf16.mxu1 %v7263_v52  ;;  %6238 = vmatprep.subr.bf16.mxu0 %v7891_v30 }
 0x520   :  { %6240 = vmatpush1.bf16.msra.mxu0 %v7894_v41  ;;  %6268 = vmatpush3.bf16.msra.mxu1 %v7897_v48 }
 0x521   :  { %6269 = vmatprep.subr.bf16.mxu1 %v7263_v52  ;;  %6242 = vmatprep.subr.bf16.mxu0 %v7901_v63 }
 0x524   :  { %6244 = vmatpush1.bf16.msra.mxu0 %v7904_v26  ;;  %6271 = vmatpush3.bf16.msra.mxu1 %v7907_v31 }
 0x525   :  { %6246 = vmatprep.subr.bf16.mxu0 %v7910_v55  ;;  %6272 = vmatprep.subr.bf16.mxu1 %v7263_v52 }
 0x528   :  { %6248 = vmatpush1.bf16.msra.mxu0 %v7913_v60  ;;  %6274 = vmatpush3.bf16.msra.mxu1 %v7915_v12 }
 0x529   :  { %6250 = vmatprep.subr.bf16.mxu0 %v7919_v62  ;;  %6275 = vmatprep.subr.bf16.mxu1 %v7263_v52 }
 0x52c   :  { %6252 = vmatpush1.bf16.msra.mxu0 %v7922_v24  ;;  %6277 = vmatpush3.bf16.msra.mxu1 %v7926_v32 }
 0x52d   :  { %6254 = vmatprep.subr.bf16.mxu0 %v7928_v33  ;;  %6278 = vmatprep.subr.bf16.mxu1 %v7263_v52 }
 0x530   :  { %6256 = vmatpush1.bf16.msra.mxu0 %v7932_v0  ;;  %6280 = vmatpush3.bf16.msra.mxu1 %v7936_v35 }
 0x531   :  { %6282 = vmatprep.subr.bf16.mxu0 %v7862_v58  ;;  %6313 = vmatprep.subr.bf16.mxu1 %v7263_v52 }
 0x5e5   :  { %v2019_v6 = vpop.f32.mrb[30].mxu0  ;;  %v2090_v10 = vpop.f32.mrb[44].mxu1 }
 0x5e6   :  { %v6766_v20 = vadd.f32 %v6765_v3, %v2019_v6  ;;  %v2021_v25 = vpop.f32.mrb[31].mxu0  ;;  %v5536_v27 = vpop.f32.mrb[45].mxu1  ;;  %v2091_v50 = vadd.f32 %v2090_v10, %v1949_v39 }
 0x5e7   :  { %v6768_v61 = vadd.f32 %v6767_v16, %v2021_v25 }
 0x5e8   :  { %v4909_v7 = vmul.f32 -1.442695, %v6766_v20 }
 0x5e9   :  { %v4910_v8 = vmul.f32 -1.442695, %v6768_v61 }
 0x5ea   :  { %6875 = vpow2.f32 %v4909_v7 }
 0x5eb   :  { %6877 = vpow2.f32 %v4910_v8 }
 0x5f4   :  { %v6876_v1 = vpop.eup %6875 }
 0x5f5   :  { %v2098_v14 = vadd.f32 1.0, %v6876_v1  ;;  %v6878_v23 = vpop.eup %6877 }
 0x5f6   :  { %v2105_v42 = vadd.f32 1.0, %v6878_v23 }
 0x5f7   :  { %6879 = vrcp.f32 %v2098_v14 }
 0x5f8   :  { %6881 = vrcp.f32 %v2105_v42 }
 0x601   :  { %v6880_v53 = vpop.eup %6879 }
 0x602   :  { %v2108_v29 = vmul.f32 %v6880_v53, %v2091_v50  ;;  %v6882_v3 = vpop.eup %6881 }
 0x603   :  { %v2111_v6 = vsub.f32 1.0, %v6882_v3  ;;  %v2113_v25 = vmul.f32 %v6882_v3, %v7855_v15 }
 0x604   :  { %v2109_v51 = vadd.f32 %v2108_v29, %v7719_v36  ;;  %v2172_v36 = vld [vmem:[%s8908_s8] sm:$0x7] }
 0x605   :  { %v2177_v2 = vrot.slane %v2172_v36, %v7738_v49  ;;  %v2181_v10 = vrot.slane %v2172_v36, %v7741_v57 }
 0x606   :  { %6883 = vtanh.f32 %v2109_v51 }
 0x607   :  { %v6769_v61 = vadd.f32 %v2177_v2, %v7748_v4  ;;  %v6771_v1 = vadd.f32 %v2181_v10, %v7751_v54 }
 0x610   :  { %v6884_v16 = vpop.eup %6883 }
 0x611   :  { %v2112_v20 = vmul.f32 %v6884_v16, %v2111_v6  ;;  %v2185_v6 = vrot.slane %v2172_v36, %v7709_v18 }
 0x613   :  { %v7953_v27 = vadd.f32 %v2113_v25, %v2112_v20 }
 0x615   :  { %2254 = vmatmul.mubr.f32.vlgmr.msra.gmra.mrb[32].mxu0 %v7953_v27  ;;  %5570 = vmatmul.mubr.f32.vlgmr.msra.gmra.mrb[46].mxu1 %v7953_v27 }
 0x616   :  { %6284 = vmatpush1.bf16.msra.mxu0 %v7864_v9  ;;  %6315 = vmatpush3.bf16.msra.mxu1 %v7867_v56 }
 0x617   :  { %6286 = vmatprep.subr.bf16.mxu0 %v7871_v34  ;;  %6316 = vmatprep.subr.bf16.mxu1 %v7263_v52 }
 0x618   :  { %2489 = vmatprep.mubr.f32.mxu0 %v8948_v11  ;;  %5604 = vmatprep.mubr.msk.f32.mxu1 %vm7264_vm0, %v8948_v11 }
 0x61a   :  { %6288 = vmatpush1.bf16.msra.mxu0 %v7874_v19  ;;  %6318 = vmatpush3.bf16.msra.mxu1 %v7877_v59 }
 0x61b   :  { %6290 = vmatprep.subr.bf16.mxu0 %v7881_v5  ;;  %6319 = vmatprep.subr.bf16.mxu1 %v7263_v52 }
 0x61e   :  { %6292 = vmatpush1.bf16.msra.mxu0 %v7884_v13  ;;  %6321 = vmatpush3.bf16.msra.mxu1 %v7887_v21 }
 0x61f   :  { %6294 = vmatprep.subr.bf16.mxu0 %v7891_v30  ;;  %6322 = vmatprep.subr.bf16.mxu1 %v7263_v52 }
 0x622   :  { %6296 = vmatpush1.bf16.msra.mxu0 %v7894_v41  ;;  %6324 = vmatpush3.bf16.msra.mxu1 %v7897_v48 }
 0x623   :  { %6298 = vmatprep.subr.bf16.mxu0 %v7901_v63  ;;  %6325 = vmatprep.subr.bf16.mxu1 %v7263_v52 }
 0x626   :  { %6300 = vmatpush1.bf16.msra.mxu0 %v7904_v26  ;;  %6327 = vmatpush3.bf16.msra.mxu1 %v7907_v31 }
 0x627   :  { %6302 = vmatprep.subr.bf16.mxu0 %v7910_v55  ;;  %6328 = vmatprep.subr.bf16.mxu1 %v7263_v52 }
 0x62a   :  { %6304 = vmatpush1.bf16.msra.mxu0 %v7913_v60  ;;  %6330 = vmatpush3.bf16.msra.mxu1 %v7915_v12 }
 0x62b   :  { %6306 = vmatprep.subr.bf16.mxu0 %v7919_v62  ;;  %6331 = vmatprep.subr.bf16.mxu1 %v7263_v52 }
 0x62e   :  { %6308 = vmatpush1.bf16.msra.mxu0 %v7922_v24  ;;  %6333 = vmatpush3.bf16.msra.mxu1 %v7926_v32 }
 0x62f   :  { %6310 = vmatprep.subr.bf16.mxu0 %v7928_v33  ;;  %6334 = vmatprep.subr.bf16.mxu1 %v7263_v52 }
 0x632   :  { %6312 = vmatpush1.bf16.msra.mxu0 %v7932_v0  ;;  %6336 = vmatpush3.bf16.msra.mxu1 %v7936_v35 }
 0x633   :  { %6338 = vmatprep.subr.bf16.mxu0 %v7862_v58  ;;  %6369 = vmatprep.subr.bf16.mxu1 %v7263_v52 }
 0x6e8   :  { %v2255_v7 = vpop.f32.mrb[32].mxu0  ;;  %v2326_v8 = vpop.f32.mrb[46].mxu1 }
 0x6e9   :  { %v6770_v14 = vadd.f32 %v6769_v61, %v2255_v7  ;;  %v2257_v23 = vpop.f32.mrb[33].mxu0  ;;  %v5571_v39 = vpop.f32.mrb[47].mxu1  ;;  %v2327_v20 = vadd.f32 %v2326_v8, %v2185_v6 }
 0x6ea   :  { %v6772_v42 = vadd.f32 %v6771_v1, %v2257_v23 }
 0x6eb   :  { %v4911_v50 = vmul.f32 -1.442695, %v6770_v14 }
 0x6ec   :  { %v4912_v53 = vmul.f32 -1.442695, %v6772_v42 }
 0x6ed   :  { %6885 = vpow2.f32 %v4911_v50 }
 0x6ee   :  { %6887 = vpow2.f32 %v4912_v53 }
 0x6f7   :  { %v6886_v29 = vpop.eup %6885 }
 0x6f8   :  { %v2334_v51 = vadd.f32 1.0, %v6886_v29  ;;  %v6888_v3 = vpop.eup %6887 }
 0x6f9   :  { %v2341_v16 = vadd.f32 1.0, %v6888_v3 }
 0x6fa   :  { %6889 = vrcp.f32 %v2334_v51 }
 0x6fb   :  { %6891 = vrcp.f32 %v2341_v16 }
 0x704   :  { %v6890_v25 = vpop.eup %6889 }
 0x705   :  { %v2344_v2 = vmul.f32 %v6890_v25, %v2327_v20  ;;  %v6892_v61 = vpop.eup %6891 }
 0x706   :  { %v2347_v7 = vsub.f32 1.0, %v6892_v61  ;;  %v2349_v23 = vmul.f32 %v6892_v61, %v7953_v27 }
 0x707   :  { %v2345_v10 = vadd.f32 %v2344_v2, %v7721_v37  ;;  %v2408_v37 = vld [vmem:[%s8908_s8] sm:$0x7] }
 0x708   :  { %v2413_v36 = vrot.slane %v2408_v37, %v7738_v49  ;;  %v2417_v8 = vrot.slane %v2408_v37, %v7741_v57  ;;  %v2421_v61 = vrot.slane %v2408_v37, %v7709_v18 }
 0x709   :  { %6893 = vtanh.f32 %v2345_v10 }
 0x70a   :  { %v6773_v42 = vadd.f32 %v2413_v36, %v7748_v4  ;;  %v6775_v29 = vadd.f32 %v2417_v8, %v7751_v54 }
 0x713   :  { %v6894_v1 = vpop.eup %6893 }
 0x714   :  { %v2348_v14 = vmul.f32 %v6894_v1, %v2347_v7 }
 0x716   :  { %v8002_v39 = vadd.f32 %v2349_v23, %v2348_v14 }
 0x718   :  { %2490 = vmatmul.mubr.f32.vlgmr.msra.gmra.mrb[34].mxu0 %v8002_v39  ;;  %5605 = vmatmul.mubr.f32.vlgmr.msra.gmra.mrb[48].mxu1 %v8002_v39 }
 0x719   :  { %6340 = vmatpush1.bf16.msra.mxu0 %v7864_v9  ;;  %6371 = vmatpush3.bf16.msra.mxu1 %v7867_v56 }
 0x71a   :  { %6342 = vmatprep.subr.bf16.mxu0 %v7871_v34  ;;  %6372 = vmatprep.subr.bf16.mxu1 %v7263_v52 }
 0x71b   :  { %2725 = vmatprep.mubr.f32.mxu0 %v8948_v11  ;;  %5639 = vmatprep.mubr.msk.f32.mxu1 %vm7264_vm0, %v8948_v11 }
 0x71d   :  { %6344 = vmatpush1.bf16.msra.mxu0 %v7874_v19  ;;  %6374 = vmatpush3.bf16.msra.mxu1 %v7877_v59 }
 0x71e   :  { %6346 = vmatprep.subr.bf16.mxu0 %v7881_v5  ;;  %6375 = vmatprep.subr.bf16.mxu1 %v7263_v52 }
 0x721   :  { %6348 = vmatpush1.bf16.msra.mxu0 %v7884_v13  ;;  %6377 = vmatpush3.bf16.msra.mxu1 %v7887_v21 }
 0x722   :  { %6350 = vmatprep.subr.bf16.mxu0 %v7891_v30  ;;  %6378 = vmatprep.subr.bf16.mxu1 %v7263_v52 }
 0x725   :  { %6352 = vmatpush1.bf16.msra.mxu0 %v7894_v41  ;;  %6380 = vmatpush3.bf16.msra.mxu1 %v7897_v48 }
 0x726   :  { %6354 = vmatprep.subr.bf16.mxu0 %v7901_v63  ;;  %6381 = vmatprep.subr.bf16.mxu1 %v7263_v52 }
 0x729   :  { %6356 = vmatpush1.bf16.msra.mxu0 %v7904_v26  ;;  %6383 = vmatpush3.bf16.msra.mxu1 %v7907_v31 }
 0x72a   :  { %6358 = vmatprep.subr.bf16.mxu0 %v7910_v55  ;;  %6384 = vmatprep.subr.bf16.mxu1 %v7263_v52 }
 0x72d   :  { %6360 = vmatpush1.bf16.msra.mxu0 %v7913_v60  ;;  %6386 = vmatpush3.bf16.msra.mxu1 %v7915_v12 }
 0x72e   :  { %6362 = vmatprep.subr.bf16.mxu0 %v7919_v62  ;;  %6387 = vmatprep.subr.bf16.mxu1 %v7263_v52 }
 0x731   :  { %6364 = vmatpush1.bf16.msra.mxu0 %v7922_v24  ;;  %6389 = vmatpush3.bf16.msra.mxu1 %v7926_v32 }
 0x732   :  { %6366 = vmatprep.subr.bf16.mxu0 %v7928_v33  ;;  %6390 = vmatprep.subr.bf16.mxu1 %v7263_v52 }
 0x735   :  { %6368 = vmatpush1.bf16.msra.mxu0 %v7932_v0  ;;  %6392 = vmatpush3.bf16.msra.mxu1 %v7936_v35 }
 0x736   :  { %6394 = vmatprep.subr.bf16.mxu0 %v7862_v58  ;;  %6425 = vmatprep.subr.bf16.mxu1 %v7263_v52 }
 0x7eb   :  { %v2491_v50 = vpop.f32.mrb[34].mxu0  ;;  %v2562_v53 = vpop.f32.mrb[48].mxu1 }
 0x7ec   :  { %v6774_v51 = vadd.f32 %v6773_v42, %v2491_v50  ;;  %v2493_v3 = vpop.f32.mrb[35].mxu0  ;;  %v5606_v6 = vpop.f32.mrb[49].mxu1  ;;  %v2563_v1 = vadd.f32 %v2562_v53, %v2421_v61 }
 0x7ed   :  { %v6776_v58 = vadd.f32 %v6775_v29, %v2493_v3 }
 0x7ee   :  { %v4913_v16 = vmul.f32 -1.442695, %v6774_v51 }
 0x7ef   :  { %v4914_v20 = vmul.f32 -1.442695, %v6776_v58 }
 0x7f0   :  { %6895 = vpow2.f32 %v4913_v16  ;;  %v3069_v16 = vld [vmem:[#allocation10 + $0x8] sm:$0xff] }
 0x7f1   :  { %6897 = vpow2.f32 %v4914_v20 }
 0x7fa   :  { %v6896_v25 = vpop.eup %6895 }
 0x7fb   :  { %v2570_v2 = vadd.f32 1.0, %v6896_v25  ;;  %v6898_v10 = vpop.eup %6897  ;;  %v3068_v25 = vld [vmem:[#allocation10] sm:$0xff] }
 0x7fc   :  { %v2577_v7 = vadd.f32 1.0, %v6898_v10  ;;  %v3070_v10 = vld [vmem:[#allocation10 + $0x10] sm:$0xff] }
 0x7fd   :  { %6899 = vrcp.f32 %v2570_v2  ;;  %v3071_v2 = vld [vmem:[#allocation10 + $0x18] sm:$0xff] }
 0x7fe   :  { %6901 = vrcp.f32 %v2577_v7  ;;  %v8108_v61 = vpack.c.bf16 %v3071_v2, %v3068_v25  ;;  %v3073_v7 = vld [vmem:[#allocation10 + $0x28] sm:$0xff]  ;;  %v3102_v25 = vld [vmem:[#allocation10 + $0x110] sm:$0xff] }
 0x7ff   :  { %v3098_v2 = vld [vmem:[#allocation10 + $0xf0] sm:$0xff] }
 0x807   :  { %v6900_v14 = vpop.eup %6899 }
 0x808   :  { %v2580_v23 = vmul.f32 %v6900_v14, %v2563_v1  ;;  %v6902_v8 = vpop.eup %6901  ;;  %v8111_v1 = vpack.c.bf16 %v3073_v7, %v3070_v10  ;;  %v3075_v14 = vld [vmem:[#allocation10 + $0x38] sm:$0xff]  ;;  %v3101_v7 = vld [vmem:[#allocation10 + $0x108] sm:$0xff] }
 0x809   :  { %v2583_v42 = vsub.f32 1.0, %v6902_v8  ;;  %v2585_v51 = vmul.f32 %v6902_v8, %v8002_v39  ;;  %v3074_v8 = vld [vmem:[#allocation10 + $0x30] sm:$0xff] }
 0x80a   :  { %v2581_v36 = vadd.f32 %v2580_v23, %v7723_v38  ;;  %v2644_v38 = vld [vmem:[%s8908_s8] sm:$0x7]  ;;  %v3078_v23 = vld [vmem:[#allocation10 + $0x50] sm:$0xff] }
 0x80c   :  { %6903 = vtanh.f32 %v2581_v36  ;;  %v8115_v36 = vpack.c.bf16 %v3078_v23, %v3075_v14  ;;  %v3100_v14 = vld [vmem:[#allocation10 + $0x100] sm:$0xff]  ;;  %v3103_v23 = vld [vmem:[#allocation10 + $0x118] sm:$0xff] }
 0x816   :  { %v6904_v50 = vpop.eup %6903 }
 0x817   :  { %v2584_v29 = vmul.f32 %v6904_v50, %v2583_v42  ;;  %v3077_v42 = vld [vmem:[#allocation10 + $0x48] sm:$0xff]  ;;  %v3076_v50 = vld [vmem:[#allocation10 + $0x40] sm:$0xff] }
 0x819   :  { %v8051_v3 = vadd.f32 %v2585_v51, %v2584_v29  ;;  %v8118_v29 = vpack.c.bf16 %v3077_v42, %v3074_v8  ;;  %v3079_v51 = vld [vmem:[#allocation10 + $0x58] sm:$0xff]  ;;  %v8156_v8 = vpack.c.bf16 %v3101_v7, %v3098_v2  ;;  %v3105_v42 = vld [vmem:[#allocation10 + $0x128] sm:$0xff] }
 0x81b   :  { %2726 = vmatmul.mubr.f32.vlgmr.msra.gmra.mrb[36].mxu0 %v8051_v3  ;;  %5640 = vmatmul.mubr.f32.vlgmr.msra.gmra.mrb[50].mxu1 %v8051_v3 }
 0x81c   :  { %6396 = vmatpush1.bf16.msra.mxu0 %v7864_v9  ;;  %6427 = vmatpush3.bf16.msra.mxu1 %v7867_v56  ;;  %v2649_v9 = vrot.slane %v2644_v38, %v7738_v49  ;;  %v2653_v56 = vrot.slane %v2644_v38, %v7741_v57 }
 0x81d   :  { %6398 = vmatprep.subr.bf16.mxu0 %v7871_v34  ;;  %6428 = vmatprep.subr.bf16.mxu1 %v7263_v52 }
 0x81e   :  { %2961 = vmatprep.mubr.f32.mxu0 %v8948_v11  ;;  %5674 = vmatprep.mubr.msk.f32.mxu1 %vm7264_vm0, %v8948_v11  ;;  %v6777_v34 = vadd.f32 %v2649_v9, %v7748_v4  ;;  %v3081_v9 = vld [vmem:[#allocation10 + $0x68] sm:$0xff] }
 0x820   :  { %6400 = vmatpush1.bf16.msra.mxu0 %v7874_v19  ;;  %6430 = vmatpush3.bf16.msra.mxu1 %v7877_v59 }
 0x821   :  { %6402 = vmatprep.subr.bf16.mxu0 %v7881_v5  ;;  %6431 = vmatprep.subr.bf16.mxu1 %v7263_v52  ;;  %v6779_v5 = vadd.f32 %v2653_v56, %v7751_v54  ;;  %v3084_v56 = vld [vmem:[#allocation10 + $0x80] sm:$0xff] }
 0x824   :  { %6404 = vmatpush1.bf16.msra.mxu0 %v7884_v13  ;;  %6433 = vmatpush3.bf16.msra.mxu1 %v7887_v21 }
 0x825   :  { %6406 = vmatprep.subr.bf16.mxu0 %v7891_v30  ;;  %6434 = vmatprep.subr.bf16.mxu1 %v7263_v52 }
 0x828   :  { %6408 = vmatpush1.bf16.msra.mxu0 %v7894_v41  ;;  %6436 = vmatpush3.bf16.msra.mxu1 %v7897_v48 }
 0x829   :  { %6410 = vmatprep.subr.bf16.mxu0 %v7901_v63  ;;  %6437 = vmatprep.subr.bf16.mxu1 %v7263_v52 }
 0x82c   :  { %6412 = vmatpush1.bf16.msra.mxu0 %v7904_v26  ;;  %6439 = vmatpush3.bf16.msra.mxu1 %v7907_v31 }
 0x82d   :  { %6414 = vmatprep.subr.bf16.mxu0 %v7910_v55  ;;  %6440 = vmatprep.subr.bf16.mxu1 %v7263_v52 }
 0x830   :  { %6416 = vmatpush1.bf16.msra.mxu0 %v7913_v60  ;;  %6442 = vmatpush3.bf16.msra.mxu1 %v7915_v12  ;;  %v2657_v60 = vrot.slane %v2644_v38, %v7709_v18  ;;  %v8121_v38 = vpack.c.bf16 %v3079_v51, %v3076_v50  ;;  %v3108_v50 = vld [vmem:[#allocation10 + $0x140] sm:$0xff]  ;;  %v8160_v51 = vpack.c.bf16 %v3103_v23, %v3100_v14 }
 0x831   :  { %6418 = vmatprep.subr.bf16.mxu0 %v7919_v62  ;;  %6443 = vmatprep.subr.bf16.mxu1 %v7263_v52 }
 0x834   :  { %6420 = vmatpush1.bf16.msra.mxu0 %v7922_v24  ;;  %6445 = vmatpush3.bf16.msra.mxu1 %v7926_v32 }
 0x835   :  { %6422 = vmatprep.subr.bf16.mxu0 %v7928_v33  ;;  %6446 = vmatprep.subr.bf16.mxu1 %v7263_v52 }
 0x838   :  { %6424 = vmatpush1.bf16.msra.mxu0 %v7932_v0  ;;  %6448 = vmatpush3.bf16.msra.mxu1 %v7936_v35 }
 0x839   :  { %6481 = vmatprep.subr.bf16.mxu1 %v7263_v52 }
 0x8ee   :  { %v2727_v19 = vpop.f32.mrb[36].mxu0  ;;  %v2798_v59 = vpop.f32.mrb[50].mxu1 }
 0x8ef   :  { %v6778_v13 = vadd.f32 %v6777_v34, %v2727_v19  ;;  %v2729_v21 = vpop.f32.mrb[37].mxu0  ;;  %v5641_v30 = vpop.f32.mrb[51].mxu1  ;;  %v2799_v62 = vadd.f32 %v2798_v59, %v2657_v60  ;;  %v8125_v34 = vpack.c.bf16 %v3084_v56, %v3081_v9  ;;  %v3080_v19 = vld [vmem:[#allocation10 + $0x60] sm:$0xff]  ;;  %v3083_v59 = vld [vmem:[#allocation10 + $0x78] sm:$0xff]  ;;  %v8162_v9 = vpack.c.bf16 %v3108_v50, %v3105_v42 }
 0x8f0   :  { %v6780_v41 = vadd.f32 %v6779_v5, %v2729_v21  ;;  %v3082_v5 = vld [vmem:[#allocation10 + $0x70] sm:$0xff]  ;;  %v3085_v21 = vld [vmem:[#allocation10 + $0x88] sm:$0xff]  ;;  %v3104_v56 = vld [vmem:[#allocation10 + $0x120] sm:$0xff] }
 0x8f1   :  { %v4915_v48 = vmul.f32 -1.442695, %v6778_v13  ;;  %v8128_v13 = vpack.c.bf16 %v3083_v59, %v3080_v19  ;;  %v8131_v30 = vpack.c.bf16 %v3085_v21, %v3082_v5  ;;  %v3107_v19 = vld [vmem:[#allocation10 + $0x138] sm:$0xff]  ;;  %v3106_v59 = vld [vmem:[#allocation10 + $0x130] sm:$0xff]  ;;  %v3109_v5 = vld [vmem:[#allocation10 + $0x148] sm:$0xff] }
 0x8f2   :  { %v4916_v63 = vmul.f32 -1.442695, %v6780_v41  ;;  %v3087_v41 = vld [vmem:[#allocation10 + $0x98] sm:$0xff] }
 0x8f3   :  { %6905 = vpow2.f32 %v4915_v48  ;;  %v3090_v48 = vld [vmem:[#allocation10 + $0xb0] sm:$0xff]  ;;  %v3111_v21 = vld [vmem:[#allocation10 + $0x158] sm:$0xff] }
 0x8f4   :  { %6907 = vpow2.f32 %v4916_v63  ;;  %v8135_v63 = vpack.c.bf16 %v3090_v48, %v3087_v41  ;;  %v3114_v41 = vld [vmem:[#allocation10 + $0x170] sm:$0xff]  ;;  %v8166_v48 = vpack.c.bf16 %v3107_v19, %v3104_v56 }
 0x8fd   :  { %v6906_v26 = vpop.eup %6905 }
 0x8fe   :  { %v2806_v31 = vadd.f32 1.0, %v6906_v26  ;;  %v6908_v55 = vpop.eup %6907  ;;  %v3086_v26 = vld [vmem:[#allocation10 + $0x90] sm:$0xff] }
 0x8ff   :  { %v2813_v12 = vadd.f32 1.0, %v6908_v55  ;;  %v3088_v55 = vld [vmem:[#allocation10 + $0xa0] sm:$0xff] }
 0x900   :  { %6909 = vrcp.f32 %v2806_v31  ;;  %v3089_v31 = vld [vmem:[#allocation10 + $0xa8] sm:$0xff] }
 0x901   :  { %6911 = vrcp.f32 %v2813_v12  ;;  %v8138_v60 = vpack.c.bf16 %v3089_v31, %v3086_v26  ;;  %v3091_v12 = vld [vmem:[#allocation10 + $0xb8] sm:$0xff]  ;;  %v8170_v26 = vpack.c.bf16 %v3109_v5, %v3106_v59  ;;  %v8172_v31 = vpack.c.bf16 %v3114_v41, %v3111_v21 }
 0x90a   :  { %v6910_v24 = vpop.eup %6909 }
 0x90b   :  { %v2816_v32 = vmul.f32 %v6910_v24, %v2799_v62  ;;  %v6912_v0 = vpop.eup %6911  ;;  %v8141_v62 = vpack.c.bf16 %v3091_v12, %v3088_v55  ;;  %v3093_v24 = vld [vmem:[#allocation10 + $0xc8] sm:$0xff]  ;;  %v3110_v55 = vld [vmem:[#allocation10 + $0x150] sm:$0xff] }
 0x90c   :  { %v2819_v35 = vsub.f32 1.0, %v6912_v0  ;;  %v2821_v6 = vmul.f32 %v6912_v0, %v8051_v3  ;;  %v3113_v12 = vld [vmem:[#allocation10 + $0x168] sm:$0xff] }
 0x90d   :  { %v2817_v33 = vadd.f32 %v2816_v32, %v7725_v40  ;;  %v3072_v40 = vld [vmem:[#allocation10 + $0x20] sm:$0xff] }
 0x90e   :  { %v8106_v20 = vpack.c.bf16 %v3072_v40, %v3069_v16  ;;  %v3096_v32 = vld [vmem:[#allocation10 + $0xe0] sm:$0xff]  ;;  %v3099_v40 = vld [vmem:[#allocation10 + $0xf8] sm:$0xff] }
 0x90f   :  { %6913 = vtanh.f32 %v2817_v33  ;;  %v3092_v33 = vld [vmem:[#allocation10 + $0xc0] sm:$0xff]  ;;  %v8145_v0 = vpack.c.bf16 %v3096_v32, %v3093_v24  ;;  %v8153_v10 = vpack.c.bf16 %v3102_v25, %v3099_v40  ;;  %v3115_v32 = vld [vmem:[#allocation10 + $0x178] sm:$0xff] }
 0x910   :  { %6450 = vmatprep.subr.bf16.mxu0 %v8106_v20  ;;  %v3112_v24 = vld [vmem:[#allocation10 + $0x160] sm:$0xff] }
 0x919   :  { %v6914_v37 = vpop.eup %6913 }
 0x91a   :  { %v2820_v53 = vmul.f32 %v6914_v37, %v2819_v35  ;;  %v3095_v35 = vld [vmem:[#allocation10 + $0xd8] sm:$0xff]  ;;  %v3094_v37 = vld [vmem:[#allocation10 + $0xd0] sm:$0xff] }
 0x91c   :  { %v8099_v58 = vadd.f32 %v2821_v6, %v2820_v53  ;;  %v3097_v53 = vld [vmem:[#allocation10 + $0xe8] sm:$0xff]  ;;  %v8148_v6 = vpack.c.bf16 %v3095_v35, %v3092_v33  ;;  %v8176_v33 = vpack.c.bf16 %v3113_v12, %v3110_v55  ;;  %v8180_v35 = vpack.c.bf16 %v3115_v32, %v3112_v24 }
 0x91d   :  { %v8150_v16 = vpack.c.bf16 %v3097_v53, %v3094_v37  ;;  %v2880_v37 = vld [vmem:[%s8908_s8] sm:$0x7] }
 0x91e   :  { %2962 = vmatmul.mubr.f32.vlgmr.msra.gmra.mrb[38].mxu0 %v8099_v58  ;;  %5675 = vmatmul.mubr.f32.vlgmr.msra.gmra.mrb[52].mxu1 %v8099_v58  ;;  %v2885_v53 = vrot.slane %v2880_v37, %v7738_v49  ;;  %v2889_v40 = vrot.slane %v2880_v37, %v7741_v57  ;;  %v2893_v55 = vrot.slane %v2880_v37, %v7709_v18 }
 0x91f   :  { %3197 = vmatprep.mubr.f32.mxu0 %v8948_v11  ;;  %5709 = vmatprep.mubr.msk.f32.mxu1 %vm7264_vm0, %v8948_v11 }
 0x920   :  { %6452 = vmatpush1.bf16.msra.mxu0 %v8108_v61  ;;  %6483 = vmatpush3.bf16.msra.mxu1 %v8111_v1  ;;  %v6781_v25 = vadd.f32 %v2885_v53, %v7748_v4  ;;  %v6783_v14 = vadd.f32 %v2889_v40, %v7751_v54 }
 0x921   :  { %6484 = vmatprep.subr.bf16.mxu1 %v7263_v52  ;;  %6454 = vmatprep.subr.bf16.mxu0 %v8115_v36 }
 0x924   :  { %6456 = vmatpush1.bf16.msra.mxu0 %v8118_v29  ;;  %6486 = vmatpush3.bf16.msra.mxu1 %v8121_v38 }
 0x925   :  { %6487 = vmatprep.subr.bf16.mxu1 %v7263_v52  ;;  %6458 = vmatprep.subr.bf16.mxu0 %v8125_v34 }
 0x928   :  { %6460 = vmatpush1.bf16.msra.mxu0 %v8128_v13  ;;  %6489 = vmatpush3.bf16.msra.mxu1 %v8131_v30 }
 0x929   :  { %6490 = vmatprep.subr.bf16.mxu1 %v7263_v52  ;;  %6462 = vmatprep.subr.bf16.mxu0 %v8135_v63 }
 0x92c   :  { %6464 = vmatpush1.bf16.msra.mxu0 %v8138_v60  ;;  %6492 = vmatpush3.bf16.msra.mxu1 %v8141_v62 }
 0x92d   :  { %6493 = vmatprep.subr.bf16.mxu1 %v7263_v52  ;;  %6466 = vmatprep.subr.bf16.mxu0 %v8145_v0 }
 0x930   :  { %6468 = vmatpush1.bf16.msra.mxu0 %v8148_v6  ;;  %6495 = vmatpush3.bf16.msra.mxu1 %v8150_v16 }
 0x931   :  { %6470 = vmatprep.subr.bf16.mxu0 %v8153_v10  ;;  %6496 = vmatprep.subr.bf16.mxu1 %v7263_v52 }
 0x934   :  { %6472 = vmatpush1.bf16.msra.mxu0 %v8156_v8  ;;  %6498 = vmatpush3.bf16.msra.mxu1 %v8160_v51 }
 0x935   :  { %6474 = vmatprep.subr.bf16.mxu0 %v8162_v9  ;;  %6499 = vmatprep.subr.bf16.mxu1 %v7263_v52 }
 0x938   :  { %6476 = vmatpush1.bf16.msra.mxu0 %v8166_v48  ;;  %6501 = vmatpush3.bf16.msra.mxu1 %v8170_v26 }
 0x939   :  { %6478 = vmatprep.subr.bf16.mxu0 %v8172_v31  ;;  %6502 = vmatprep.subr.bf16.mxu1 %v7263_v52 }
 0x93c   :  { %6480 = vmatpush1.bf16.msra.mxu0 %v8176_v33  ;;  %6504 = vmatpush3.bf16.msra.mxu1 %v8180_v35 }
 0x93d   :  { %6506 = vmatprep.subr.bf16.mxu0 %v8106_v20  ;;  %6537 = vmatprep.subr.bf16.mxu1 %v7263_v52 }
 0x9f1   :  { %v2963_v2 = vpop.f32.mrb[38].mxu0  ;;  %v3034_v7 = vpop.f32.mrb[52].mxu1 }
 0x9f2   :  { %v6782_v23 = vadd.f32 %v6781_v25, %v2963_v2  ;;  %v2965_v42 = vpop.f32.mrb[39].mxu0  ;;  %v5676_v50 = vpop.f32.mrb[53].mxu1  ;;  %v3035_v24 = vadd.f32 %v3034_v7, %v2893_v55 }
 0x9f3   :  { %v6784_v56 = vadd.f32 %v6783_v14, %v2965_v42 }
 0x9f4   :  { %v4917_v19 = vmul.f32 -1.442695, %v6782_v23 }
 0x9f5   :  { %v4918_v59 = vmul.f32 -1.442695, %v6784_v56 }
 0x9f6   :  { %6915 = vpow2.f32 %v4917_v19 }
 0x9f7   :  { %6917 = vpow2.f32 %v4918_v59 }
 0xa00   :  { %v6916_v5 = vpop.eup %6915 }
 0xa01   :  { %v3042_v21 = vadd.f32 1.0, %v6916_v5  ;;  %v6918_v41 = vpop.eup %6917 }
 0xa02   :  { %v3049_v12 = vadd.f32 1.0, %v6918_v41 }
 0xa03   :  { %6919 = vrcp.f32 %v3042_v21 }
 0xa04   :  { %6921 = vrcp.f32 %v3049_v12 }
 0xa0d   :  { %v6920_v32 = vpop.eup %6919 }
 0xa0e   :  { %v3052_v53 = vmul.f32 %v6920_v32, %v3035_v24  ;;  %v6922_v25 = vpop.eup %6921 }
 0xa0f   :  { %v3055_v2 = vsub.f32 1.0, %v6922_v25  ;;  %v3057_v42 = vmul.f32 %v6922_v25, %v8099_v58 }
 0xa10   :  { %v3053_v40 = vadd.f32 %v3052_v53, %v7727_v43  ;;  %v3116_v43 = vld [vmem:[%s8908_s8] sm:$0x7] }
 0xa11   :  { %v3121_v37 = vrot.slane %v3116_v43, %v7738_v49  ;;  %v3125_v7 = vrot.slane %v3116_v43, %v7741_v57 }
 0xa12   :  { %6923 = vtanh.f32 %v3053_v40 }
 0xa13   :  { %v6785_v56 = vadd.f32 %v3121_v37, %v7748_v4  ;;  %v6787_v5 = vadd.f32 %v3125_v7, %v7751_v54 }
 0xa1c   :  { %v6924_v14 = vpop.eup %6923 }
 0xa1d   :  { %v3056_v23 = vmul.f32 %v6924_v14, %v3055_v2  ;;  %v3129_v2 = vrot.slane %v3116_v43, %v7709_v18 }
 0xa1f   :  { %v8197_v50 = vadd.f32 %v3057_v42, %v3056_v23 }
 0xa21   :  { %3198 = vmatmul.mubr.f32.vlgmr.msra.gmra.mrb[40].mxu0 %v8197_v50  ;;  %5710 = vmatmul.mubr.f32.vlgmr.msra.gmra.mrb[54].mxu1 %v8197_v50 }
 0xa22   :  { %6508 = vmatpush1.bf16.msra.mxu0 %v8108_v61  ;;  %6539 = vmatpush3.bf16.msra.mxu1 %v8111_v1 }
 0xa23   :  { %6510 = vmatprep.subr.bf16.mxu0 %v8115_v36  ;;  %6540 = vmatprep.subr.bf16.mxu1 %v7263_v52 }
 0xa24   :  { %3433 = vmatprep.mubr.f32.mxu0 %v8948_v11  ;;  %5744 = vmatprep.mubr.msk.f32.mxu1 %vm7264_vm0, %v8948_v11 }
 0xa26   :  { %6512 = vmatpush1.bf16.msra.mxu0 %v8118_v29  ;;  %6542 = vmatpush3.bf16.msra.mxu1 %v8121_v38 }
 0xa27   :  { %6514 = vmatprep.subr.bf16.mxu0 %v8125_v34  ;;  %6543 = vmatprep.subr.bf16.mxu1 %v7263_v52 }
 0xa2a   :  { %6516 = vmatpush1.bf16.msra.mxu0 %v8128_v13  ;;  %6545 = vmatpush3.bf16.msra.mxu1 %v8131_v30 }
 0xa2b   :  { %6518 = vmatprep.subr.bf16.mxu0 %v8135_v63  ;;  %6546 = vmatprep.subr.bf16.mxu1 %v7263_v52 }
 0xa2e   :  { %6520 = vmatpush1.bf16.msra.mxu0 %v8138_v60  ;;  %6548 = vmatpush3.bf16.msra.mxu1 %v8141_v62 }
 0xa2f   :  { %6522 = vmatprep.subr.bf16.mxu0 %v8145_v0  ;;  %6549 = vmatprep.subr.bf16.mxu1 %v7263_v52 }
 0xa32   :  { %6524 = vmatpush1.bf16.msra.mxu0 %v8148_v6  ;;  %6551 = vmatpush3.bf16.msra.mxu1 %v8150_v16 }
 0xa33   :  { %6526 = vmatprep.subr.bf16.mxu0 %v8153_v10  ;;  %6552 = vmatprep.subr.bf16.mxu1 %v7263_v52 }
 0xa36   :  { %6528 = vmatpush1.bf16.msra.mxu0 %v8156_v8  ;;  %6554 = vmatpush3.bf16.msra.mxu1 %v8160_v51 }
 0xa37   :  { %6530 = vmatprep.subr.bf16.mxu0 %v8162_v9  ;;  %6555 = vmatprep.subr.bf16.mxu1 %v7263_v52 }
 0xa3a   :  { %6532 = vmatpush1.bf16.msra.mxu0 %v8166_v48  ;;  %6557 = vmatpush3.bf16.msra.mxu1 %v8170_v26 }
 0xa3b   :  { %6534 = vmatprep.subr.bf16.mxu0 %v8172_v31  ;;  %6558 = vmatprep.subr.bf16.mxu1 %v7263_v52 }
 0xa3e   :  { %6536 = vmatpush1.bf16.msra.mxu0 %v8176_v33  ;;  %6560 = vmatpush3.bf16.msra.mxu1 %v8180_v35 }
 0xa3f   :  { %6562 = vmatprep.subr.bf16.mxu0 %v8106_v20  ;;  %6593 = vmatprep.subr.bf16.mxu1 %v7263_v52 }
 0xaf4   :  { %v3199_v19 = vpop.f32.mrb[40].mxu0  ;;  %v3270_v59 = vpop.f32.mrb[54].mxu1 }
 0xaf5   :  { %v6786_v21 = vadd.f32 %v6785_v56, %v3199_v19  ;;  %v3201_v41 = vpop.f32.mrb[41].mxu0  ;;  %v5711_v55 = vpop.f32.mrb[55].mxu1  ;;  %v3271_v23 = vadd.f32 %v3270_v59, %v3129_v2 }
 0xaf6   :  { %v6788_v12 = vadd.f32 %v6787_v5, %v3201_v41 }
 0xaf7   :  { %v4919_v24 = vmul.f32 -1.442695, %v6786_v21 }
 0xaf8   :  { %v4920_v32 = vmul.f32 -1.442695, %v6788_v12 }
 0xaf9   :  { %6925 = vpow2.f32 %v4919_v24 }
 0xafa   :  { %6927 = vpow2.f32 %v4920_v32 }
 0xb03   :  { %v6926_v53 = vpop.eup %6925 }
 0xb04   :  { %v3278_v40 = vadd.f32 1.0, %v6926_v53  ;;  %v6928_v25 = vpop.eup %6927 }
 0xb05   :  { %v3285_v14 = vadd.f32 1.0, %v6928_v25 }
 0xb06   :  { %6929 = vrcp.f32 %v3278_v40 }
 0xb07   :  { %6931 = vrcp.f32 %v3285_v14 }
 0xb10   :  { %v6930_v42 = vpop.eup %6929 }
 0xb11   :  { %v3288_v37 = vmul.f32 %v6930_v42, %v3271_v23  ;;  %v6932_v56 = vpop.eup %6931 }
 0xb12   :  { %v3291_v19 = vsub.f32 1.0, %v6932_v56  ;;  %v3293_v41 = vmul.f32 %v6932_v56, %v8197_v50 }
 0xb13   :  { %v3289_v7 = vadd.f32 %v3288_v37, %v7729_v44  ;;  %v3352_v44 = vld [vmem:[%s8908_s8] sm:$0x7] }
 0xb14   :  { %v3357_v43 = vrot.slane %v3352_v44, %v7738_v49  ;;  %v3361_v59 = vrot.slane %v3352_v44, %v7741_v57  ;;  %v3365_v56 = vrot.slane %v3352_v44, %v7709_v18 }
 0xb15   :  { %6933 = vtanh.f32 %v3289_v7 }
 0xb16   :  { %v6789_v12 = vadd.f32 %v3357_v43, %v7748_v4  ;;  %v6791_v53 = vadd.f32 %v3361_v59, %v7751_v54 }
 0xb1f   :  { %v6934_v5 = vpop.eup %6933 }
 0xb20   :  { %v3292_v21 = vmul.f32 %v6934_v5, %v3291_v19 }
 0xb22   :  { %v8246_v55 = vadd.f32 %v3293_v41, %v3292_v21 }
 0xb24   :  { %3434 = vmatmul.mubr.f32.vlgmr.msra.gmra.mrb[42].mxu0 %v8246_v55  ;;  %5745 = vmatmul.mubr.f32.vlgmr.msra.gmra.mrb[56].mxu1 %v8246_v55 }
 0xb25   :  { %6564 = vmatpush1.bf16.msra.mxu0 %v8108_v61  ;;  %6595 = vmatpush3.bf16.msra.mxu1 %v8111_v1 }
 0xb26   :  { %6566 = vmatprep.subr.bf16.mxu0 %v8115_v36  ;;  %6596 = vmatprep.subr.bf16.mxu1 %v7263_v52 }
 0xb27   :  { %3669 = vmatprep.mubr.f32.mxu0 %v8948_v11  ;;  %5779 = vmatprep.mubr.msk.f32.mxu1 %vm7264_vm0, %v8948_v11 }
 0xb29   :  { %6568 = vmatpush1.bf16.msra.mxu0 %v8118_v29  ;;  %6598 = vmatpush3.bf16.msra.mxu1 %v8121_v38 }
 0xb2a   :  { %6570 = vmatprep.subr.bf16.mxu0 %v8125_v34  ;;  %6599 = vmatprep.subr.bf16.mxu1 %v7263_v52 }
 0xb2d   :  { %6572 = vmatpush1.bf16.msra.mxu0 %v8128_v13  ;;  %6601 = vmatpush3.bf16.msra.mxu1 %v8131_v30 }
 0xb2e   :  { %6574 = vmatprep.subr.bf16.mxu0 %v8135_v63  ;;  %6602 = vmatprep.subr.bf16.mxu1 %v7263_v52 }
 0xb31   :  { %6576 = vmatpush1.bf16.msra.mxu0 %v8138_v60  ;;  %6604 = vmatpush3.bf16.msra.mxu1 %v8141_v62 }
 0xb32   :  { %6578 = vmatprep.subr.bf16.mxu0 %v8145_v0  ;;  %6605 = vmatprep.subr.bf16.mxu1 %v7263_v52 }
 0xb35   :  { %6580 = vmatpush1.bf16.msra.mxu0 %v8148_v6  ;;  %6607 = vmatpush3.bf16.msra.mxu1 %v8150_v16 }
 0xb36   :  { %6582 = vmatprep.subr.bf16.mxu0 %v8153_v10  ;;  %6608 = vmatprep.subr.bf16.mxu1 %v7263_v52 }
 0xb39   :  { %6584 = vmatpush1.bf16.msra.mxu0 %v8156_v8  ;;  %6610 = vmatpush3.bf16.msra.mxu1 %v8160_v51 }
 0xb3a   :  { %6586 = vmatprep.subr.bf16.mxu0 %v8162_v9  ;;  %6611 = vmatprep.subr.bf16.mxu1 %v7263_v52 }
 0xb3d   :  { %6588 = vmatpush1.bf16.msra.mxu0 %v8166_v48  ;;  %6613 = vmatpush3.bf16.msra.mxu1 %v8170_v26 }
 0xb3e   :  { %6590 = vmatprep.subr.bf16.mxu0 %v8172_v31  ;;  %6614 = vmatprep.subr.bf16.mxu1 %v7263_v52 }
 0xb41   :  { %6592 = vmatpush1.bf16.msra.mxu0 %v8176_v33  ;;  %6616 = vmatpush3.bf16.msra.mxu1 %v8180_v35 }
 0xb42   :  { %6618 = vmatprep.subr.bf16.mxu0 %v8106_v20  ;;  %6649 = vmatprep.subr.bf16.mxu1 %v7263_v52 }
 0xbf7   :  { %v3435_v24 = vpop.f32.mrb[42].mxu0  ;;  %v3506_v32 = vpop.f32.mrb[56].mxu1 }
 0xbf8   :  { %v6790_v40 = vadd.f32 %v6789_v12, %v3435_v24  ;;  %v3437_v25 = vpop.f32.mrb[43].mxu0  ;;  %v5746_v2 = vpop.f32.mrb[57].mxu1  ;;  %v3507_v5 = vadd.f32 %v3506_v32, %v3365_v56  ;;  %v4027_v56 = vld [vmem:[#allocation12 + $0x48] sm:$0xff] }
 0xbf9   :  { %v6792_v20 = vadd.f32 %v6791_v53, %v3437_v25 }
 0xbfa   :  { %v4921_v14 = vmul.f32 -1.442695, %v6790_v40 }
 0xbfb   :  { %v4922_v23 = vmul.f32 -1.442695, %v6792_v20 }
 0xbfc   :  { %6935 = vpow2.f32 %v4921_v14  ;;  %v4018_v14 = vld [vmem:[#allocation12] sm:$0xff] }
 0xbfd   :  { %6937 = vpow2.f32 %v4922_v23  ;;  %v4022_v23 = vld [vmem:[#allocation12 + $0x20] sm:$0xff] }
 0xc06   :  { %v6936_v42 = vpop.eup %6935 }
 0xc07   :  { %v3514_v37 = vadd.f32 1.0, %v6936_v42  ;;  %v6938_v7 = vpop.eup %6937 }
 0xc08   :  { %v3521_v19 = vadd.f32 1.0, %v6938_v7  ;;  %v4024_v7 = vld [vmem:[#allocation12 + $0x30] sm:$0xff] }
 0xc09   :  { %6939 = vrcp.f32 %v3514_v37  ;;  %v4020_v37 = vld [vmem:[#allocation12 + $0x10] sm:$0xff] }
 0xc0a   :  { %6941 = vrcp.f32 %v3521_v19 }
 0xc13   :  { %v6940_v21 = vpop.eup %6939 }
 0xc14   :  { %v3524_v41 = vmul.f32 %v6940_v21, %v3507_v5  ;;  %v6942_v59 = vpop.eup %6941  ;;  %v4031_v5 = vld [vmem:[#allocation12 + $0x68] sm:$0xff]  ;;  %v4029_v21 = vld [vmem:[#allocation12 + $0x58] sm:$0xff] }
 0xc15   :  { %v3527_v12 = vsub.f32 1.0, %v6942_v59  ;;  %v3529_v40 = vmul.f32 %v6942_v59, %v8246_v55 }
 0xc16   :  { %v3525_v43 = vadd.f32 %v3524_v41, %v7731_v45  ;;  %v4019_v45 = vld [vmem:[#allocation12 + $0x8] sm:$0xff]  ;;  %v4033_v41 = vld [vmem:[#allocation12 + $0x78] sm:$0xff] }
 0xc18   :  { %6943 = vtanh.f32 %v3525_v43 }
 0xc22   :  { %v6944_v24 = vpop.eup %6943 }
 0xc23   :  { %v3528_v53 = vmul.f32 %v6944_v24, %v3527_v12  ;;  %v6675_v12 = vpack.c.bf16 %v4022_v23, %v4018_v14  ;;  %v8345_v24 = vpack.c.bf16 %v4024_v7, %v4020_v37  ;;  %v4051_v14 = vld [vmem:[#allocation12 + $0x108] sm:$0xff]  ;;  %v4057_v37 = vld [vmem:[#allocation12 + $0x138] sm:$0xff] }
 0xc24   :  { %v4055_v23 = vld [vmem:[#allocation12 + $0x128] sm:$0xff] }
 0xc25   :  { %v8295_v25 = vadd.f32 %v3529_v40, %v3528_v53  ;;  %v4026_v53 = vld [vmem:[#allocation12 + $0x40] sm:$0xff] }
 0xc27   :  { %3670 = vmatmul.mubr.f32.vlgmr.msra.gmra.mrb[44].mxu0 %v8295_v25  ;;  %5780 = vmatmul.mubr.f32.vlgmr.msra.gmra.mrb[58].mxu1 %v8295_v25 }
 0xc28   :  { %6620 = vmatpush1.bf16.msra.mxu0 %v8108_v61  ;;  %6651 = vmatpush3.bf16.msra.mxu1 %v8111_v1  ;;  %v4023_v61 = vld [vmem:[#allocation12 + $0x28] sm:$0xff]  ;;  %v4021_v1 = vld [vmem:[#allocation12 + $0x18] sm:$0xff] }
 0xc29   :  { %6622 = vmatprep.subr.bf16.mxu0 %v8115_v36  ;;  %6652 = vmatprep.subr.bf16.mxu1 %v7263_v52  ;;  %v6673_v36 = vpack.c.bf16 %v4023_v61, %v4019_v45  ;;  %v6677_v45 = vpack.c.bf16 %v4031_v5, %v4027_v56  ;;  %v8349_v61 = vpack.c.bf16 %v4033_v41, %v4029_v21  ;;  %v4054_v5 = vld [vmem:[#allocation12 + $0x120] sm:$0xff] }
 0xc2a   :  { %3905 = vmatprep.mubr.f32.mxu0 %v8948_v11  ;;  %5814 = vmatprep.mubr.msk.f32.mxu1 %vm7264_vm0, %v8948_v11  ;;  %v6689_v21 = vpack.c.bf16 %v4055_v23, %v4051_v14  ;;  %v4077_v14 = vld [vmem:[#allocation12 + $0x1d8] sm:$0xff] }
 0xc2b   :  { %v4081_v23 = vld [vmem:[#allocation12 + $0x1f8] sm:$0xff] }
 0xc2c   :  { %6624 = vmatpush1.bf16.msra.mxu0 %v8118_v29  ;;  %6654 = vmatpush3.bf16.msra.mxu1 %v8121_v38  ;;  %v4025_v29 = vld [vmem:[#allocation12 + $0x38] sm:$0xff] }
 0xc2d   :  { %6626 = vmatprep.subr.bf16.mxu0 %v8125_v34  ;;  %6655 = vmatprep.subr.bf16.mxu1 %v7263_v52  ;;  %v8332_v38 = vpack.c.bf16 %v4025_v29, %v4021_v1  ;;  %v3588_v34 = vld [vmem:[%s8908_s8] sm:$0x7]  ;;  %v4028_v1 = vld [vmem:[#allocation12 + $0x50] sm:$0xff]  ;;  %v4035_v29 = vld [vmem:[#allocation12 + $0x88] sm:$0xff] }
 0xc30   :  { %6628 = vmatpush1.bf16.msra.mxu0 %v8128_v13  ;;  %6657 = vmatpush3.bf16.msra.mxu1 %v8131_v30  ;;  %v3597_v13 = vrot.slane %v3588_v34, %v7741_v57 }
 0xc31   :  { %6630 = vmatprep.subr.bf16.mxu0 %v8135_v63  ;;  %6658 = vmatprep.subr.bf16.mxu1 %v7263_v52 }
 0xc34   :  { %6632 = vmatpush1.bf16.msra.mxu0 %v8138_v60  ;;  %6660 = vmatpush3.bf16.msra.mxu1 %v8141_v62  ;;  %v6795_v62 = vadd.f32 %v3597_v13, %v7751_v54  ;;  %v4041_v13 = vld [vmem:[#allocation12 + $0xb8] sm:$0xff] }
 0xc35   :  { %6634 = vmatprep.subr.bf16.mxu0 %v8145_v0  ;;  %6661 = vmatprep.subr.bf16.mxu1 %v7263_v52 }
 0xc38   :  { %6636 = vmatpush1.bf16.msra.mxu0 %v8148_v6  ;;  %6663 = vmatpush3.bf16.msra.mxu1 %v8150_v16 }
 0xc39   :  { %6638 = vmatprep.subr.bf16.mxu0 %v8153_v10  ;;  %6664 = vmatprep.subr.bf16.mxu1 %v7263_v52 }
 0xc3c   :  { %6640 = vmatpush1.bf16.msra.mxu0 %v8156_v8  ;;  %6666 = vmatpush3.bf16.msra.mxu1 %v8160_v51 }
 0xc3d   :  { %6642 = vmatprep.subr.bf16.mxu0 %v8162_v9  ;;  %6667 = vmatprep.subr.bf16.mxu1 %v7263_v52 }
 0xc40   :  { %6644 = vmatpush1.bf16.msra.mxu0 %v8166_v48  ;;  %6669 = vmatpush3.bf16.msra.mxu1 %v8170_v26 }
 0xc41   :  { %6646 = vmatprep.subr.bf16.mxu0 %v8172_v31  ;;  %6670 = vmatprep.subr.bf16.mxu1 %v7263_v52  ;;  %v3593_v52 = vrot.slane %v3588_v34, %v7738_v49  ;;  %v3601_v31 = vrot.slane %v3588_v34, %v7709_v18  ;;  %v4039_v34 = vld [vmem:[#allocation12 + $0xa8] sm:$0xff] }
 0xc43   :  { %v6793_v30 = vadd.f32 %v3593_v52, %v7748_v4  ;;  %v4037_v52 = vld [vmem:[#allocation12 + $0x98] sm:$0xff] }
 0xc44   :  { %6648 = vmatpush1.bf16.msra.mxu0 %v8176_v33  ;;  %6672 = vmatpush3.bf16.msra.mxu1 %v8180_v35 }
 0xc45   :  { %6674 = vmatprep.subr.bf16.mxu1 %v6673_v36  ;;  %6706 = vmatprep.subr.bf16.mxu0 %v8332_v38  ;;  %v4032_v36 = vld [vmem:[#allocation12 + $0x70] sm:$0xff] }
 0xcfa   :  { %v3671_v63 = vpop.f32.mrb[44].mxu0  ;;  %v3742_v60 = vpop.f32.mrb[58].mxu1 }
 0xcfb   :  { %v6794_v0 = vadd.f32 %v6793_v30, %v3671_v63  ;;  %v3673_v6 = vpop.f32.mrb[45].mxu0  ;;  %v5781_v16 = vpop.f32.mrb[59].mxu1  ;;  %v3743_v35 = vadd.f32 %v3742_v60, %v3601_v31  ;;  %v8354_v63 = vpack.c.bf16 %v4032_v36, %v4028_v1  ;;  %v4034_v60 = vld [vmem:[#allocation12 + $0x80] sm:$0xff] }
 0xcfc   :  { %v6796_v10 = vadd.f32 %v6795_v62, %v3673_v6  ;;  %v4038_v62 = vld [vmem:[#allocation12 + $0xa0] sm:$0xff]  ;;  %v8357_v6 = vpack.c.bf16 %v4041_v13, %v4037_v52  ;;  %v4036_v16 = vld [vmem:[#allocation12 + $0x90] sm:$0xff] }
 0xcfd   :  { %v4923_v8 = vmul.f32 -1.442695, %v6794_v0  ;;  %v6681_v0 = vpack.c.bf16 %v4039_v34, %v4035_v29  ;;  %v4058_v29 = vld [vmem:[#allocation12 + $0x140] sm:$0xff] }
 0xcfe   :  { %v4924_v51 = vmul.f32 -1.442695, %v6796_v10  ;;  %v4040_v10 = vld [vmem:[#allocation12 + $0xb0] sm:$0xff]  ;;  %v4062_v34 = vld [vmem:[#allocation12 + $0x160] sm:$0xff] }
 0xcff   :  { %6945 = vpow2.f32 %v4923_v8  ;;  %v4043_v8 = vld [vmem:[#allocation12 + $0xc8] sm:$0xff]  ;;  %v8362_v31 = vpack.c.bf16 %v4040_v10, %v4036_v16  ;;  %v4069_v16 = vld [vmem:[#allocation12 + $0x198] sm:$0xff] }
 0xd00   :  { %6947 = vpow2.f32 %v4924_v51  ;;  %v4047_v51 = vld [vmem:[#allocation12 + $0xe8] sm:$0xff]  ;;  %v4073_v10 = vld [vmem:[#allocation12 + $0x1b8] sm:$0xff] }
 0xd09   :  { %v6946_v9 = vpop.eup %6945 }
 0xd0a   :  { %v3750_v48 = vadd.f32 1.0, %v6946_v9  ;;  %v6948_v26 = vpop.eup %6947  ;;  %v4045_v9 = vld [vmem:[#allocation12 + $0xd8] sm:$0xff] }
 0xd0b   :  { %v3757_v33 = vadd.f32 1.0, %v6948_v26  ;;  %v6683_v26 = vpack.c.bf16 %v4038_v62, %v4034_v60  ;;  %v4064_v60 = vld [vmem:[#allocation12 + $0x170] sm:$0xff]  ;;  %v4067_v62 = vld [vmem:[#allocation12 + $0x188] sm:$0xff] }
 0xd0c   :  { %6949 = vrcp.f32 %v3750_v48  ;;  %v4049_v48 = vld [vmem:[#allocation12 + $0xf8] sm:$0xff] }
 0xd0d   :  { %6951 = vrcp.f32 %v3757_v33  ;;  %v4042_v33 = vld [vmem:[#allocation12 + $0xc0] sm:$0xff] }
 0xd16   :  { %v6950_v44 = vpop.eup %6949 }
 0xd17   :  { %v3760_v32 = vmul.f32 %v6950_v44, %v3743_v35  ;;  %v6952_v20 = vpop.eup %6951  ;;  %v4046_v35 = vld [vmem:[#allocation12 + $0xe0] sm:$0xff]  ;;  %v6685_v44 = vpack.c.bf16 %v4047_v51, %v4043_v8  ;;  %v6695_v8 = vpack.c.bf16 %v4062_v34, %v4058_v29 }
 0xd18   :  { %v3763_v42 = vsub.f32 1.0, %v6952_v20  ;;  %v3765_v59 = vmul.f32 %v6952_v20, %v8295_v25  ;;  %v4048_v20 = vld [vmem:[#allocation12 + $0xf0] sm:$0xff]  ;;  %v6687_v7 = vpack.c.bf16 %v4046_v35, %v4042_v33  ;;  %v6729_v33 = vpack.c.bf16 %v4073_v10, %v4069_v16 }
 0xd19   :  { %v3761_v2 = vadd.f32 %v3760_v32, %v7733_v46  ;;  %v4030_v46 = vld [vmem:[#allocation12 + $0x60] sm:$0xff]  ;;  %v8365_v32 = vpack.c.bf16 %v4049_v48, %v4045_v9  ;;  %v4068_v35 = vld [vmem:[#allocation12 + $0x190] sm:$0xff] }
 0xd1a   :  { %v6679_v30 = vpack.c.bf16 %v4030_v46, %v4026_v53  ;;  %v4063_v53 = vld [vmem:[#allocation12 + $0x168] sm:$0xff]  ;;  %v4061_v46 = vld [vmem:[#allocation12 + $0x158] sm:$0xff]  ;;  %v4066_v9 = vld [vmem:[#allocation12 + $0x180] sm:$0xff] }
 0xd1b   :  { %6953 = vtanh.f32 %v3761_v2  ;;  %v4044_v2 = vld [vmem:[#allocation12 + $0xd0] sm:$0xff]  ;;  %v4070_v48 = vld [vmem:[#allocation12 + $0x1a0] sm:$0xff] }
 0xd1c   :  { %v8368_v56 = vpack.c.bf16 %v4048_v20, %v4044_v2  ;;  %v4075_v2 = vld [vmem:[#allocation12 + $0x1c8] sm:$0xff] }
 0xd1d   :  { %v4079_v20 = vld [vmem:[#allocation12 + $0x1e8] sm:$0xff] }
 0xd25   :  { %v6954_v19 = vpop.eup %6953 }
 0xd26   :  { %v3764_v43 = vmul.f32 %v6954_v19, %v3763_v42  ;;  %v4053_v42 = vld [vmem:[#allocation12 + $0x118] sm:$0xff]  ;;  %v4050_v19 = vld [vmem:[#allocation12 + $0x100] sm:$0xff] }
 0xd27   :  { %v8371_v41 = vpack.c.bf16 %v4057_v37, %v4053_v42  ;;  %v6691_v1 = vpack.c.bf16 %v4054_v5, %v4050_v19  ;;  %v6699_v42 = vpack.c.bf16 %v4070_v48, %v4066_v9  ;;  %v6701_v19 = vpack.c.bf16 %v4079_v20, %v4075_v2 }
 0xd28   :  { %v8347_v40 = vadd.f32 %v3765_v59, %v3764_v43  ;;  %v4052_v43 = vld [vmem:[#allocation12 + $0x110] sm:$0xff]  ;;  %v6733_v5 = vpack.c.bf16 %v4081_v23, %v4077_v14 }
 0xd29   :  { %v4056_v59 = vld [vmem:[#allocation12 + $0x130] sm:$0xff] }
 0xd2a   :  { %3906 = vmatmul.mubr.f32.vlgmr.msra.gmra.mrb[46].mxu0 %v8347_v40  ;;  %5815 = vmatmul.mubr.f32.vlgmr.msra.gmra.mrb[60].mxu1 %v8347_v40  ;;  %v8374_v36 = vpack.c.bf16 %v4056_v59, %v4052_v43  ;;  %v4076_v43 = vld [vmem:[#allocation12 + $0x1d0] sm:$0xff] }
 0xd2b   :  { %6676 = vmatpush1.bf16.msra.mxu1 %v6675_v12  ;;  %6708 = vmatpush1.bf16.msra.mxu0 %v8345_v24  ;;  %v4059_v12 = vld [vmem:[#allocation12 + $0x148] sm:$0xff]  ;;  %v4080_v59 = vld [vmem:[#allocation12 + $0x1f0] sm:$0xff] }
 0xd2c   :  { %6678 = vmatprep.subr.bf16.mxu1 %v6677_v45  ;;  %6710 = vmatprep.subr.bf16.mxu0 %v8349_v61  ;;  %v4065_v45 = vld [vmem:[#allocation12 + $0x178] sm:$0xff]  ;;  %v6693_v52 = vpack.c.bf16 %v4063_v53, %v4059_v12  ;;  %v6735_v53 = vpack.c.bf16 %v4080_v59, %v4076_v43 }
 0xd2d   :  { %4168 = vmatprep.mubr.f32.mxu1 %v8948_v11  ;;  %4305 = vmatprep.mubr.f32.mxu0 %v8948_v11  ;;  %v8377_v13 = vpack.c.bf16 %v4065_v45, %v4061_v46 }
 0xd2f   :  { %6680 = vmatpush1.bf16.msra.mxu1 %v6679_v30  ;;  %6712 = vmatpush1.bf16.msra.mxu0 %v8354_v63  ;;  %v4060_v30 = vld [vmem:[#allocation12 + $0x150] sm:$0xff] }
 0xd30   :  { %6682 = vmatprep.subr.bf16.mxu1 %v6681_v0  ;;  %6714 = vmatprep.subr.bf16.mxu0 %v8357_v6  ;;  %v4071_v0 = vld [vmem:[#allocation12 + $0x1a8] sm:$0xff]  ;;  %v8380_v51 = vpack.c.bf16 %v4064_v60, %v4060_v30 }
 0xd33   :  { %6684 = vmatpush1.bf16.msra.mxu1 %v6683_v26  ;;  %6716 = vmatpush1.bf16.msra.mxu0 %v8362_v31  ;;  %v6697_v26 = vpack.c.bf16 %v4071_v0, %v4067_v62 }
 0xd34   :  { %6686 = vmatprep.subr.bf16.mxu1 %v6685_v44  ;;  %6718 = vmatprep.subr.bf16.mxu0 %v8365_v32  ;;  %v4072_v44 = vld [vmem:[#allocation12 + $0x1b0] sm:$0xff] }
 0xd35   :  { %v6731_v37 = vpack.c.bf16 %v4072_v44, %v4068_v35 }
 0xd37   :  { %6688 = vmatpush1.bf16.msra.mxu1 %v6687_v7  ;;  %6720 = vmatpush1.bf16.msra.mxu0 %v8368_v56  ;;  %v4074_v7 = vld [vmem:[#allocation12 + $0x1c0] sm:$0xff] }
 0xd38   :  { %6690 = vmatprep.subr.bf16.mxu1 %v6689_v21  ;;  %6722 = vmatprep.subr.bf16.mxu0 %v8371_v41  ;;  %v4078_v21 = vld [vmem:[#allocation12 + $0x1e0] sm:$0xff] }
 0xd39   :  { %v6703_v12 = vpack.c.bf16 %v4078_v21, %v4074_v7 }
 0xd3b   :  { %6692 = vmatpush1.bf16.msra.mxu1 %v6691_v1  ;;  %6724 = vmatpush1.bf16.msra.mxu0 %v8374_v36 }
 0xd3c   :  { %6694 = vmatprep.subr.bf16.mxu1 %v6693_v52  ;;  %6726 = vmatprep.subr.bf16.mxu0 %v8377_v13 }
 0xd3f   :  { %6696 = vmatpush1.bf16.msra.mxu1 %v6695_v8  ;;  %6728 = vmatpush1.bf16.msra.mxu0 %v8380_v51 }
 0xd40   :  { %6698 = vmatprep.subr.bf16.mxu1 %v6697_v26  ;;  %6730 = vmatprep.subr.bf16.mxu0 %v6729_v33 }
 0xd43   :  { %6700 = vmatpush1.bf16.msra.mxu1 %v6699_v42  ;;  %6732 = vmatpush1.bf16.msra.mxu0 %v6731_v37 }
 0xd44   :  { %6702 = vmatprep.subr.bf16.mxu1 %v6701_v19  ;;  %6734 = vmatprep.subr.bf16.mxu0 %v6733_v5 }
 0xd47   :  { %6704 = vmatpush1.bf16.msra.mxu1 %v6703_v12  ;;  %6736 = vmatpush1.bf16.msra.mxu0 %v6735_v53 }
 0xd48   :  { %6737 = vmatprep.subr.bf16.mxu1 %v8332_v38 }
 0xd4a   :  { %4169 = vmatmul.mubr.f32.vlgmr.msra.gmra.mrb[62].mxu1 %v7758_v22  ;;  %4306 = vmatmul.mubr.f32.vlgmr.msra.gmra.mrb[50].mxu0 %v7758_v22  ;;  %v3824_v22 = vld [vmem:[%s8908_s8] sm:$0x7] }
 0xd4b   :  { %4174 = vmatprep.mubr.f32.mxu1 %v8948_v11  ;;  %4311 = vmatprep.mubr.f32.mxu0 %v8948_v11 }
 0xd4c   :  { %6745 = vmatpush1.bf16.msra.mxu1 %v8345_v24 }
 0xd4d   :  { %6738 = vmatprep.subr.bf16.mxu1 %v8349_v61 }
 0xd4e   :  { %4175 = vmatmul.mubr.f32.gmra.mrb[64].mxu1 %v7807_v28  ;;  %4312 = vmatmul.mubr.f32.gmra.mrb[52].mxu0 %v7807_v28  ;;  %v3829_v28 = vrot.slane %v3824_v22, %v7738_v49 }
 0xd4f   :  { %4180 = vmatprep.mubr.f32.mxu1 %v8948_v11  ;;  %4317 = vmatprep.mubr.f32.mxu0 %v8948_v11 }
 0xd50   :  { %6746 = vmatpush1.bf16.msra.mxu1 %v8354_v63 }
 0xd51   :  { %6739 = vmatprep.subr.bf16.mxu1 %v8357_v6 }
 0xd52   :  { %4181 = vmatmul.mubr.f32.gmra.mrb[66].mxu1 %v7855_v15  ;;  %4318 = vmatmul.mubr.f32.gmra.mrb[54].mxu0 %v7855_v15  ;;  %v3833_v15 = vrot.slane %v3824_v22, %v7741_v57 }
 0xd53   :  { %4186 = vmatprep.mubr.f32.mxu1 %v8948_v11  ;;  %4323 = vmatprep.mubr.f32.mxu0 %v8948_v11 }
 0xd54   :  { %6747 = vmatpush1.bf16.msra.mxu1 %v8362_v31 }
 0xd55   :  { %6740 = vmatprep.subr.bf16.mxu1 %v8365_v32  ;;  %v3837_v32 = vrot.slane %v3824_v22, %v7709_v18 }
 0xd56   :  { %4187 = vmatmul.mubr.f32.gmra.mrb[68].mxu1 %v7953_v27  ;;  %4324 = vmatmul.mubr.f32.gmra.mrb[56].mxu0 %v7953_v27  ;;  %v6797_v27 = vadd.f32 %v3829_v28, %v7748_v4  ;;  %v4082_v4 = vld [vmem:[%s8910_s10] sm:$0xf]  ;;  %s7265_s10 = smov [#allocation14]  }
 0xd57   :  { %4192 = vmatprep.mubr.f32.mxu1 %v8948_v11  ;;  %4329 = vmatprep.mubr.f32.mxu0 %v8948_v11  ;;  %v8449_v45 = vrot.slane %v4082_v4, %v7738_v49  ;;  %v8452_v1 = vrot.slane %v4082_v4, %v7741_v57  ;;  %v8457_v52 = vrot.slane %v4082_v4, %v7709_v18  ;;  %s4792_s6 = sshll.u32 %s7265_s10, 4  ;;  %s4793_s6 = int_to_ptr.vmem [resolvable:$true] %s4792_s6 }
 0xd58   :  { %6748 = vmatpush1.bf16.msra.mxu1 %v8368_v56  ;;  %s7195_s19 = scalar_lea.vmem %s4793_s6, 128  ;;  %p7200_p13 = scmp.lt.s32.totalorder %s4793_s6, %s4793_s6 }
 0xd59   :  { %6741 = vmatprep.subr.bf16.mxu1 %v8371_v41  ;;  %p7196_p12 = scmp.ne.s32.totalorder %s4793_s6, %s7195_s19  ;;  %p7201_p0 = scmp.lt.s32.totalorder %s7195_s19, %s7195_s19 }
 0xd5a   :  { %4193 = vmatmul.mubr.f32.gmra.mrb[70].mxu1 %v8002_v39  ;;  %4330 = vmatmul.mubr.f32.gmra.mrb[58].mxu0 %v8002_v39 }
 0xd5b   :  { %4198 = vmatprep.mubr.f32.mxu1 %v8948_v11  ;;  %4335 = vmatprep.mubr.f32.mxu0 %v8948_v11  ;;  %p7202_p1 = por %p7201_p0, %p7200_p13 }
 0xd5c   :  { %6749 = vmatpush1.bf16.msra.mxu1 %v8374_v36  ;;  %v4098_v36 = vsub.s32 3, %v7706_v17 }
 0xd5d   :  { %6742 = vmatprep.subr.bf16.mxu1 %v8377_v13  ;;  %p7203_p2 = pnand %p7202_p1, %p7196_p12 }
 0xd5e   :  { %4199 = vmatmul.mubr.f32.gmra.mrb[72].mxu1 %v8051_v3  ;;  %4336 = vmatmul.mubr.f32.gmra.mrb[60].mxu0 %v8051_v3  ;;  %v8465_v57 = vrot.slane %v4082_v4, %v4098_v36 }
 0xd5f   :  { %4204 = vmatprep.mubr.f32.mxu1 %v8948_v11  ;;  %4341 = vmatprep.mubr.f32.mxu0 %v8948_v11 }
 0xd60   :  { %6750 = vmatpush1.bf16.msra.mxu1 %v8380_v51 }
 0xd61   :  { %6743 = vmatprep.subr.bf16.mxu1 %v6729_v33 }
 0xd62   :  { %4205 = vmatmul.mubr.f32.gmra.mrb[74].mxu1 %v8099_v58  ;;  %4342 = vmatmul.mubr.f32.gmra.mrb[62].mxu0 %v8099_v58  ;;  %v6799_v58 = vadd.f32 %v3833_v15, %v7751_v54 }
 0xd63   :  { %4210 = vmatprep.mubr.f32.mxu1 %v8948_v11  ;;  %4347 = vmatprep.mubr.f32.mxu0 %v8948_v11 }
 0xd64   :  { %6751 = vmatpush1.bf16.msra.mxu1 %v6731_v37 }
 0xd65   :  { %6744 = vmatprep.subr.bf16.mxu1 %v6733_v5 }
 0xd66   :  { %4211 = vmatmul.mubr.f32.gmra.mrb[76].mxu1 %v8197_v50  ;;  %4348 = vmatmul.mubr.f32.gmra.mrb[64].mxu0 %v8197_v50 }
 0xd67   :  { %4216 = vmatprep.mubr.f32.mxu1 %v8948_v11  ;;  %4353 = vmatprep.mubr.f32.mxu0 %v8948_v11 }
 0xd68   :  { %6752 = vmatpush1.bf16.msra.mxu1 %v6735_v53 }
 0xd6a   :  { %4217 = vmatmul.mubr.f32.gmra.mrb[78].mxu1 %v8246_v55  ;;  %4354 = vmatmul.mubr.f32.gmra.mrb[66].mxu0 %v8246_v55 }
 0xd6b   :  { %4222 = vmatprep.mubr.f32.mxu1 %v8948_v11  ;;  %4359 = vmatprep.mubr.f32.mxu0 %v8948_v11 }
 0xd6e   :  { %4223 = vmatmul.mubr.f32.gmra.mrb[80].mxu1 %v8295_v25  ;;  %4360 = vmatmul.mubr.f32.gmra.mrb[68].mxu0 %v8295_v25 }
 0xd6f   :  { %4228 = vmatprep.mubr.f32.mxu1 %v8948_v11 }
 0xd72   :  { %4229 = vmatmul.mubr.f32.gmra.mrb[82].mxu1 %v8347_v40 }
 0xd73   :  { %4234 = vmatprep.mubr.f32.mxu1 %v8948_v11 }
 0xdfd   :  { %v3907_v39 = vpop.f32.mrb[46].mxu0  ;;  %v3978_v3 = vpop.f32.mrb[60].mxu1 }
 0xdfe   :  { %v6798_v50 = vadd.f32 %v6797_v27, %v3907_v39  ;;  %v3909_v55 = vpop.f32.mrb[47].mxu0  ;;  %v5816_v25 = vpop.f32.mrb[61].mxu1  ;;  %v3979_v54 = vadd.f32 %v3978_v3, %v3837_v32 }
 0xdff   :  { %v6800_v38 = vadd.f32 %v6799_v58, %v3909_v55 }
 0xe00   :  { %v4925_v24 = vmul.f32 -1.442695, %v6798_v50 }
 0xe01   :  { %v4926_v61 = vmul.f32 -1.442695, %v6800_v38 }
 0xe02   :  { %6955 = vpow2.f32 %v4925_v24 }
 0xe03   :  { %6957 = vpow2.f32 %v4926_v61 }
 0xe0c   :  { %v6956_v63 = vpop.eup %6955 }
 0xe0d   :  { %v3986_v6 = vadd.f32 1.0, %v6956_v63  ;;  %v6958_v31 = vpop.eup %6957 }
 0xe0e   :  { %v3993_v56 = vadd.f32 1.0, %v6958_v31 }
 0xe0f   :  { %6959 = vrcp.f32 %v3986_v6 }
 0xe10   :  { %6961 = vrcp.f32 %v3993_v56 }
 0xe19   :  { %v6960_v41 = vpop.eup %6959 }
 0xe1a   :  { %v3996_v46 = vmul.f32 %v6960_v41, %v3979_v54  ;;  %v6962_v26 = vpop.eup %6961 }
 0xe1b   :  { %v3999_v5 = vsub.f32 1.0, %v6962_v26  ;;  %v4001_v43 = vmul.f32 %v6962_v26, %v8347_v40 }
 0xe1c   :  { %v3997_v29 = vadd.f32 %v3996_v46, %v7735_v47 }
 0xe1d   :  { %v4170_v34 = vpop.f32.mrb[62].mxu1  ;;  %v4307_v13 = vpop.f32.mrb[50].mxu0 }
 0xe1e   :  { %6963 = vtanh.f32 %v3997_v29  ;;  %v8460_v30 = vadd.f32 %v4170_v34, %v8449_v45  ;;  %v4172_v60 = vpop.f32.mrb[63].mxu1  ;;  %v4309_v62 = vpop.f32.mrb[51].mxu0  ;;  %v8468_v17 = vadd.f32 %v4307_v13, %v8457_v52 }
 0xe1f   :  { %v8463_v49 = vadd.f32 %v4172_v60, %v8452_v1  ;;  %v8476_v51 = vadd.f32 %v4309_v62, %v8465_v57 }
 0xe21   :  { %v4378_v47 = vmax.f32 %v8460_v30, %v8463_v49  ;;  %v4176_v18 = vpop.f32.mrb[64].mxu1  ;;  %v4313_v0 = vpop.f32.mrb[52].mxu0 }
 0xe22   :  { %v8473_v16 = vadd.f32 %v4176_v18, %v8449_v45  ;;  %v4178_v10 = vpop.f32.mrb[65].mxu1  ;;  %v4315_v8 = vpop.f32.mrb[53].mxu0  ;;  %v8483_v33 = vadd.f32 %v4313_v0, %v8457_v52 }
 0xe23   :  { %v8479_v9 = vadd.f32 %v4178_v10, %v8452_v1  ;;  %v4379_v48 = vmax.f32 %v4378_v47, %v8468_v17  ;;  %v8492_v37 = vadd.f32 %v4315_v8, %v8465_v57 }
 0xe24   :  { %8949 = vst [vmem:[#allocation21_spill] sm:$0xff] %v8473_v16  ;;  %8951 = vst [vmem:[#allocation23_spill] sm:$0xff] %v8483_v33 }
 0xe25   :  { %8950 = vst [vmem:[#allocation22_spill] sm:$0xff] %v8479_v9  ;;  %v4383_v35 = vmax.f32 %v8473_v16, %v8479_v9  ;;  %v4182_v44 = vpop.f32.mrb[66].mxu1  ;;  %v4319_v2 = vpop.f32.mrb[54].mxu0  ;;  %v4380_v20 = vmax.f32 %v4379_v48, %v8476_v51  ;;  %8952 = vst [vmem:[#allocation24_spill] sm:$0xff] %v8492_v37 }
 0xe26   :  { %v8489_v14 = vadd.f32 %v4182_v44, %v8449_v45  ;;  %v4184_v23 = vpop.f32.mrb[67].mxu1  ;;  %v4321_v42 = vpop.f32.mrb[55].mxu0  ;;  %v8500_v59 = vadd.f32 %v4319_v2, %v8457_v52 }
 0xe27   :  { %v8495_v7 = vadd.f32 %v4184_v23, %v8452_v1  ;;  %4381 = vmax.xlane.f32.xlu0 %v4380_v20  ;;  %v4384_v19 = vmax.f32 %v4383_v35, %v8483_v33  ;;  %v8509_v58 = vadd.f32 %v4321_v42, %v8465_v57 }
 0xe28   :  { %v6964_v21 = vpop.eup %6963 }
 0xe29   :  { %v4388_v12 = vmax.f32 %v8489_v14, %v8495_v7  ;;  %v4188_v53 = vpop.f32.mrb[68].mxu1  ;;  %v4325_v22 = vpop.f32.mrb[56].mxu0  ;;  %v4385_v28 = vmax.f32 %v4384_v19, %v8492_v37  ;;  %v4000_v15 = vmul.f32 %v6964_v21, %v3999_v5 }
 0xe2a   :  { %v8506_v27 = vadd.f32 %v4188_v53, %v8449_v45  ;;  %v4190_v39 = vpop.f32.mrb[69].mxu1  ;;  %v4327_v3 = vpop.f32.mrb[57].mxu0  ;;  %v8516_v38 = vadd.f32 %v4325_v22, %v8457_v52 }
 0xe2b   :  { %v8512_v50 = vadd.f32 %v4190_v39, %v8452_v1  ;;  %4386 = vmax.xlane.f32.xlu1 %v4385_v28  ;;  %v4002_v55 = vadd.f32 %v4001_v43, %v4000_v15  ;;  %v4389_v25 = vmax.f32 %v4388_v12, %v8500_v59  ;;  %v8526_v4 = vadd.f32 %v4327_v3, %v8465_v57 }
 0xe2c   :  { %8953 = vst [vmem:[#allocation25_spill] sm:$0xff] %v8506_v27  ;;  %8955 = vst [vmem:[#allocation27_spill] sm:$0xff] %v8516_v38 }
 0xe2d   :  { %8954 = vst [vmem:[#allocation26_spill] sm:$0xff] %v8512_v50  ;;  %v4393_v24 = vmax.f32 %v8506_v27, %v8512_v50  ;;  %v4194_v61 = vpop.f32.mrb[70].mxu1  ;;  %v4331_v63 = vpop.f32.mrb[58].mxu0  ;;  %4235 = vmatmul.mubr.f32.gmra.mrb[84].mxu1 %v4002_v55  ;;  %4005 = vst [vmem:[#allocation14] sm:$0xff] %v4002_v55  ;;  %v4390_v6 = vmax.f32 %v4389_v25, %v8509_v58 }
 0xe2e   :  { %v8522_v31 = vadd.f32 %v4194_v61, %v8449_v45  ;;  %v4196_v32 = vpop.f32.mrb[71].mxu1  ;;  %v4333_v56 = vpop.f32.mrb[59].mxu0  ;;  %4365 = vmatprep.mubr.f32.mxu1 %v8948_v11  ;;  %8957 = vst [vmem:[#allocation29_spill] sm:$0xff] %v8526_v4  ;;  %v8533_v46 = vadd.f32 %v4331_v63, %v8457_v52 }
 0xe2f   :  { %v8529_v54 = vadd.f32 %v4196_v32, %v8452_v1  ;;  %4391 = vmax.xlane.f32.xlu0 %v4390_v6  ;;  %v4394_v41 = vmax.f32 %v4393_v24, %v8516_v38  ;;  %v8544_v18 = vadd.f32 %v4333_v56, %v8465_v57 }
 0xe30   :  { %8956 = vst [vmem:[#allocation28_spill] sm:$0xff] %v8522_v31  ;;  %8959 = vst [vmem:[#allocation31_spill] sm:$0xff] %v8533_v46 }
 0xe31   :  { %8958 = vst [vmem:[#allocation30_spill] sm:$0xff] %v8529_v54  ;;  %v4398_v36 = vmax.f32 %v8522_v31, %v8529_v54  ;;  %v4200_v29 = vpop.f32.mrb[72].mxu1  ;;  %v4337_v34 = vpop.f32.mrb[60].mxu0  ;;  %4366 = vmatmul.mubr.f32.vlgmr.msra.gmra.mrb[86].mxu1 %v8347_v40  ;;  %v4395_v13 = vmax.f32 %v4394_v41, %v8526_v4  ;;  %8961 = vst [vmem:[#allocation33_spill] sm:$0xff] %v8544_v18 }
 0xe32   :  { %v8540_v60 = vadd.f32 %v4200_v29, %v8449_v45  ;;  %v4202_v62 = vpop.f32.mrb[73].mxu1  ;;  %v4339_v47 = vpop.f32.mrb[61].mxu0  ;;  %4371 = vmatprep.mubr.f32.mxu1 %v8948_v11  ;;  %v8551_v40 = vadd.f32 %v4337_v34, %v8457_v52 }
 0xe33   :  { %v8547_v0 = vadd.f32 %v4202_v62, %v8452_v1  ;;  %4396 = vmax.xlane.f32.xlu0 %v4395_v13  ;;  %v4399_v10 = vmax.f32 %v4398_v36, %v8533_v46  ;;  %v8560_v20 = vadd.f32 %v4339_v47, %v8465_v57 }
 0xe34   :  { %8960 = vst [vmem:[#allocation32_spill] sm:$0xff] %v8540_v60  ;;  %8963 = vst [vmem:[#allocation35_spill] sm:$0xff] %v8551_v40 }
 0xe35   :  { %8962 = vst [vmem:[#allocation34_spill] sm:$0xff] %v8547_v0  ;;  %v4403_v8 = vmax.f32 %v8540_v60, %v8547_v0  ;;  %v4206_v48 = vpop.f32.mrb[74].mxu1  ;;  %v4343_v26 = vpop.f32.mrb[62].mxu0  ;;  %4372 = vmatmul.mubr.f32.gmra.mrb[88].mxu1 %v4002_v55  ;;  %v4400_v11 = vmax.f32 %v4399_v10, %v8544_v18  ;;  %8965 = vst [vmem:[#allocation37_spill] sm:$0xff] %v8560_v20 }
 0xe36   :  { %v8557_v35 = vadd.f32 %v4206_v48, %v8449_v45  ;;  %v4208_v44 = vpop.f32.mrb[75].mxu1  ;;  %v4345_v2 = vpop.f32.mrb[63].mxu0  ;;  %v8567_v19 = vadd.f32 %v4343_v26, %v8457_v52 }
 0xe37   :  { %v8563_v23 = vadd.f32 %v4208_v44, %v8452_v1  ;;  %4401 = vmax.xlane.f32.xlu1 %v4400_v11  ;;  %v4404_v42 = vmax.f32 %v4403_v8, %v8551_v40  ;;  %v8576_v15 = vadd.f32 %v4345_v2, %v8465_v57 }
 0xe38   :  { %8964 = vst [vmem:[#allocation36_spill] sm:$0xff] %v8557_v35  ;;  %8967 = vst [vmem:[#allocation39_spill] sm:$0xff] %v8567_v19 }
 0xe39   :  { %8966 = vst [vmem:[#allocation38_spill] sm:$0xff] %v8563_v23  ;;  %v4408_v5 = vmax.f32 %v8557_v35, %v8563_v23  ;;  %v4212_v21 = vpop.f32.mrb[76].mxu1  ;;  %v4349_v43 = vpop.f32.mrb[64].mxu0  ;;  %v4405_v12 = vmax.f32 %v4404_v42, %v8560_v20  ;;  %8969 = vst [vmem:[#allocation41_spill] sm:$0xff] %v8576_v15 }
 0xe3a   :  { %v8573_v53 = vadd.f32 %v4212_v21, %v8449_v45  ;;  %v4214_v22 = vpop.f32.mrb[77].mxu1  ;;  %v4351_v28 = vpop.f32.mrb[65].mxu0  ;;  %v8583_v55 = vadd.f32 %v4349_v43, %v8457_v52 }
 0xe3b   :  { %v8579_v39 = vadd.f32 %v4214_v22, %v8452_v1  ;;  %4406 = vmax.xlane.f32.xlu0 %v4405_v12  ;;  %v4409_v3 = vmax.f32 %v4408_v5, %v8567_v19  ;;  %v8592_v41 = vadd.f32 %v4351_v28, %v8465_v57 }
 0xe3c   :  { %8968 = vst [vmem:[#allocation40_spill] sm:$0xff] %v8573_v53  ;;  %8971 = vst [vmem:[#allocation43_spill] sm:$0xff] %v8583_v55 }
 0xe3d   :  { %8970 = vst [vmem:[#allocation42_spill] sm:$0xff] %v8579_v39  ;;  %v4413_v25 = vmax.f32 %v8573_v53, %v8579_v39  ;;  %v4218_v24 = vpop.f32.mrb[78].mxu1  ;;  %v4355_v61 = vpop.f32.mrb[66].mxu0  ;;  %v4410_v63 = vmax.f32 %v4409_v3, %v8576_v15  ;;  %8973 = vst [vmem:[#allocation45_spill] sm:$0xff] %v8592_v41 }
 0xe3e   :  { %v8589_v6 = vadd.f32 %v4218_v24, %v8449_v45  ;;  %v4220_v32 = vpop.f32.mrb[79].mxu1  ;;  %v4357_v56 = vpop.f32.mrb[67].mxu0  ;;  %v8599_v34 = vadd.f32 %v4355_v61, %v8457_v52 }
 0xe3f   :  { %v8595_v36 = vadd.f32 %v4220_v32, %v8452_v1  ;;  %4411 = vmax.xlane.f32.xlu1 %v4410_v63  ;;  %v4414_v29 = vmax.f32 %v4413_v25, %v8583_v55  ;;  %v8608_v11 = vadd.f32 %v4357_v56, %v8465_v57 }
 0xe40   :  { %8972 = vst [vmem:[#allocation44_spill] sm:$0xff] %v8589_v6 }
 0xe41   :  { %8974 = vst [vmem:[#allocation46_spill] sm:$0xff] %v8595_v36  ;;  %v4418_v13 = vmax.f32 %v8589_v6, %v8595_v36  ;;  %v4224_v62 = vpop.f32.mrb[80].mxu1  ;;  %v4361_v47 = vpop.f32.mrb[68].mxu0  ;;  %v4415_v10 = vmax.f32 %v4414_v29, %v8592_v41 }
 0xe42   :  { %v8605_v8 = vadd.f32 %v4224_v62, %v8449_v45  ;;  %v4226_v48 = vpop.f32.mrb[81].mxu1  ;;  %v4363_v26 = vpop.f32.mrb[69].mxu0  ;;  %v8615_v42 = vadd.f32 %v4361_v47, %v8457_v52 }
 0xe43   :  { %v8611_v44 = vadd.f32 %v4226_v48, %v8452_v1  ;;  %4416 = vmax.xlane.f32.xlu0 %v4415_v10  ;;  %v4419_v2 = vmax.f32 %v4418_v13, %v8599_v34  ;;  %v8625_v22 = vadd.f32 %v4363_v26, %v8465_v57 }
 0xe44   :  { %8975 = vst [vmem:[#allocation47_spill] sm:$0xff] %v8605_v8  ;;  %8977 = vst [vmem:[#allocation49_spill] sm:$0xff] %v8615_v42 }
 0xe45   :  { %8976 = vst [vmem:[#allocation48_spill] sm:$0xff] %v8611_v44  ;;  %v4423_v5 = vmax.f32 %v8605_v8, %v8611_v44  ;;  %v8619_v21 = vpop.f32.mrb[82].mxu1  ;;  %v4420_v43 = vmax.f32 %v4419_v2, %v8608_v11 }
 0xe46   :  { %v8622_v12 = vpop.f32.mrb[83].mxu1 }
 0xe47   :  { %4421 = vmax.xlane.f32.xlu1 %v4420_v43  ;;  %v4424_v28 = vmax.f32 %v4423_v5, %v8615_v42 }
 0xe49   :  { %v4425_v3 = vmax.f32 %v4424_v28, %v8625_v22 }
 0xe4b   :  { %4426 = vmax.xlane.f32.xlu0 %v4425_v3 }
 0xeb4   :  { %v8629_v25 = vpop.xlane.xlu0 %4381 }
 0xeb5   :  { %v4438_v24 = vsub.f32 %v8460_v30, %v8629_v25  ;;  %v4439_v61 = vsub.f32 %v8463_v49, %v8629_v25  ;;  %v4440_v32 = vsub.f32 %v8468_v17, %v8629_v25  ;;  %v4441_v56 = vsub.f32 %v8476_v51, %v8629_v25 }
 0xeb7   :  { %v4486_v13 = vmul.f32 1.442695, %v4438_v24  ;;  %v4488_v47 = vmul.f32 1.442695, %v4439_v61  ;;  %v4490_v48 = vmul.f32 1.442695, %v4440_v32 }
 0xeb8   :  { %v8635_v63 = vpop.xlane.xlu1 %4386  ;;  %v4492_v2 = vmul.f32 1.442695, %v4441_v56 }
 0xeb9   :  { %v4442_v62 = vsub.f32 %v8473_v16, %v8635_v63  ;;  %v4443_v10 = vsub.f32 %v8479_v9, %v8635_v63  ;;  %v4444_v26 = vsub.f32 %v8483_v33, %v8635_v63  ;;  %v4445_v5 = vsub.f32 %v8492_v37, %v8635_v63 }
 0xeba   :  { %6965 = vpow2.f32 %v4486_v13 }
 0xebb   :  { %v4494_v43 = vmul.f32 1.442695, %v4442_v62  ;;  %6967 = vpow2.f32 %v4488_v47  ;;  %v4496_v3 = vmul.f32 1.442695, %v4443_v10  ;;  %v4498_v32 = vmul.f32 1.442695, %v4444_v26 }
 0xebc   :  { %v8641_v29 = vpop.xlane.xlu0 %4391  ;;  %6969 = vpow2.f32 %v4490_v48  ;;  %v4500_v33 = vmul.f32 1.442695, %v4445_v5 }
 0xebd   :  { %v4446_v28 = vsub.f32 %v8489_v14, %v8641_v29  ;;  %v4447_v24 = vsub.f32 %v8495_v7, %v8641_v29  ;;  %v4448_v56 = vsub.f32 %v8500_v59, %v8641_v29  ;;  %6971 = vpow2.f32 %v4492_v2 }
 0xebe   :  { %v4449_v13 = vsub.f32 %v8509_v58, %v8641_v29  ;;  %6973 = vpow2.f32 %v4494_v43 }
 0xebf   :  { %v4502_v62 = vmul.f32 1.442695, %v4446_v28  ;;  %6975 = vpow2.f32 %v4496_v3  ;;  %v4504_v10 = vmul.f32 1.442695, %v4447_v24  ;;  %v4506_v26 = vmul.f32 1.442695, %v4448_v56 }
 0xec0   :  { %v8655_v61 = vpop.xlane.xlu0 %4396  ;;  %6977 = vpow2.f32 %v4498_v32  ;;  %v4508_v5 = vmul.f32 1.442695, %v4449_v13 }
 0xec1   :  { %8978 = vst [vmem:[#allocation50_spill] sm:$0xff] %v8655_v61  ;;  %v4450_v47 = vsub.f32 %v8506_v27, %v8655_v61  ;;  %v4451_v37 = vsub.f32 %v8512_v50, %v8655_v61  ;;  %v4452_v2 = vsub.f32 %v8516_v38, %v8655_v61  ;;  %6979 = vpow2.f32 %v4500_v33 }
 0xec2   :  { %v4453_v43 = vsub.f32 %v8526_v4, %v8655_v61  ;;  %6981 = vpow2.f32 %v4502_v62 }
 0xec3   :  { %v4510_v28 = vmul.f32 1.442695, %v4450_v47  ;;  %6983 = vpow2.f32 %v4504_v10  ;;  %v4512_v24 = vmul.f32 1.442695, %v4451_v37  ;;  %v4514_v38 = vmul.f32 1.442695, %v4452_v2 }
 0xec4   :  { %v8665_v48 = vpop.xlane.xlu1 %4401  ;;  %v6966_v56 = vpop.eup %6965  ;;  %6985 = vpow2.f32 %v4506_v26  ;;  %v4516_v62 = vmul.f32 1.442695, %v4453_v43 }
 0xec5   :  { %8979 = vst [vmem:[#allocation51_spill] sm:$0xff] %v8665_v48  ;;  %v4454_v3 = vsub.f32 %v8522_v31, %v8665_v48  ;;  %v4455_v50 = vsub.f32 %v8529_v54, %v8665_v48  ;;  %v4456_v33 = vsub.f32 %v8533_v46, %v8665_v48  ;;  %v6968_v13 = vpop.eup %6967  ;;  %6987 = vpow2.f32 %v4508_v5 }
 0xec6   :  { %v4457_v47 = vsub.f32 %v8544_v18, %v8665_v48  ;;  %v6970_v4 = vpop.eup %6969  ;;  %6989 = vpow2.f32 %v4510_v28 }
 0xec7   :  { %v4518_v37 = vmul.f32 1.442695, %v4454_v3  ;;  %v8683_v27 = vpop.eup %6971  ;;  %6991 = vpow2.f32 %v4512_v24  ;;  %v4520_v26 = vmul.f32 1.442695, %v4455_v50  ;;  %v4522_v43 = vmul.f32 1.442695, %v4456_v33 }
 0xec8   :  { %v8675_v32 = vpop.xlane.xlu0 %4406  ;;  %v6974_v5 = vpop.eup %6973  ;;  %6993 = vpow2.f32 %v4514_v38  ;;  %v4524_v3 = vmul.f32 1.442695, %v4457_v47 }
 0xec9   :  { %8980 = vst [vmem:[#allocation52_spill] sm:$0xff] %v8675_v32  ;;  %v4458_v10 = vsub.f32 %v8540_v60, %v8675_v32  ;;  %v4459_v2 = vsub.f32 %v8547_v0, %v8675_v32  ;;  %v4460_v18 = vsub.f32 %v8551_v40, %v8675_v32  ;;  %v6976_v28 = vpop.eup %6975  ;;  %6995 = vpow2.f32 %v4516_v62 }
 0xeca   :  { %v4461_v60 = vsub.f32 %v8560_v20, %v8675_v32  ;;  %v8693_v54 = vpop.eup %6977  ;;  %6997 = vpow2.f32 %v4518_v37  ;;  %v8705_v20 = vadd.f32 %v8619_v21, %v8449_v45  ;;  %v4587_v9 = vadd.f32 %v6976_v28, %v6974_v5 }
 0xecb   :  { %v4526_v50 = vmul.f32 1.442695, %v4458_v10  ;;  %v8699_v38 = vpop.eup %6979  ;;  %6999 = vpow2.f32 %v4520_v26  ;;  %v4528_v33 = vmul.f32 1.442695, %v4459_v2  ;;  %v4530_v37 = vmul.f32 1.442695, %v4460_v18 }
 0xecc   :  { %v8687_v46 = vpop.xlane.xlu1 %4411  ;;  %v6982_v47 = vpop.eup %6981  ;;  %7001 = vpow2.f32 %v4522_v43  ;;  %v8713_v26 = vadd.f32 %v8622_v12, %v8452_v1  ;;  %v4532_v2 = vmul.f32 1.442695, %v4461_v60  ;;  %v4582_v43 = vadd.f32 %v6968_v13, %v6966_v56 }
 0xecd   :  { %v4462_v24 = vsub.f32 %v8557_v35, %v8687_v46  ;;  %v4463_v62 = vsub.f32 %v8563_v23, %v8687_v46  ;;  %v4464_v10 = vsub.f32 %v8567_v19, %v8687_v46  ;;  %v6984_v35 = vpop.eup %6983  ;;  %7003 = vpow2.f32 %v4524_v3 }
 0xece   :  { %v8717_v32 = vpop.eup %6985  ;;  %7005 = vpow2.f32 %v4526_v50  ;;  %v4428_v56 = vmax.f32 %v8705_v20, %v8713_v26 }
 0xecf   :  { %v4534_v21 = vmul.f32 1.442695, %v4462_v24  ;;  %v8721_v19 = vpop.eup %6987  ;;  %7007 = vpow2.f32 %v4528_v33  ;;  %v4536_v31 = vmul.f32 1.442695, %v4463_v62  ;;  %v4538_v60 = vmul.f32 1.442695, %v4464_v10 }
 0xed0   :  { %v8697_v0 = vpop.xlane.xlu0 %4416  ;;  %v8725_v3 = vpop.eup %6989  ;;  %7009 = vpow2.f32 %v4530_v37  ;;  %v4465_v37 = vsub.f32 %v8576_v15, %v8687_v46 }
 0xed1   :  { %8981 = vst [vmem:[#allocation53_spill] sm:$0xff] %v8697_v0  ;;  %v4466_v23 = vsub.f32 %v8573_v53, %v8697_v0  ;;  %v4467_v18 = vsub.f32 %v8579_v39, %v8697_v0  ;;  %v8731_v61 = vpop.eup %6991  ;;  %7011 = vpow2.f32 %v4532_v2  ;;  %v4583_v39 = vadd.f32 %v6970_v4, %v4582_v43 }
 0xed2   :  { %v8735_v62 = vpop.eup %6993  ;;  %7013 = vpow2.f32 %v4534_v21 }
 0xed3   :  { %v4542_v13 = vmul.f32 1.442695, %v4466_v23  ;;  %v4544_v10 = vmul.f32 1.442695, %v4467_v18  ;;  %7015 = vpow2.f32 %v4536_v31  ;;  %v4468_v23 = vsub.f32 %v8583_v55, %v8697_v0 }
 0xed4   :  { %v8709_v40 = vpop.xlane.xlu1 %4421  ;;  %7017 = vpow2.f32 %v4538_v60 }
 0xed5   :  { %v4470_v12 = vsub.f32 %v8589_v6, %v8709_v40  ;;  %v4471_v53 = vsub.f32 %v8595_v36, %v8709_v40  ;;  %v8739_v36 = vpop.eup %6995  ;;  %7019 = vpow2.f32 %v4542_v13 }
 0xed6   :  { %v6998_v16 = vpop.eup %6997  ;;  %7021 = vpow2.f32 %v4544_v10 }
 0xed7   :  { %v4550_v6 = vmul.f32 1.442695, %v4470_v12  ;;  %v4552_v2 = vmul.f32 1.442695, %v4471_v53  ;;  %v7000_v18 = vpop.eup %6999  ;;  %v4540_v12 = vmul.f32 1.442695, %v4465_v37  ;;  %v4472_v53 = vsub.f32 %v8599_v34, %v8709_v40 }
 0xed8   :  { %v8729_v50 = vpop.xlane.xlu0 %4426  ;;  %v7002_v43 = vpop.eup %7001 }
 0xed9   :  { %v4474_v48 = vsub.f32 %v8605_v8, %v8729_v50  ;;  %v4475_v15 = vsub.f32 %v8611_v44, %v8729_v50  ;;  %v8761_v13 = vpop.eup %7003  ;;  %7023 = vpow2.f32 %v4550_v6  ;;  %v4546_v44 = vmul.f32 1.442695, %v4468_v23 }
 0xeda   :  { %7025 = vpow2.f32 %v4552_v2 }
 0xedb   :  { %v4560_v37 = vmul.f32 1.442695, %v4475_v15  ;;  %7027 = vpow2.f32 %v4540_v12  ;;  %v4476_v15 = vsub.f32 %v8615_v42, %v8729_v50 }
 0xf00   :  { %v4236_v24 = vpop.f32.mrb[84].mxu1 }
 0xf01   :  { %v4238_v33 = vpop.f32.mrb[85].mxu1  ;;  %v8748_v4 = vadd.f32 %v4236_v24, %v8449_v45  ;;  %v4558_v45 = vmul.f32 1.442695, %v4474_v48  ;;  %v4592_v24 = vadd.f32 %v6984_v35, %v6982_v47 }
 0xf02   :  { %v8751_v31 = vadd.f32 %v4238_v33, %v8452_v1  ;;  %v7006_v33 = vpop.eup %7005 }
 0xf03   :  { %v7008_v8 = vpop.eup %7007  ;;  %7029 = vpow2.f32 %v4558_v45  ;;  %v4593_v12 = vadd.f32 %v8717_v32, %v4592_v24 }
 0xf04   :  { %v4367_v21 = vpop.f32.mrb[86].mxu1  ;;  %v4433_v55 = vmax.f32 %v8748_v4, %v8751_v31  ;;  %v7010_v47 = vpop.eup %7009  ;;  %7031 = vpow2.f32 %v4560_v37 }
 0xf05   :  { %v8754_v5 = vadd.f32 %v4367_v21, %v8457_v52  ;;  %v4369_v28 = vpop.f32.mrb[87].mxu1  ;;  %v4469_v21 = vsub.f32 %v8592_v41, %v8697_v0  ;;  %v7012_v2 = vpop.eup %7011  ;;  %v4584_v41 = vadd.f32 %v8683_v27, %v4583_v39  ;;  %7033 = vpow2.f32 %v4546_v44 }
 0xf06   :  { %v8759_v60 = vadd.f32 %v4369_v28, %v8465_v57  ;;  %v4473_v28 = vsub.f32 %v8608_v11, %v8709_v40  ;;  %v7014_v0 = vpop.eup %7013  ;;  %v4477_v27 = vsub.f32 %v8625_v22, %v8729_v50  ;;  %v4607_v44 = vadd.f32 %v7008_v8, %v7006_v33 }
 0xf07   :  { %v4429_v1 = vmax.f32 %v4428_v56, %v8754_v5  ;;  %v4554_v56 = vmul.f32 1.442695, %v4472_v53  ;;  %v4597_v53 = vadd.f32 %v8731_v61, %v8725_v3  ;;  %v7016_v42 = vpop.eup %7015 }
 0xf08   :  { %v4373_v10 = vpop.f32.mrb[88].mxu1 }
 0xf09   :  { %v8771_v6 = vadd.f32 %v4373_v10, %v8457_v52  ;;  %v4375_v48 = vpop.f32.mrb[89].mxu1  ;;  %v4430_v35 = vmax.f32 %v4429_v1, %v8759_v60  ;;  %v4588_v10 = vadd.f32 %v8693_v54, %v4587_v9  ;;  %v4548_v1 = vmul.f32 1.442695, %v4469_v21 }
 0xf0a   :  { %v8777_v23 = vadd.f32 %v4375_v48, %v8465_v57  ;;  %v4556_v57 = vmul.f32 1.442695, %v4473_v28  ;;  %v4602_v48 = vadd.f32 %v7000_v18, %v6998_v16  ;;  %7035 = vpow2.f32 %v4554_v56 }
 0xf0b   :  { %4431 = vmax.xlane.f32.xlu1 %v4430_v35  ;;  %v4434_v52 = vmax.f32 %v4433_v55, %v8771_v6  ;;  %v7018_v35 = vpop.eup %7017  ;;  %v4562_v9 = vmul.f32 1.442695, %v4476_v15  ;;  %7037 = vpow2.f32 %v4548_v1  ;;  %v4589_v55 = vadd.f32 %v8699_v38, %v4588_v10 }
 0xf0c   :  { %v7020_v54 = vpop.eup %7019  ;;  %v4598_v61 = vadd.f32 %v8735_v62, %v4597_v53  ;;  %7039 = vpow2.f32 %v4556_v57  ;;  %v4594_v16 = vadd.f32 %v8721_v19, %v4593_v12  ;;  %v4603_v3 = vadd.f32 %v7002_v43, %v4602_v48 }
 0xf0d   :  { %v4435_v45 = vmax.f32 %v4434_v52, %v8777_v23  ;;  %v7022_v39 = vpop.eup %7021  ;;  %v4612_v18 = vadd.f32 %v7016_v42, %v7014_v0  ;;  %7041 = vpow2.f32 %v4562_v9  ;;  %v4564_v21 = vmul.f32 1.442695, %v4477_v27 }
 0xf0e   :  { %v7024_v32 = vpop.eup %7023  ;;  %v4599_v37 = vadd.f32 %v8739_v36, %v4598_v61  ;;  %v4608_v28 = vadd.f32 %v7010_v47, %v4607_v44  ;;  %v4604_v38 = vadd.f32 %v8761_v13, %v4603_v3  ;;  %v4617_v33 = vadd.f32 %v7022_v39, %v7020_v54 }
 0xf0f   :  { %4585 = vadd.xlane.f32.xlu1 %v4584_v41  ;;  %4436 = vmax.xlane.f32.xlu0 %v4435_v45  ;;  %v7026_v24 = vpop.eup %7025  ;;  %v4613_v62 = vadd.f32 %v7018_v35, %v4612_v18  ;;  %7043 = vpow2.f32 %v4564_v21 }
 0xf10   :  { %v7028_v41 = vpop.eup %7027  ;;  %v4622_v8 = vadd.f32 %v7026_v24, %v7024_v32  ;;  %v4609_v42 = vadd.f32 %v7012_v2, %v4608_v28 }
 0xf11   :  { %v7030_v56 = vpop.eup %7029  ;;  %v4614_v43 = vadd.f32 %v7028_v41, %v4613_v62 }
 0xf12   :  { %v7032_v15 = vpop.eup %7031 }
 0xf13   :  { %4595 = vadd.xlane.f32.xlu1 %v4594_v16  ;;  %4590 = vadd.xlane.f32.xlu0 %v4589_v55  ;;  %v7034_v19 = vpop.eup %7033  ;;  %v4627_v1 = vadd.f32 %v7032_v15, %v7030_v56 }
 0xf14   :  { %v7036_v0 = vpop.eup %7035  ;;  %v4618_v10 = vadd.f32 %v7034_v19, %v4617_v33 }
 0xf15   :  { %v4623_v52 = vadd.f32 %v7036_v0, %v4622_v8  ;;  %v7038_v12 = vpop.eup %7037 }
 0xf16   :  { %v7040_v36 = vpop.eup %7039  ;;  %v4619_v53 = vadd.f32 %v7038_v12, %v4618_v10 }
 0xf17   :  { %4605 = vadd.xlane.f32.xlu1 %v4604_v38  ;;  %4600 = vadd.xlane.f32.xlu0 %v4599_v37  ;;  %v7042_v47 = vpop.eup %7041  ;;  %v4624_v13 = vadd.f32 %v7040_v36, %v4623_v52 }
 0xf18   :  { %v4628_v57 = vadd.f32 %v7042_v47, %v4627_v1 }
 0xf19   :  { %v7044_v45 = vpop.eup %7043 }
 0xf1a   :  { %v4629_v48 = vadd.f32 %v7044_v45, %v4628_v57 }
 0xf1b   :  { %4615 = vadd.xlane.f32.xlu1 %v4614_v43  ;;  %4610 = vadd.xlane.f32.xlu0 %v4609_v42 }
 0xf1f   :  { %4625 = vadd.xlane.f32.xlu1 %v4624_v13  ;;  %4620 = vadd.xlane.f32.xlu0 %v4619_v53 }
 0xf23   :  { %4630 = vadd.xlane.f32.xlu0 %v4629_v48 }
 0xf98   :  { %v8793_v35 = vpop.xlane.xlu1 %4431 }
 0xf99   :  { %v4478_v2 = vsub.f32 %v8705_v20, %v8793_v35  ;;  %v4479_v27 = vsub.f32 %v8713_v26, %v8793_v35  ;;  %v4480_v9 = vsub.f32 %v8754_v5, %v8793_v35  ;;  %v4481_v54 = vsub.f32 %v8759_v60, %v8793_v35 }
 0xf9b   :  { %v4566_v39 = vmul.f32 1.442695, %v4478_v2  ;;  %v4568_v55 = vmul.f32 1.442695, %v4479_v27  ;;  %v4570_v61 = vmul.f32 1.442695, %v4480_v9 }
 0xf9c   :  { %v4572_v44 = vmul.f32 1.442695, %v4481_v54  ;;  %v4586_v32 = vpop.xlane.xlu1 %4585  ;;  %v8803_v16 = vpop.xlane.xlu0 %4436 }
 0xf9d   :  { %7045 = vpow2.f32 %v4566_v39  ;;  %v4482_v3 = vsub.f32 %v8748_v4, %v8803_v16  ;;  %v4483_v18 = vsub.f32 %v8751_v31, %v8803_v16  ;;  %v4484_v24 = vsub.f32 %v8771_v6, %v8803_v16 }
 0xf9e   :  { %7047 = vpow2.f32 %v4568_v55  ;;  %v4485_v21 = vsub.f32 %v8777_v23, %v8803_v16 }
 0xf9f   :  { %7049 = vpow2.f32 %v4570_v61  ;;  %v4574_v41 = vmul.f32 1.442695, %v4482_v3  ;;  %v4576_v37 = vmul.f32 1.442695, %v4483_v18  ;;  %v4578_v28 = vmul.f32 1.442695, %v4484_v24 }
 0xfa0   :  { %7051 = vpow2.f32 %v4572_v44  ;;  %v4596_v56 = vpop.xlane.xlu1 %4595  ;;  %v4591_v38 = vpop.xlane.xlu0 %4590  ;;  %v4580_v62 = vmul.f32 1.442695, %v4485_v21 }
 0xfa1   :  { %7053 = vlog2.f32 %v4586_v32 }
 0xfa2   :  { %7055 = vpow2.f32 %v4574_v41 }
 0xfa3   :  { %7057 = vpow2.f32 %v4576_v37 }
 0xfa4   :  { %7059 = vpow2.f32 %v4578_v28  ;;  %v4606_v8 = vpop.xlane.xlu1 %4605  ;;  %v4601_v33 = vpop.xlane.xlu0 %4600 }
 0xfa5   :  { %7061 = vpow2.f32 %v4580_v62 }
 0xfa6   :  { %7063 = vlog2.f32 %v4596_v56 }
 0xfa7   :  { %v7046_v15 = vpop.eup %7045  ;;  %7065 = vlog2.f32 %v4591_v38 }
 0xfa8   :  { %v7048_v19 = vpop.eup %7047  ;;  %7067 = vlog2.f32 %v4606_v8  ;;  %v4616_v0 = vpop.xlane.xlu1 %4615 }
 0xfa9   :  { %v4611_v42 = vpop.xlane.xlu0 %4610  ;;  %v7050_v43 = vpop.eup %7049  ;;  %7069 = vlog2.f32 %v4601_v33  ;;  %v4632_v52 = vadd.f32 %v7048_v19, %v7046_v15  ;;  %v8982_v15 = vld [vmem:[#allocation21_spill] sm:$0xff] }
 0xfaa   :  { %v7052_v10 = vpop.eup %7051  ;;  %7071 = vlog2.f32 %v4616_v0  ;;  %v8983_v0 = vld [vmem:[#allocation22_spill] sm:$0xff] }
 0xfab   :  { %v7054_v1 = vpop.eup %7053  ;;  %7073 = vlog2.f32 %v4611_v42  ;;  %v4633_v12 = vadd.f32 %v7050_v43, %v4632_v52  ;;  %v8984_v42 = vld [vmem:[#allocation23_spill] sm:$0xff]  ;;  %v8985_v52 = vld [vmem:[#allocation24_spill] sm:$0xff] }
 0xfac   :  { %v7056_v36 = vpop.eup %7055  ;;  %v4643_v47 = vmul.f32 0.6931472, %v7054_v1  ;;  %v4626_v13 = vpop.xlane.xlu1 %4625  ;;  %v8987_v1 = vld [vmem:[#allocation50_spill] sm:$0xff] }
 0xfad   :  { %v4621_v53 = vpop.xlane.xlu0 %4620  ;;  %v7058_v57 = vpop.eup %7057  ;;  %7075 = vlog2.f32 %v4626_v13  ;;  %v4634_v45 = vadd.f32 %v7052_v10, %v4633_v12  ;;  %v8988_v13 = vld [vmem:[#allocation28_spill] sm:$0xff] }
 0xfae   :  { %v7060_v48 = vpop.eup %7059  ;;  %v4666_v2 = vadd.f32 %v4643_v47, %v8629_v25  ;;  %v4637_v27 = vadd.f32 %v7058_v57, %v7056_v36  ;;  %7077 = vlog2.f32 %v4621_v53  ;;  %v8989_v57 = vld [vmem:[#allocation30_spill] sm:$0xff] }
 0xfaf   :  { %v7062_v9 = vpop.eup %7061  ;;  %4635 = vadd.xlane.f32.xlu1 %v4634_v45 }
 0xfb0   :  { %v7064_v54 = vpop.eup %7063  ;;  %v4678_v39 = vsub.f32 %v8460_v30, %v4666_v2  ;;  %v4679_v55 = vsub.f32 %v8463_v49, %v4666_v2  ;;  %v4680_v61 = vsub.f32 %v8468_v17, %v4666_v2  ;;  %v4681_v44 = vsub.f32 %v8476_v51, %v4666_v2 }
 0xfb1   :  { %v4631_v32 = vpop.xlane.xlu0 %4630  ;;  %v7066_v3 = vpop.eup %7065  ;;  %v4647_v18 = vmul.f32 0.6931472, %v7064_v54  ;;  %v4638_v24 = vadd.f32 %v7060_v48, %v4637_v27  ;;  %v8990_v48 = vld [vmem:[#allocation31_spill] sm:$0xff]  ;;  %v8991_v27 = vld [vmem:[#allocation33_spill] sm:$0xff] }
 0xfb2   :  { %7079 = vlog2.f32 %v4631_v32  ;;  %v7068_v21 = vpop.eup %7067  ;;  %4726 = vst [vmem:[#allocation13] sm:$0xff] %v4678_v39  ;;  %4727 = vst [vmem:[#allocation13 + $0x8] sm:$0xff] %v4679_v55  ;;  %v4645_v25 = vmul.f32 0.6931472, %v7066_v3  ;;  %v8992_v54 = vld [vmem:[#allocation25_spill] sm:$0xff]  ;;  %v8993_v55 = vld [vmem:[#allocation26_spill] sm:$0xff] }
 0xfb3   :  { %4728 = vst [vmem:[#allocation13 + $0x10] sm:$0xff] %v4680_v61  ;;  %4729 = vst [vmem:[#allocation13 + $0x18] sm:$0xff] %v4681_v44  ;;  %v7070_v41 = vpop.eup %7069  ;;  %v4668_v30 = vadd.f32 %v4647_v18, %v8641_v29  ;;  %v4651_v37 = vmul.f32 0.6931472, %v7068_v21  ;;  %v4639_v49 = vadd.f32 %v7062_v9, %v4638_v24  ;;  %v8994_v44 = vld [vmem:[#allocation27_spill] sm:$0xff]  ;;  %v8995_v3 = vld [vmem:[#allocation29_spill] sm:$0xff] }
 0xfb4   :  { %v7072_v28 = vpop.eup %7071  ;;  %v4667_v17 = vadd.f32 %v4645_v25, %v8635_v63  ;;  %v4649_v51 = vmul.f32 0.6931472, %v7070_v41  ;;  %v8996_v25 = vld [vmem:[#allocation52_spill] sm:$0xff] }
 0xfb5   :  { %v7074_v56 = vpop.eup %7073  ;;  %v4686_v38 = vsub.f32 %v8489_v14, %v4668_v30  ;;  %v4687_v62 = vsub.f32 %v8495_v7, %v4668_v30  ;;  %v4688_v8 = vsub.f32 %v8500_v59, %v4668_v30  ;;  %v4689_v33 = vsub.f32 %v8509_v58, %v4668_v30  ;;  %4640 = vadd.xlane.f32.xlu0 %v4639_v49  ;;  %v8986_v14 = vld [vmem:[#allocation51_spill] sm:$0xff] }
 0xfb6   :  { %v4682_v19 = vsub.f32 %v8982_v15, %v4667_v17  ;;  %v4683_v29 = vsub.f32 %v8983_v0, %v4667_v17  ;;  %v4684_v43 = vsub.f32 %v8984_v42, %v4667_v17  ;;  %v4685_v10 = vsub.f32 %v8985_v52, %v4667_v17  ;;  %v9001_v15 = vld [vmem:[#allocation32_spill] sm:$0xff]  ;;  %v9004_v42 = vld [vmem:[#allocation37_spill] sm:$0xff] }
 0xfb7   :  { %v7076_v63 = vpop.eup %7075  ;;  %4734 = vst [vmem:[#allocation13 + $0x40] sm:$0xff] %v4686_v38  ;;  %4735 = vst [vmem:[#allocation13 + $0x48] sm:$0xff] %v4687_v62  ;;  %v4670_v7 = vadd.f32 %v4651_v37, %v8986_v14  ;;  %v4669_v59 = vadd.f32 %v4649_v51, %v8987_v1  ;;  %v4655_v12 = vmul.f32 0.6931472, %v7072_v28  ;;  %v4653_v58 = vmul.f32 0.6931472, %v7074_v56 }
 0xfb8   :  { %4736 = vst [vmem:[#allocation13 + $0x50] sm:$0xff] %v4688_v8  ;;  %4737 = vst [vmem:[#allocation13 + $0x58] sm:$0xff] %v4689_v33  ;;  %v4659_v36 = vmul.f32 0.6931472, %v7076_v63  ;;  %v7078_v47 = vpop.eup %7077  ;;  %v8997_v28 = vld [vmem:[#allocation36_spill] sm:$0xff]  ;;  %v8998_v51 = vld [vmem:[#allocation38_spill] sm:$0xff] }
 0xfb9   :  { %4730 = vst [vmem:[#allocation13 + $0x20] sm:$0xff] %v4682_v19  ;;  %4731 = vst [vmem:[#allocation13 + $0x28] sm:$0xff] %v4683_v29  ;;  %v4694_v53 = vsub.f32 %v8988_v13, %v4670_v7  ;;  %v4695_v45 = vsub.f32 %v8989_v57, %v4670_v7  ;;  %v4696_v2 = vsub.f32 %v8990_v48, %v4670_v7  ;;  %v4657_v37 = vmul.f32 0.6931472, %v7078_v47  ;;  %v8999_v38 = vld [vmem:[#allocation39_spill] sm:$0xff]  ;;  %v9000_v8 = vld [vmem:[#allocation41_spill] sm:$0xff] }
 0xfba   :  { %4732 = vst [vmem:[#allocation13 + $0x30] sm:$0xff] %v4684_v43  ;;  %4733 = vst [vmem:[#allocation13 + $0x38] sm:$0xff] %v4685_v10  ;;  %v4697_v9 = vsub.f32 %v8991_v27, %v4670_v7  ;;  %v4690_v39 = vsub.f32 %v8992_v54, %v4669_v59  ;;  %v4691_v61 = vsub.f32 %v8993_v55, %v4669_v59  ;;  %v9002_v19 = vld [vmem:[#allocation34_spill] sm:$0xff]  ;;  %v9003_v29 = vld [vmem:[#allocation35_spill] sm:$0xff] }
 0xfbb   :  { %v4692_v32 = vsub.f32 %v8994_v44, %v4669_v59  ;;  %v4693_v18 = vsub.f32 %v8995_v3, %v4669_v59  ;;  %4742 = vst [vmem:[#allocation13 + $0x80] sm:$0xff] %v4694_v53  ;;  %4743 = vst [vmem:[#allocation13 + $0x88] sm:$0xff] %v4695_v45  ;;  %v4672_v21 = vadd.f32 %v4655_v12, %v8687_v46  ;;  %v9005_v52 = vld [vmem:[#allocation44_spill] sm:$0xff]  ;;  %v9006_v63 = vld [vmem:[#allocation46_spill] sm:$0xff] }
 0xfbc   :  { %v7080_v24 = vpop.eup %7079  ;;  %4744 = vst [vmem:[#allocation13 + $0x90] sm:$0xff] %v4696_v2  ;;  %4745 = vst [vmem:[#allocation13 + $0x98] sm:$0xff] %v4697_v9  ;;  %v4671_v41 = vadd.f32 %v4653_v58, %v8996_v25  ;;  %v4674_v30 = vadd.f32 %v4659_v36, %v8709_v40  ;;  %v9007_v59 = vld [vmem:[#allocation53_spill] sm:$0xff]  ;;  %v9008_v36 = vld [vmem:[#allocation40_spill] sm:$0xff] }
 0xfbd   :  { %4738 = vst [vmem:[#allocation13 + $0x60] sm:$0xff] %v4690_v39  ;;  %4739 = vst [vmem:[#allocation13 + $0x68] sm:$0xff] %v4691_v61  ;;  %v4661_v49 = vmul.f32 0.6931472, %v7080_v24  ;;  %v4702_v17 = vsub.f32 %v8997_v28, %v4672_v21  ;;  %v4703_v56 = vsub.f32 %v8998_v51, %v4672_v21  ;;  %v4704_v62 = vsub.f32 %v8999_v38, %v4672_v21  ;;  %v9009_v13 = vld [vmem:[#allocation42_spill] sm:$0xff]  ;;  %v9010_v57 = vld [vmem:[#allocation43_spill] sm:$0xff] }
 0xfbe   :  { %4740 = vst [vmem:[#allocation13 + $0x70] sm:$0xff] %v4692_v32  ;;  %4741 = vst [vmem:[#allocation13 + $0x78] sm:$0xff] %v4693_v18  ;;  %v4705_v33 = vsub.f32 %v9000_v8, %v4672_v21  ;;  %v4698_v46 = vsub.f32 %v9001_v15, %v4671_v41  ;;  %v4699_v0 = vsub.f32 %v9002_v19, %v4671_v41  ;;  %v9011_v45 = vld [vmem:[#allocation45_spill] sm:$0xff]  ;;  %v9012_v48 = vld [vmem:[#allocation47_spill] sm:$0xff] }
 0xfbf   :  { %v4700_v40 = vsub.f32 %v9003_v29, %v4671_v41  ;;  %v4701_v43 = vsub.f32 %v9004_v42, %v4671_v41  ;;  %4750 = vst [vmem:[#allocation13 + $0xc0] sm:$0xff] %v4702_v17  ;;  %4751 = vst [vmem:[#allocation13 + $0xc8] sm:$0xff] %v4703_v56  ;;  %v4710_v10 = vsub.f32 %v9005_v52, %v4674_v30  ;;  %v9013_v27 = vld [vmem:[#allocation48_spill] sm:$0xff]  ;;  %v9014_v54 = vld [vmem:[#allocation49_spill] sm:$0xff] }
 0xfc0   :  { %4752 = vst [vmem:[#allocation13 + $0xd0] sm:$0xff] %v4704_v62  ;;  %4753 = vst [vmem:[#allocation13 + $0xd8] sm:$0xff] %v4705_v33  ;;  %v4711_v14 = vsub.f32 %v9006_v63, %v4674_v30  ;;  %v4712_v7 = vsub.f32 %v8599_v34, %v4674_v30  ;;  %v4713_v1 = vsub.f32 %v8608_v11, %v4674_v30 }
 0xfc1   :  { %4746 = vst [vmem:[#allocation13 + $0xa0] sm:$0xff] %v4698_v46  ;;  %4747 = vst [vmem:[#allocation13 + $0xa8] sm:$0xff] %v4699_v0  ;;  %v4673_v12 = vadd.f32 %v4657_v37, %v9007_v59  ;;  %v4675_v58 = vadd.f32 %v4661_v49, %v8729_v50 }
 0xfc2   :  { %4748 = vst [vmem:[#allocation13 + $0xb0] sm:$0xff] %v4700_v40  ;;  %4749 = vst [vmem:[#allocation13 + $0xb8] sm:$0xff] %v4701_v43 }
 0xfc3   :  { %4758 = vst [vmem:[#allocation13 + $0x100] sm:$0xff] %v4710_v10  ;;  %4759 = vst [vmem:[#allocation13 + $0x108] sm:$0xff] %v4711_v14  ;;  %v4706_v47 = vsub.f32 %v9008_v36, %v4673_v12  ;;  %v4707_v53 = vsub.f32 %v9009_v13, %v4673_v12  ;;  %v4708_v34 = vsub.f32 %v9010_v57, %v4673_v12 }
 0xfc4   :  { %4760 = vst [vmem:[#allocation13 + $0x110] sm:$0xff] %v4712_v7  ;;  %4761 = vst [vmem:[#allocation13 + $0x118] sm:$0xff] %v4713_v1  ;;  %v4709_v11 = vsub.f32 %v9011_v45, %v4673_v12  ;;  %v4714_v2 = vsub.f32 %v9012_v48, %v4675_v58  ;;  %v4715_v9 = vsub.f32 %v9013_v27, %v4675_v58 }
 0xfc5   :  { %v4716_v39 = vsub.f32 %v9014_v54, %v4675_v58  ;;  %v4717_v50 = vsub.f32 %v8625_v22, %v4675_v58  ;;  %4754 = vst [vmem:[#allocation13 + $0xe0] sm:$0xff] %v4706_v47  ;;  %4755 = vst [vmem:[#allocation13 + $0xe8] sm:$0xff] %v4707_v53 }
 0xfc6   :  { %4756 = vst [vmem:[#allocation13 + $0xf0] sm:$0xff] %v4708_v34  ;;  %4757 = vst [vmem:[#allocation13 + $0xf8] sm:$0xff] %v4709_v11 }
 0xfc7   :  { %4762 = vst [vmem:[#allocation13 + $0x120] sm:$0xff] %v4714_v2  ;;  %4763 = vst [vmem:[#allocation13 + $0x128] sm:$0xff] %v4715_v9 }
 0xfc8   :  { %4764 = vst [vmem:[#allocation13 + $0x130] sm:$0xff] %v4716_v39  ;;  %4765 = vst [vmem:[#allocation13 + $0x138] sm:$0xff] %v4717_v50 }
 0xfc9   :  { %7206 = shalt.err (!%p7203_p2)
}
 0xfca   :  { %s7207_s20 = scalar_lea.hbm %s8912_s12, 128 }
 0xfcb   :  { %p7208_p3 = scmp.ne.s32.totalorder %s8912_s12, %s7207_s20  ;;  %p7211_p4 = scmp.lt.u32.totalorder %s7207_s20, %s8912_s12 }
 0xfcd   :  { %p7213_p5 = pnand %p7211_p4, %p7208_p3 }
 0xfcf   :  { %7216 = shalt.err (!%p7213_p5)
}
 0xfd0   :  { %4795 = dma.vmem_to_hbm [thread:$0]  %s4793_s6, 128, %s8912_s12, [#allocation15]  }
 0xfd1   :  { %s7266_s12 = smov [#allocation13]  }
 0xfd2   :  { %s4779_s27 = sshll.u32 %s7266_s12, 4  ;;  %s4780_s27 = int_to_ptr.vmem [resolvable:$true] %s4779_s27 }
 0xfd3   :  { %s7217_s4 = scalar_lea.vmem %s4780_s27, 6144  ;;  %p7222_p7 = scmp.lt.s32.totalorder %s4780_s27, %s4780_s27 }
 0xfd4   :  { %p7218_p6 = scmp.ne.s32.totalorder %s4780_s27, %s7217_s4  ;;  %p7223_p8 = scmp.lt.s32.totalorder %s7217_s4, %s7217_s4 }
 0xfd6   :  { %p7224_p9 = por %p7223_p8, %p7222_p7 }
 0xfd8   :  { %p7225_p10 = pnand %p7224_p9, %p7218_p6 }
0x103c   :  { %v4636_v22 = vpop.xlane.xlu1 %4635 }
0x103d   :  { %7081 = vlog2.f32 %v4636_v22 }
0x1042   :  { %v4641_v55 = vpop.xlane.xlu0 %4640 }
0x1043   :  { %7083 = vlog2.f32 %v4641_v55 }
0x1047   :  { %v7082_v61 = vpop.eup %7081 }
0x1048   :  { %v4663_v44 = vmul.f32 0.6931472, %v7082_v61 }
0x104a   :  { %v4676_v32 = vadd.f32 %v4663_v44, %v8793_v35 }
0x104c   :  { %v4718_v3 = vsub.f32 %v8705_v20, %v4676_v32  ;;  %v4719_v18 = vsub.f32 %v8713_v26, %v4676_v32  ;;  %v4720_v24 = vsub.f32 %v8754_v5, %v4676_v32  ;;  %v4721_v21 = vsub.f32 %v8759_v60, %v4676_v32 }
0x104d   :  { %v7084_v25 = vpop.eup %7083 }
0x104e   :  { %4766 = vst [vmem:[#allocation13 + $0x140] sm:$0xff] %v4718_v3  ;;  %4767 = vst [vmem:[#allocation13 + $0x148] sm:$0xff] %v4719_v18  ;;  %v4665_v41 = vmul.f32 0.6931472, %v7084_v25 }
0x104f   :  { %4768 = vst [vmem:[#allocation13 + $0x150] sm:$0xff] %v4720_v24  ;;  %4769 = vst [vmem:[#allocation13 + $0x158] sm:$0xff] %v4721_v21 }
0x1050   :  { %v4677_v30 = vadd.f32 %v4665_v41, %v8803_v16 }
0x1052   :  { %v4722_v35 = vsub.f32 %v8748_v4, %v4677_v30  ;;  %v4723_v20 = vsub.f32 %v8751_v31, %v4677_v30  ;;  %v4724_v26 = vsub.f32 %v8771_v6, %v4677_v30  ;;  %v4725_v5 = vsub.f32 %v8777_v23, %v4677_v30 }
0x1054   :  { %4770 = vst [vmem:[#allocation13 + $0x160] sm:$0xff] %v4722_v35  ;;  %4771 = vst [vmem:[#allocation13 + $0x168] sm:$0xff] %v4723_v20 }
0x1055   :  { %4772 = vst [vmem:[#allocation13 + $0x170] sm:$0xff] %v4724_v26  ;;  %4773 = vst [vmem:[#allocation13 + $0x178] sm:$0xff] %v4725_v5 }
0x1056   :  { %7228 = shalt.err (!%p7225_p10)
}
0x1057   :  { %s7229_s28 = scalar_lea.hbm %s8911_s11, 6144 }
0x1058   :  { %p7230_p11 = scmp.ne.s32.totalorder %s8911_s11, %s7229_s28  ;;  %p7233_p12 = scmp.lt.u32.totalorder %s7229_s28, %s8911_s11 }
0x105a   :  { %p7235_p13 = pnand %p7233_p12, %p7230_p11 }
0x105c   :  { %7238 = shalt.err (!%p7235_p13)
}
0x105d   :  { %4785 = dma.vmem_to_hbm [thread:$0]  %s4780_s27, 6144, %s8911_s11, [#allocation6], %s7258_s5, %s7258_s5, %s7259_s13  }
0x105e   :  { %7245 = dma.done.wait [#allocation6], 6144  }
0x105f   :  { %7246 = vsyncadd [#allocation6], 4294961152 }
0x1060   :  { %7247 = dma.done.wait [#allocation15], 128  }
0x1061   :  { %7248 = vsyncadd [#allocation15], 4294967168 }
0x1062   :  { %4802 = vsyncpa [#allocation5], 1 }
0x1063   :  { %4803 = vsyncpa [#allocation8], 1 }
0x1064   :  { %4804 = vsyncpa [#allocation11], 1 }
0x1065   :  { %4805 = vsyncpa [#allocation6], 1 }
0x1066   :  { %4806 = vsyncpa [#allocation15], 1 }

</bundles_post_ra>
